<compile_context>
chip_gen: v7x
topology: tpu7x:2x2x1
jax: 0.10.0
libtpu: 0.0.40
codegen_flags: <defaults>
</compile_context>

<pallas_src>
import functools

import jax
import jax.numpy as jnp
from jax.experimental import pallas as pl
from jax.experimental.pallas import tpu as pltpu

MXU_DTYPE = jnp.bfloat16  # MXU operand dtype; accumulation is always f32.


# ----------------------------------------------------------------------------- kernel

def _fused_forward_kernel(
    patches_ref, emb_ref, kbias_ref, patch_w_ref,
    ln1_g_ref, ln1_b_ref, wqkv_ref, wo_ref, bo_ref,
    ln2_g_ref, ln2_b_ref, w1_ref, b1_ref, w2_ref, b2_ref,
    lnf_g_ref, lnf_b_ref, head_w_ref, head_b_ref,
    out_ref,
    h_ref,
    *, batch_block, t_pad, heads, dim_head, eps, mxu_dtype):
  """Grid point (b, l): transformer layer l on a block of `batch_block` ECGs.

  Activations stay flattened as (batch_block*t_pad, D) in the VMEM scratch
  h_ref for the whole forward (no HBM round trips); per-layer weights are
  streamed by the depth grid axis (double-buffered by BlockSpec).
  """
  l = pl.program_id(1)
  n_layers = pl.num_programs(1)
  rows, d_model = h_ref.shape
  inner = heads * dim_head
  scale = float(dim_head) ** -0.5

  def mm(x, w):
    # activations cast to bf16 once per matmul; weights are already bf16 in HBM.
    return jnp.dot(x.astype(mxu_dtype), w, preferred_element_type=jnp.float32)

  def layernorm(x, g, b):
    mu = jnp.mean(x, axis=-1, keepdims=True)
    xc = x - mu
    var = jnp.mean(xc * xc, axis=-1, keepdims=True)
    return xc * jax.lax.rsqrt(var + eps) * g + b

  # ---- l == 0: patch embedding.  Host pre-pads patches (zero CLS/pad rows) and
  # pre-folds cls/pos/chan/time embeddings + patch bias into emb, so this is a
  # single full-block matmul + add (no concatenate, no output zero-fill).
  @pl.when(l == 0)
  def _init():
    h_ref[...] = mm(patches_ref[...], patch_w_ref[...]) + emb_ref[...]

  h = h_ref[...]                                                   # (rows, D) f32

  # ---------------- pre-norm attention --------------------------------------
  hn = layernorm(h, ln1_g_ref[0], ln1_b_ref[0])
  qkv = mm(hn, wqkv_ref[0])                                        # (rows, 3*inner) f32
  # reshape in f32 (t_pad is a multiple of 16 -> tile-aligned split), cast once
  qkv = qkv.reshape(batch_block, t_pad, 3 * inner).astype(mxu_dtype)
  kbias = kbias_ref[...].reshape(1, 1, t_pad)                      # mask padded keys

  o_heads = []
  for hh in range(heads):              # static unroll; heads is small & known
    lo = hh * dim_head
    q_h = qkv[:, :, lo:lo + dim_head]                              # (Bt, T, dh) bf16
    k_h = qkv[:, :, inner + lo:inner + lo + dim_head]
    v_h = qkv[:, :, 2 * inner + lo:2 * inner + lo + dim_head]
    s = jnp.einsum('bqd,bkd->bqk', q_h, k_h,
                   preferred_element_type=jnp.float32) * scale     # (Bt, T, T) f32
    s = s + kbias
    s = s - jnp.max(s, axis=-1, keepdims=True)
    p = jnp.exp(s)
    p = p * pl.reciprocal(jnp.sum(p, axis=-1, keepdims=True), approx=True)  # EUP
    o_heads.append(jnp.einsum('bqk,bkd->bqd', p.astype(mxu_dtype), v_h,
                              preferred_element_type=jnp.float32))
  # fused output projection: one K=inner matmul instead of `heads` K=dh matmuls
  o_all = jnp.concatenate(o_heads, axis=-1).reshape(rows, inner)
  h = h + mm(o_all, wo_ref[0]) + bo_ref[0]

  # ---------------- pre-norm MLP ---------------------------------------------
  hn2 = layernorm(h, ln2_g_ref[0], ln2_b_ref[0])
  m = mm(hn2, w1_ref[0]) + b1_ref[0]
  m = jax.nn.gelu(m, approximate=True)    # tanh GELU -> EUP slot (vs erf on VALU)
  m = mm(m, w2_ref[0]) + b2_ref[0]
  h = h + m
  h_ref[...] = h

  # ---- l == depth-1: final LN on the CLS rows + classification head ----------
  @pl.when(l == n_layers - 1)
  def _head():
    cls = h.reshape(batch_block, t_pad, d_model)[:, 0, :]          # (Bt, D)
    cls = layernorm(cls, lnf_g_ref[...], lnf_b_ref[...])
    logits = mm(cls, head_w_ref[...]) + head_b_ref[...]            # (Bt, NC_pad)
    out_ref[...] = logits.reshape(out_ref.shape).astype(out_ref.dtype)


# ----------------------------------------------------------------------------- parameters

def init_params(key, *, num_leads, seq_len, time_window, embed_dim, depth, heads,
                dim_head, mlp_dim, num_classes):
  """Per-layer weights are stored stacked as (depth, ...) arrays so the kernel's
  depth grid axis can block-index them (double-buffered weight streaming)."""
  inner = heads * dim_head
  n_time = seq_len // time_window
  n_tok = num_leads * n_time
  keys = iter(jax.random.split(key, 32))

  def u(shape):
    # mirrors randomly_initialize_weights: uniform [-0.1, 0.1]
    return jax.random.uniform(next(keys), shape, jnp.float32, -0.1, 0.1)

  return {
      "patch_w": u((time_window, embed_dim)), "patch_b": u((embed_dim,)),
      "cls": u((1, 1, embed_dim)),
      "pos": u((1, n_tok + 1, embed_dim)),
      "chan_emb": u((num_leads, embed_dim)),
      "time_emb": u((n_time, embed_dim)),
      # stacked transformer layer params (depth, ...)
      "ln1_g": u((depth, 1, embed_dim)), "ln1_b": u((depth, 1, embed_dim)),
      "wqkv": u((depth, embed_dim, 3 * inner)),                     # to_qkv, bias=False
      "wo": u((depth, inner, embed_dim)), "bo": u((depth, 1, embed_dim)),
      "ln2_g": u((depth, 1, embed_dim)), "ln2_b": u((depth, 1, embed_dim)),
      "w1": u((depth, embed_dim, mlp_dim)), "b1": u((depth, 1, mlp_dim)),
      "w2": u((depth, mlp_dim, embed_dim)), "b2": u((depth, 1, embed_dim)),
      # final norm + classifier head
      "ln_f_g": u((embed_dim,)), "ln_f_b": u((embed_dim,)),
      "head_w": u((embed_dim, num_classes)), "head_b": u((num_classes,)),
  }


# ----------------------------------------------------------------------------- forward

def st_ecgformer_classifier_forward(params, x, in_chan_matrix=None, in_time_matrix=None,
                                    *, heads, dim_head, batch_block=None,
                                    return_all_tokens=True):
  # TODO(synk): return_all_tokens only affects the backbone's return value; the
  # classifier always reads token 0, so it is a no-op here.
  del return_all_tokens
  B, C, L = x.shape
  tw, D = params["patch_w"].shape
  n_time = L // tw
  N = C * n_time
  T = N + 1
  T_pad = ((T + 15) // 16) * 16         # multiple of 16: clean f32 & bf16 sublane tiles
  depth = params["wqkv"].shape[0]
  inner = heads * dim_head
  mlp_dim = params["w1"].shape[-1]
  NC = params["head_w"].shape[-1]
  NC_pad = ((NC + 127) // 128) * 128    # lane-dense logits slab

  if batch_block is None:
    batch_block = 1
    for cand in (8, 4, 2, 1):
      if B % cand == 0:
        batch_block = cand
        break
  assert B % batch_block == 0, "batch must be divisible by batch_block"
  nb = B // batch_block                 # keep >= 2 (and even) to use both TCs on v7x
  rows = batch_block * T_pad

  # ---- host glue --------------------------------------------------------------
  # Patches padded to (B, T_pad, tw): row 0 (CLS slot) and pad rows are zero, so
  # the kernel init is a single full-block matmul (no in-kernel concatenate).
  patches = x.reshape(B, N, tw).astype(jnp.float32)
  patches_pad = jnp.zeros((B, T_pad, tw), jnp.float32).at[:, 1:1 + N, :].set(patches)
  patches_flat = patches_pad.reshape(B * T_pad, tw)

  if in_chan_matrix is None:
    in_chan_matrix = jnp.broadcast_to(jnp.arange(C)[:, None], (C, n_time))
  if in_time_matrix is None:
    in_time_matrix = jnp.broadcast_to(jnp.arange(n_time)[None, :], (C, n_time))
  # TODO(synk): exact chan/time embedding composition of the original ST_ECGFormer
  # backbone is unknown (source not provided); additive lookup tables are used.
  ce = params["chan_emb"][in_chan_matrix.reshape(-1)]               # (N, D)
  te = params["time_emb"][in_time_matrix.reshape(-1)]               # (N, D)
  emb = jnp.zeros((T_pad, D), jnp.float32)
  emb = emb.at[0].set(params["cls"][0, 0] + params["pos"][0, 0])
  emb = emb.at[1:1 + N].set(ce + te + params["pos"][0, 1:1 + N]
                            + params["patch_b"][None, :])
  emb_tiled = jnp.tile(emb, (batch_block, 1))                       # (rows, D) resident

  # additive key mask for padded token positions (precomputed, resident)
  kbias = jnp.where(jnp.arange(T_pad) < T, 0.0, -1e30).astype(jnp.float32)
  kbias = kbias.reshape(1, T_pad)

  # Weights feeding the MXU are stored bf16 in HBM: halves the per-layer DMA
  # stream and removes per-matmul weight casts (accumulation stays f32).
  bf16 = lambda a: a.astype(MXU_DTYPE)
  patch_w = bf16(params["patch_w"])
  wqkv, wo = bf16(params["wqkv"]), bf16(params["wo"])
  w1, w2 = bf16(params["w1"]), bf16(params["w2"])
  head_w = bf16(jnp.pad(params["head_w"], ((0, 0), (0, NC_pad - NC))))
  head_b = jnp.pad(params["head_b"], (0, NC_pad - NC)).reshape(1, NC_pad)
  lnf_g = params["ln_f_g"].reshape(1, D)
  lnf_b = params["ln_f_b"].reshape(1, D)

  kern = functools.partial(
      _fused_forward_kernel,
      batch_block=batch_block, t_pad=T_pad, heads=heads, dim_head=dim_head,
      eps=1e-5, mxu_dtype=MXU_DTYPE)

  idx_batch = lambda b, l: (b, 0)       # per-batch-block inputs
  idx_const2 = lambda b, l: (0, 0)      # shared resident 2-D arrays
  idx_layer = lambda b, l: (l, 0, 0)    # stacked (depth, ...) per-layer weights
  idx_out = lambda b, l: (b, 0, 0)

  in_specs = [
      pl.BlockSpec((rows, tw), idx_batch),          # patches (pre-padded, flattened)
      pl.BlockSpec((rows, D), idx_const2),          # folded token embeddings
      pl.BlockSpec((1, T_pad), idx_const2),         # key mask bias
      pl.BlockSpec((tw, D), idx_const2),            # patch_w (bf16)
      pl.BlockSpec((1, 1, D), idx_layer),           # ln1_g
      pl.BlockSpec((1, 1, D), idx_layer),           # ln1_b
      pl.BlockSpec((1, D, 3 * inner), idx_layer),   # wqkv (bf16, bias=False)
      pl.BlockSpec((1, inner, D), idx_layer),       # wo (bf16)
      pl.BlockSpec((1, 1, D), idx_layer),           # bo
      pl.BlockSpec((1, 1, D), idx_layer),           # ln2_g
      pl.BlockSpec((1, 1, D), idx_layer),           # ln2_b
      pl.BlockSpec((1, D, mlp_dim), idx_layer),     # w1 (bf16)
      pl.BlockSpec((1, 1, mlp_dim), idx_layer),     # b1
      pl.BlockSpec((1, mlp_dim, D), idx_layer),     # w2 (bf16)
      pl.BlockSpec((1, 1, D), idx_layer),           # b2
      pl.BlockSpec((1, D), idx_const2),             # ln_f_g
      pl.BlockSpec((1, D), idx_const2),             # ln_f_b
      pl.BlockSpec((D, NC_pad), idx_const2),        # head_w (bf16, zero-padded)
      pl.BlockSpec((1, NC_pad), idx_const2),        # head_b
  ]

  # ---- cost estimate + explicit VMEM budget (kept <= 64 MiB for v7x) ----------
  layer_w_bytes = 2 * (D * 3 * inner + inner * D + 2 * D * mlp_dim)   # bf16 bytes/layer
  layer_small_bytes = 4 * (6 * D + mlp_dim)                           # f32 LN/bias rows
  flops = int(2 * B * (
      T_pad * tw * D
      + depth * (T_pad * D * 3 * inner + 2 * heads * T_pad * T_pad * dim_head
                 + T_pad * inner * D + 2 * T_pad * D * mlp_dim)
      + D * NC_pad))
  transcendentals = int(B * depth * (heads * T_pad * T_pad + T_pad * mlp_dim))
  bytes_accessed = int(nb * depth * (layer_w_bytes + layer_small_bytes)
                       + B * T_pad * tw * 4 + B * NC_pad * 4
                       + rows * D * 4 + (tw * D + D * NC_pad) * 2)
  cost = pl.CostEstimate(flops=flops, transcendentals=transcendentals,
                         bytes_accessed=bytes_accessed)

  stream_bytes = 2 * (rows * tw * 4 + batch_block * NC_pad * 4
                      + layer_w_bytes + layer_small_bytes)            # double-buffered
  resident_bytes = (2 * rows * D * 4                                  # emb_tiled + h scratch
                    + (tw * D + D * NC_pad) * 2
                    + (T_pad + 2 * D + NC_pad) * 4)
  work_bytes = 8 * rows * max(3 * inner, mlp_dim, heads * T_pad) * 4  # temporaries
  vmem_limit = int(min(64 << 20,
                       max(16 << 20, 2 * (stream_bytes + resident_bytes + work_bytes))))

  # TODO(synk): on v5e/v6e (128 MiB VMEM) the whole bf16 weight stack could be made
  # VMEM-resident (constant index maps + in-kernel depth fori_loop); depth
  # streaming is kept here so the same tiling also fits v7x's 64 MiB VMEM.
  out = pl.pallas_call(
      kern,
      grid=(nb, depth),
      in_specs=in_specs,
      out_specs=pl.BlockSpec((1, batch_block, NC_pad), idx_out),
      out_shape=jax.ShapeDtypeStruct((nb, batch_block, NC_pad), jnp.float32),
      scratch_shapes=[pltpu.VMEM((rows, D), jnp.float32)],            # resident activations
      compiler_params=pltpu.CompilerParams(
          dimension_semantics=("parallel", "arbitrary"),
          vmem_limit_bytes=vmem_limit),
      cost_estimate=cost,
  )(patches_flat, emb_tiled, kbias, patch_w,
    params["ln1_g"], params["ln1_b"], wqkv, wo, params["bo"],
    params["ln2_g"], params["ln2_b"], w1, params["b1"], w2, params["b2"],
    lnf_g, lnf_b, head_w, head_b)

  return out.reshape(B, NC_pad)[:, :NC]                               # (B, num_classes)


# ----------------------------------------------------------------------------- main

if __name__ == "__main__":
  # small, module-consistent sizes
  B = 4             # batch
  C = 4             # ECG leads (channels)
  seq_len = 64      # time samples per lead
  time_window = 16  # samples per patch -> 4 time patches/lead -> 17 tokens incl. CLS
  depth = 2
  embed_dim = 32
  heads = 4
  dim_head = 8
  mlp_dim = 64
  num_classes = 5
  batch_block = 2   # 2 ECGs per grid step -> 2 batch blocks (both TCs on v7x)

  root = jax.random.PRNGKey(0)
  k_x, k_p = jax.random.split(root)
  x = jax.random.normal(k_x, (B, C, seq_len), jnp.float32)

  params = init_params(
      k_p, num_leads=C, seq_len=seq_len, time_window=time_window,
      embed_dim=embed_dim, depth=depth, heads=heads, dim_head=dim_head,
      mlp_dim=mlp_dim, num_classes=num_classes)

  fwd = jax.jit(functools.partial(
      st_ecgformer_classifier_forward, heads=heads, dim_head=dim_head,
      batch_block=batch_block))

  logits = fwd(params, x)
  jax.block_until_ready(logits)
  assert logits.shape == (B, num_classes)
  assert bool(jnp.all(jnp.isfinite(logits)))
  print("KERNEL_OK")
</pallas_src>

<mosaic_0001>
module attributes {stable_mosaic.version = 11 : i64} {
  func.func @_fused_forward_kernel(%arg0: i32, %arg1: i32, %arg2: memref<64x16xf32, #tpu.memory_space<vmem>>, %arg3: memref<64x32xf32, #tpu.memory_space<vmem>>, %arg4: memref<1x32xf32, #tpu.memory_space<vmem>>, %arg5: memref<16x32xbf16, #tpu.memory_space<vmem>>, %arg6: memref<1x1x32xf32, #tpu.memory_space<vmem>>, %arg7: memref<1x1x32xf32, #tpu.memory_space<vmem>>, %arg8: memref<1x32x96xbf16, #tpu.memory_space<vmem>>, %arg9: memref<1x32x32xbf16, #tpu.memory_space<vmem>>, %arg10: memref<1x1x32xf32, #tpu.memory_space<vmem>>, %arg11: memref<1x1x32xf32, #tpu.memory_space<vmem>>, %arg12: memref<1x1x32xf32, #tpu.memory_space<vmem>>, %arg13: memref<1x32x64xbf16, #tpu.memory_space<vmem>>, %arg14: memref<1x1x64xf32, #tpu.memory_space<vmem>>, %arg15: memref<1x64x32xbf16, #tpu.memory_space<vmem>>, %arg16: memref<1x1x32xf32, #tpu.memory_space<vmem>>, %arg17: memref<1x32xf32, #tpu.memory_space<vmem>>, %arg18: memref<1x32xf32, #tpu.memory_space<vmem>>, %arg19: memref<32x128xbf16, #tpu.memory_space<vmem>>, %arg20: memref<1x128xf32, #tpu.memory_space<vmem>>, %arg21: memref<1x2x128xf32, #tpu.memory_space<vmem>>, %arg22: memref<64x32xf32, #tpu.memory_space<vmem>>) attributes {dimension_semantics = [#tpu.dimension_semantics<parallel>, #tpu.dimension_semantics<arbitrary>], iteration_bounds = array<i64: 2, 2>, scalar_prefetch = 0 : i64, scratch_operands = 1 : i64, tpu.core_type = #tpu.core_type<tc>, window_params = [{transform_indices = @transform_0, window_bounds = array<i64: 64, 16>}, {pipeline_mode = #tpu.pipeline_mode<synchronous>, transform_indices = @transform_1, window_bounds = array<i64: 64, 32>}, {pipeline_mode = #tpu.pipeline_mode<synchronous>, transform_indices = @transform_2, window_bounds = array<i64: 1, 32>}, {pipeline_mode = #tpu.pipeline_mode<synchronous>, transform_indices = @transform_3, window_bounds = array<i64: 16, 32>}, {transform_indices = @transform_4, window_bounds = array<i64: 1, 1, 32>}, {transform_indices = @transform_5, window_bounds = array<i64: 1, 1, 32>}, {transform_indices = @transform_6, window_bounds = array<i64: 1, 32, 96>}, {transform_indices = @transform_7, window_bounds = array<i64: 1, 32, 32>}, {transform_indices = @transform_8, window_bounds = array<i64: 1, 1, 32>}, {transform_indices = @transform_9, window_bounds = array<i64: 1, 1, 32>}, {transform_indices = @transform_10, window_bounds = array<i64: 1, 1, 32>}, {transform_indices = @transform_11, window_bounds = array<i64: 1, 32, 64>}, {transform_indices = @transform_12, window_bounds = array<i64: 1, 1, 64>}, {transform_indices = @transform_13, window_bounds = array<i64: 1, 64, 32>}, {transform_indices = @transform_14, window_bounds = array<i64: 1, 1, 32>}, {pipeline_mode = #tpu.pipeline_mode<synchronous>, transform_indices = @transform_15, window_bounds = array<i64: 1, 32>}, {pipeline_mode = #tpu.pipeline_mode<synchronous>, transform_indices = @transform_16, window_bounds = array<i64: 1, 32>}, {pipeline_mode = #tpu.pipeline_mode<synchronous>, transform_indices = @transform_17, window_bounds = array<i64: 32, 128>}, {pipeline_mode = #tpu.pipeline_mode<synchronous>, transform_indices = @transform_18, window_bounds = array<i64: 1, 128>}, {transform_indices = @transform_19, window_bounds = array<i64: 1, 2, 128>}]} {
    %c0_i32 = arith.constant 0 : i32
    %0 = arith.cmpi eq, %arg1, %c0_i32 : i32
    %1 = arith.extui %0 : i1 to i32
    %c0_i32_0 = arith.constant 0 : i32
    %2 = arith.cmpi ne, %1, %c0_i32_0 : i32
    scf.if %2 {
      %c0_77 = arith.constant 0 : index
      %c0_78 = arith.constant 0 : index
      %185 = vector.load %arg2[%c0_77, %c0_78] : memref<64x16xf32, #tpu.memory_space<vmem>>, vector<64x16xf32>
      %c0_79 = arith.constant 0 : index
      %c0_80 = arith.constant 0 : index
      %186 = vector.load %arg5[%c0_79, %c0_80] : memref<16x32xbf16, #tpu.memory_space<vmem>>, vector<16x32xbf16>
      %187 = arith.truncf %185 : vector<64x16xf32> to vector<64x16xbf16>
      %cst_81 = arith.constant dense<0.000000e+00> : vector<64x32xf32>
      %188 = tpu.matmul %187, %186, %cst_81 {dimension_numbers = #tpu.dot_dimension_numbers<[1], [0], [0], [1], [0, 0, 1, 1], [], []>} : vector<64x16xbf16>, vector<16x32xbf16>, vector<64x32xf32> -> vector<64x32xf32>
      %c0_82 = arith.constant 0 : index
      %c0_83 = arith.constant 0 : index
      %189 = vector.load %arg3[%c0_82, %c0_83] : memref<64x32xf32, #tpu.memory_space<vmem>>, vector<64x32xf32>
      %190 = arith.addf %188, %189 : vector<64x32xf32>
      %c0_84 = arith.constant 0 : index
      %c0_85 = arith.constant 0 : index
      %191 = vector.load %arg22[%c0_84, %c0_85] : memref<64x32xf32, #tpu.memory_space<vmem>>, vector<64x32xf32>
      tpu.vector_store %arg22[%c0_84, %c0_85], %190 {strides = array<i32>} : memref<64x32xf32, #tpu.memory_space<vmem>>, vector<64x32xf32>,
    } else {
    }
    %c0 = arith.constant 0 : index
    %c0_1 = arith.constant 0 : index
    %3 = vector.load %arg22[%c0, %c0_1] : memref<64x32xf32, #tpu.memory_space<vmem>>, vector<64x32xf32>
    %c0_2 = arith.constant 0 : index
    %c0_3 = arith.constant 0 : index
    %c0_4 = arith.constant 0 : index
    %4 = vector.load %arg6[%c0_2, %c0_3, %c0_4] : memref<1x1x32xf32, #tpu.memory_space<vmem>>, vector<1x1x32xf32>
    %5 = vector.shape_cast %4 : vector<1x1x32xf32> to vector<1x32xf32>
    %c0_5 = arith.constant 0 : index
    %c0_6 = arith.constant 0 : index
    %c0_7 = arith.constant 0 : index
    %6 = vector.load %arg7[%c0_5, %c0_6, %c0_7] : memref<1x1x32xf32, #tpu.memory_space<vmem>>, vector<1x1x32xf32>
    %7 = vector.shape_cast %6 : vector<1x1x32xf32> to vector<1x32xf32>
    %cst = arith.constant dense<0.000000e+00> : vector<64xf32>
    %8 = vector.multi_reduction <add>, %3, %cst [1] : vector<64x32xf32> to vector<64xf32>
    %9 = vector.shape_cast %8 : vector<64xf32> to vector<64x1xf32>
    %cst_8 = arith.constant 3.200000e+01 : f32
    %10 = vector.broadcast %cst_8 : f32 to vector<64x1xf32>
    %11 = arith.divf %9, %10 : vector<64x1xf32>
    %12 = vector.broadcast %11 : vector<64x1xf32> to vector<64x32xf32>
    %13 = arith.subf %3, %12 : vector<64x32xf32>
    %14 = arith.mulf %13, %13 : vector<64x32xf32>
    %cst_9 = arith.constant dense<0.000000e+00> : vector<64xf32>
    %15 = vector.multi_reduction <add>, %14, %cst_9 [1] : vector<64x32xf32> to vector<64xf32>
    %16 = vector.shape_cast %15 : vector<64xf32> to vector<64x1xf32>
    %cst_10 = arith.constant 3.200000e+01 : f32
    %17 = vector.broadcast %cst_10 : f32 to vector<64x1xf32>
    %18 = arith.divf %16, %17 : vector<64x1xf32>
    %cst_11 = arith.constant 9.99999974E-6 : f32
    %19 = vector.broadcast %cst_11 : f32 to vector<64x1xf32>
    %20 = arith.addf %18, %19 : vector<64x1xf32>
    %21 = math.rsqrt %20 : vector<64x1xf32>
    %22 = vector.broadcast %21 : vector<64x1xf32> to vector<64x32xf32>
    %23 = arith.mulf %13, %22 : vector<64x32xf32>
    %24 = vector.broadcast %5 : vector<1x32xf32> to vector<64x32xf32>
    %25 = arith.mulf %23, %24 : vector<64x32xf32>
    %26 = vector.broadcast %7 : vector<1x32xf32> to vector<64x32xf32>
    %27 = arith.addf %25, %26 : vector<64x32xf32>
    %c0_12 = arith.constant 0 : index
    %c0_13 = arith.constant 0 : index
    %c0_14 = arith.constant 0 : index
    %28 = vector.load %arg8[%c0_12, %c0_13, %c0_14] : memref<1x32x96xbf16, #tpu.memory_space<vmem>>, vector<1x32x96xbf16>
    %29 = vector.shape_cast %28 : vector<1x32x96xbf16> to vector<32x96xbf16>
    %30 = arith.truncf %27 : vector<64x32xf32> to vector<64x32xbf16>
    %cst_15 = arith.constant dense<0.000000e+00> : vector<64x96xf32>
    %31 = tpu.matmul %30, %29, %cst_15 {dimension_numbers = #tpu.dot_dimension_numbers<[1], [0], [0], [1], [0, 0, 1, 1], [], []>} : vector<64x32xbf16>, vector<32x96xbf16>, vector<64x96xf32> -> vector<64x96xf32>
    %32 = vector.shape_cast %31 : vector<64x96xf32> to vector<2x32x96xf32>
    %33 = arith.truncf %32 : vector<2x32x96xf32> to vector<2x32x96xbf16>
    %c0_16 = arith.constant 0 : index
    %c0_17 = arith.constant 0 : index
    %34 = vector.load %arg4[%c0_16, %c0_17] : memref<1x32xf32, #tpu.memory_space<vmem>>, vector<1x32xf32>
    %35 = vector.shape_cast %34 : vector<1x32xf32> to vector<1x1x32xf32>
    %36 = vector.extract_strided_slice %33 {offsets = [0, 0, 0], sizes = [2, 32, 8], strides = [1, 1, 1]} : vector<2x32x96xbf16> to vector<2x32x8xbf16>
    %37 = vector.extract_strided_slice %33 {offsets = [0, 0, 32], sizes = [2, 32, 8], strides = [1, 1, 1]} : vector<2x32x96xbf16> to vector<2x32x8xbf16>
    %38 = vector.extract_strided_slice %33 {offsets = [0, 0, 64], sizes = [2, 32, 8], strides = [1, 1, 1]} : vector<2x32x96xbf16> to vector<2x32x8xbf16>
    "tpu.trace_start"() <{level = 10 : i32, message = "bqd,bkd->bqk"}> : () -> ()
    %cst_18 = arith.constant dense<0.000000e+00> : vector<2x32x32xf32>
    %39 = tpu.matmul %36, %37, %cst_18 {dimension_numbers = #tpu.dot_dimension_numbers<[2], [2], [1], [1], [0, 0, 0, 1, 1, 1], [0], [0]>} : vector<2x32x8xbf16>, vector<2x32x8xbf16>, vector<2x32x32xf32> -> vector<2x32x32xf32>
    "tpu.trace_stop"() : () -> ()
    %cst_19 = arith.constant 0.353553385 : f32
    %40 = vector.broadcast %cst_19 : f32 to vector<2x32x32xf32>
    %41 = arith.mulf %39, %40 : vector<2x32x32xf32>
    %42 = vector.broadcast %35 : vector<1x1x32xf32> to vector<2x32x32xf32>
    %43 = arith.addf %41, %42 : vector<2x32x32xf32>
    %cst_20 = arith.constant dense<0xFF800000> : vector<2x32xf32>
    %44 = vector.multi_reduction <maximumf>, %43, %cst_20 [2] : vector<2x32x32xf32> to vector<2x32xf32>
    %45 = vector.shape_cast %44 : vector<2x32xf32> to vector<2x32x1xf32>
    %46 = vector.broadcast %45 : vector<2x32x1xf32> to vector<2x32x32xf32>
    %47 = arith.subf %43, %46 : vector<2x32x32xf32>
    %48 = math.exp %47 : vector<2x32x32xf32>
    %cst_21 = arith.constant dense<0.000000e+00> : vector<2x32xf32>
    %49 = vector.multi_reduction <add>, %48, %cst_21 [2] : vector<2x32x32xf32> to vector<2x32xf32>
    %50 = vector.shape_cast %49 : vector<2x32xf32> to vector<2x32x1xf32>
    %51 = tpu.reciprocal %50 {approx = true} : vector<2x32x1xf32> -> vector<2x32x1xf32>
    %52 = vector.broadcast %51 : vector<2x32x1xf32> to vector<2x32x32xf32>
    %53 = arith.mulf %48, %52 : vector<2x32x32xf32>
    %54 = arith.truncf %53 : vector<2x32x32xf32> to vector<2x32x32xbf16>
    "tpu.trace_start"() <{level = 10 : i32, message = "bqk,bkd->bqd"}> : () -> ()
    %cst_22 = arith.constant dense<0.000000e+00> : vector<2x32x8xf32>
    %55 = tpu.matmul %54, %38, %cst_22 {dimension_numbers = #tpu.dot_dimension_numbers<[2], [1], [1], [2], [0, 0, 0, 1, 1, 2], [0], [0]>} : vector<2x32x32xbf16>, vector<2x32x8xbf16>, vector<2x32x8xf32> -> vector<2x32x8xf32>
    "tpu.trace_stop"() : () -> ()
    %56 = vector.extract_strided_slice %33 {offsets = [0, 0, 8], sizes = [2, 32, 8], strides = [1, 1, 1]} : vector<2x32x96xbf16> to vector<2x32x8xbf16>
    %57 = vector.extract_strided_slice %33 {offsets = [0, 0, 40], sizes = [2, 32, 8], strides = [1, 1, 1]} : vector<2x32x96xbf16> to vector<2x32x8xbf16>
    %58 = vector.extract_strided_slice %33 {offsets = [0, 0, 72], sizes = [2, 32, 8], strides = [1, 1, 1]} : vector<2x32x96xbf16> to vector<2x32x8xbf16>
    "tpu.trace_start"() <{level = 10 : i32, message = "bqd,bkd->bqk"}> : () -> ()
    %cst_23 = arith.constant dense<0.000000e+00> : vector<2x32x32xf32>
    %59 = tpu.matmul %56, %57, %cst_23 {dimension_numbers = #tpu.dot_dimension_numbers<[2], [2], [1], [1], [0, 0, 0, 1, 1, 1], [0], [0]>} : vector<2x32x8xbf16>, vector<2x32x8xbf16>, vector<2x32x32xf32> -> vector<2x32x32xf32>
    "tpu.trace_stop"() : () -> ()
    %cst_24 = arith.constant 0.353553385 : f32
    %60 = vector.broadcast %cst_24 : f32 to vector<2x32x32xf32>
    %61 = arith.mulf %59, %60 : vector<2x32x32xf32>
    %62 = vector.broadcast %35 : vector<1x1x32xf32> to vector<2x32x32xf32>
    %63 = arith.addf %61, %62 : vector<2x32x32xf32>
    %cst_25 = arith.constant dense<0xFF800000> : vector<2x32xf32>
    %64 = vector.multi_reduction <maximumf>, %63, %cst_25 [2] : vector<2x32x32xf32> to vector<2x32xf32>
    %65 = vector.shape_cast %64 : vector<2x32xf32> to vector<2x32x1xf32>
    %66 = vector.broadcast %65 : vector<2x32x1xf32> to vector<2x32x32xf32>
    %67 = arith.subf %63, %66 : vector<2x32x32xf32>
    %68 = math.exp %67 : vector<2x32x32xf32>
    %cst_26 = arith.constant dense<0.000000e+00> : vector<2x32xf32>
    %69 = vector.multi_reduction <add>, %68, %cst_26 [2] : vector<2x32x32xf32> to vector<2x32xf32>
    %70 = vector.shape_cast %69 : vector<2x32xf32> to vector<2x32x1xf32>
    %71 = tpu.reciprocal %70 {approx = true} : vector<2x32x1xf32> -> vector<2x32x1xf32>
    %72 = vector.broadcast %71 : vector<2x32x1xf32> to vector<2x32x32xf32>
    %73 = arith.mulf %68, %72 : vector<2x32x32xf32>
    %74 = arith.truncf %73 : vector<2x32x32xf32> to vector<2x32x32xbf16>
    "tpu.trace_start"() <{level = 10 : i32, message = "bqk,bkd->bqd"}> : () -> ()
    %cst_27 = arith.constant dense<0.000000e+00> : vector<2x32x8xf32>
    %75 = tpu.matmul %74, %58, %cst_27 {dimension_numbers = #tpu.dot_dimension_numbers<[2], [1], [1], [2], [0, 0, 0, 1, 1, 2], [0], [0]>} : vector<2x32x32xbf16>, vector<2x32x8xbf16>, vector<2x32x8xf32> -> vector<2x32x8xf32>
    "tpu.trace_stop"() : () -> ()
    %76 = vector.extract_strided_slice %33 {offsets = [0, 0, 16], sizes = [2, 32, 8], strides = [1, 1, 1]} : vector<2x32x96xbf16> to vector<2x32x8xbf16>
    %77 = vector.extract_strided_slice %33 {offsets = [0, 0, 48], sizes = [2, 32, 8], strides = [1, 1, 1]} : vector<2x32x96xbf16> to vector<2x32x8xbf16>
    %78 = vector.extract_strided_slice %33 {offsets = [0, 0, 80], sizes = [2, 32, 8], strides = [1, 1, 1]} : vector<2x32x96xbf16> to vector<2x32x8xbf16>
    "tpu.trace_start"() <{level = 10 : i32, message = "bqd,bkd->bqk"}> : () -> ()
    %cst_28 = arith.constant dense<0.000000e+00> : vector<2x32x32xf32>
    %79 = tpu.matmul %76, %77, %cst_28 {dimension_numbers = #tpu.dot_dimension_numbers<[2], [2], [1], [1], [0, 0, 0, 1, 1, 1], [0], [0]>} : vector<2x32x8xbf16>, vector<2x32x8xbf16>, vector<2x32x32xf32> -> vector<2x32x32xf32>
    "tpu.trace_stop"() : () -> ()
    %cst_29 = arith.constant 0.353553385 : f32
    %80 = vector.broadcast %cst_29 : f32 to vector<2x32x32xf32>
    %81 = arith.mulf %79, %80 : vector<2x32x32xf32>
    %82 = vector.broadcast %35 : vector<1x1x32xf32> to vector<2x32x32xf32>
    %83 = arith.addf %81, %82 : vector<2x32x32xf32>
    %cst_30 = arith.constant dense<0xFF800000> : vector<2x32xf32>
    %84 = vector.multi_reduction <maximumf>, %83, %cst_30 [2] : vector<2x32x32xf32> to vector<2x32xf32>
    %85 = vector.shape_cast %84 : vector<2x32xf32> to vector<2x32x1xf32>
    %86 = vector.broadcast %85 : vector<2x32x1xf32> to vector<2x32x32xf32>
    %87 = arith.subf %83, %86 : vector<2x32x32xf32>
    %88 = math.exp %87 : vector<2x32x32xf32>
    %cst_31 = arith.constant dense<0.000000e+00> : vector<2x32xf32>
    %89 = vector.multi_reduction <add>, %88, %cst_31 [2] : vector<2x32x32xf32> to vector<2x32xf32>
    %90 = vector.shape_cast %89 : vector<2x32xf32> to vector<2x32x1xf32>
    %91 = tpu.reciprocal %90 {approx = true} : vector<2x32x1xf32> -> vector<2x32x1xf32>
    %92 = vector.broadcast %91 : vector<2x32x1xf32> to vector<2x32x32xf32>
    %93 = arith.mulf %88, %92 : vector<2x32x32xf32>
    %94 = arith.truncf %93 : vector<2x32x32xf32> to vector<2x32x32xbf16>
    "tpu.trace_start"() <{level = 10 : i32, message = "bqk,bkd->bqd"}> : () -> ()
    %cst_32 = arith.constant dense<0.000000e+00> : vector<2x32x8xf32>
    %95 = tpu.matmul %94, %78, %cst_32 {dimension_numbers = #tpu.dot_dimension_numbers<[2], [1], [1], [2], [0, 0, 0, 1, 1, 2], [0], [0]>} : vector<2x32x32xbf16>, vector<2x32x8xbf16>, vector<2x32x8xf32> -> vector<2x32x8xf32>
    "tpu.trace_stop"() : () -> ()
    %96 = vector.extract_strided_slice %33 {offsets = [0, 0, 24], sizes = [2, 32, 8], strides = [1, 1, 1]} : vector<2x32x96xbf16> to vector<2x32x8xbf16>
    %97 = vector.extract_strided_slice %33 {offsets = [0, 0, 56], sizes = [2, 32, 8], strides = [1, 1, 1]} : vector<2x32x96xbf16> to vector<2x32x8xbf16>
    %98 = vector.extract_strided_slice %33 {offsets = [0, 0, 88], sizes = [2, 32, 8], strides = [1, 1, 1]} : vector<2x32x96xbf16> to vector<2x32x8xbf16>
    "tpu.trace_start"() <{level = 10 : i32, message = "bqd,bkd->bqk"}> : () -> ()
    %cst_33 = arith.constant dense<0.000000e+00> : vector<2x32x32xf32>
    %99 = tpu.matmul %96, %97, %cst_33 {dimension_numbers = #tpu.dot_dimension_numbers<[2], [2], [1], [1], [0, 0, 0, 1, 1, 1], [0], [0]>} : vector<2x32x8xbf16>, vector<2x32x8xbf16>, vector<2x32x32xf32> -> vector<2x32x32xf32>
    "tpu.trace_stop"() : () -> ()
    %cst_34 = arith.constant 0.353553385 : f32
    %100 = vector.broadcast %cst_34 : f32 to vector<2x32x32xf32>
    %101 = arith.mulf %99, %100 : vector<2x32x32xf32>
    %102 = vector.broadcast %35 : vector<1x1x32xf32> to vector<2x32x32xf32>
    %103 = arith.addf %101, %102 : vector<2x32x32xf32>
    %cst_35 = arith.constant dense<0xFF800000> : vector<2x32xf32>
    %104 = vector.multi_reduction <maximumf>, %103, %cst_35 [2] : vector<2x32x32xf32> to vector<2x32xf32>
    %105 = vector.shape_cast %104 : vector<2x32xf32> to vector<2x32x1xf32>
    %106 = vector.broadcast %105 : vector<2x32x1xf32> to vector<2x32x32xf32>
    %107 = arith.subf %103, %106 : vector<2x32x32xf32>
    %108 = math.exp %107 : vector<2x32x32xf32>
    %cst_36 = arith.constant dense<0.000000e+00> : vector<2x32xf32>
    %109 = vector.multi_reduction <add>, %108, %cst_36 [2] : vector<2x32x32xf32> to vector<2x32xf32>
    %110 = vector.shape_cast %109 : vector<2x32xf32> to vector<2x32x1xf32>
    %111 = tpu.reciprocal %110 {approx = true} : vector<2x32x1xf32> -> vector<2x32x1xf32>
    %112 = vector.broadcast %111 : vector<2x32x1xf32> to vector<2x32x32xf32>
    %113 = arith.mulf %108, %112 : vector<2x32x32xf32>
    %114 = arith.truncf %113 : vector<2x32x32xf32> to vector<2x32x32xbf16>
    "tpu.trace_start"() <{level = 10 : i32, message = "bqk,bkd->bqd"}> : () -> ()
    %cst_37 = arith.constant dense<0.000000e+00> : vector<2x32x8xf32>
    %115 = tpu.matmul %114, %98, %cst_37 {dimension_numbers = #tpu.dot_dimension_numbers<[2], [1], [1], [2], [0, 0, 0, 1, 1, 2], [0], [0]>} : vector<2x32x32xbf16>, vector<2x32x8xbf16>, vector<2x32x8xf32> -> vector<2x32x8xf32>
    "tpu.trace_stop"() : () -> ()
    %116 = tpu.concatenate %55, %75, %95, %115 in 2 : vector<2x32x8xf32>, vector<2x32x8xf32>, vector<2x32x8xf32>, vector<2x32x8xf32> -> vector<2x32x32xf32>
    %117 = vector.shape_cast %116 : vector<2x32x32xf32> to vector<64x32xf32>
    %c0_38 = arith.constant 0 : index
    %c0_39 = arith.constant 0 : index
    %c0_40 = arith.constant 0 : index
    %118 = vector.load %arg9[%c0_38, %c0_39, %c0_40] : memref<1x32x32xbf16, #tpu.memory_space<vmem>>, vector<1x32x32xbf16>
    %119 = vector.shape_cast %118 : vector<1x32x32xbf16> to vector<32x32xbf16>
    %120 = arith.truncf %117 : vector<64x32xf32> to vector<64x32xbf16>
    %cst_41 = arith.constant dense<0.000000e+00> : vector<64x32xf32>
    %121 = tpu.matmul %120, %119, %cst_41 {dimension_numbers = #tpu.dot_dimension_numbers<[1], [0], [0], [1], [0, 0, 1, 1], [], []>} : vector<64x32xbf16>, vector<32x32xbf16>, vector<64x32xf32> -> vector<64x32xf32>
    %122 = arith.addf %3, %121 : vector<64x32xf32>
    %c0_42 = arith.constant 0 : index
    %c0_43 = arith.constant 0 : index
    %c0_44 = arith.constant 0 : index
    %123 = vector.load %arg10[%c0_42, %c0_43, %c0_44] : memref<1x1x32xf32, #tpu.memory_space<vmem>>, vector<1x1x32xf32>
    %124 = vector.shape_cast %123 : vector<1x1x32xf32> to vector<1x32xf32>
    %125 = vector.broadcast %124 : vector<1x32xf32> to vector<64x32xf32>
    %126 = arith.addf %122, %125 : vector<64x32xf32>
    %c0_45 = arith.constant 0 : index
    %c0_46 = arith.constant 0 : index
    %c0_47 = arith.constant 0 : index
    %127 = vector.load %arg11[%c0_45, %c0_46, %c0_47] : memref<1x1x32xf32, #tpu.memory_space<vmem>>, vector<1x1x32xf32>
    %128 = vector.shape_cast %127 : vector<1x1x32xf32> to vector<1x32xf32>
    %c0_48 = arith.constant 0 : index
    %c0_49 = arith.constant 0 : index
    %c0_50 = arith.constant 0 : index
    %129 = vector.load %arg12[%c0_48, %c0_49, %c0_50] : memref<1x1x32xf32, #tpu.memory_space<vmem>>, vector<1x1x32xf32>
    %130 = vector.shape_cast %129 : vector<1x1x32xf32> to vector<1x32xf32>
    %cst_51 = arith.constant dense<0.000000e+00> : vector<64xf32>
    %131 = vector.multi_reduction <add>, %126, %cst_51 [1] : vector<64x32xf32> to vector<64xf32>
    %132 = vector.shape_cast %131 : vector<64xf32> to vector<64x1xf32>
    %cst_52 = arith.constant 3.200000e+01 : f32
    %133 = vector.broadcast %cst_52 : f32 to vector<64x1xf32>
    %134 = arith.divf %132, %133 : vector<64x1xf32>
    %135 = vector.broadcast %134 : vector<64x1xf32> to vector<64x32xf32>
    %136 = arith.subf %126, %135 : vector<64x32xf32>
    %137 = arith.mulf %136, %136 : vector<64x32xf32>
    %cst_53 = arith.constant dense<0.000000e+00> : vector<64xf32>
    %138 = vector.multi_reduction <add>, %137, %cst_53 [1] : vector<64x32xf32> to vector<64xf32>
    %139 = vector.shape_cast %138 : vector<64xf32> to vector<64x1xf32>
    %cst_54 = arith.constant 3.200000e+01 : f32
    %140 = vector.broadcast %cst_54 : f32 to vector<64x1xf32>
    %141 = arith.divf %139, %140 : vector<64x1xf32>
    %cst_55 = arith.constant 9.99999974E-6 : f32
    %142 = vector.broadcast %cst_55 : f32 to vector<64x1xf32>
    %143 = arith.addf %141, %142 : vector<64x1xf32>
    %144 = math.rsqrt %143 : vector<64x1xf32>
    %145 = vector.broadcast %144 : vector<64x1xf32> to vector<64x32xf32>
    %146 = arith.mulf %136, %145 : vector<64x32xf32>
    %147 = vector.broadcast %128 : vector<1x32xf32> to vector<64x32xf32>
    %148 = arith.mulf %146, %147 : vector<64x32xf32>
    %149 = vector.broadcast %130 : vector<1x32xf32> to vector<64x32xf32>
    %150 = arith.addf %148, %149 : vector<64x32xf32>
    %c0_56 = arith.constant 0 : index
    %c0_57 = arith.constant 0 : index
    %c0_58 = arith.constant 0 : index
    %151 = vector.load %arg13[%c0_56, %c0_57, %c0_58] : memref<1x32x64xbf16, #tpu.memory_space<vmem>>, vector<1x32x64xbf16>
    %152 = vector.shape_cast %151 : vector<1x32x64xbf16> to vector<32x64xbf16>
    %153 = arith.truncf %150 : vector<64x32xf32> to vector<64x32xbf16>
    %cst_59 = arith.constant dense<0.000000e+00> : vector<64x64xf32>
    %154 = tpu.matmul %153, %152, %cst_59 {dimension_numbers = #tpu.dot_dimension_numbers<[1], [0], [0], [1], [0, 0, 1, 1], [], []>} : vector<64x32xbf16>, vector<32x64xbf16>, vector<64x64xf32> -> vector<64x64xf32>
    %c0_60 = arith.constant 0 : index
    %c0_61 = arith.constant 0 : index
    %c0_62 = arith.constant 0 : index
    %155 = vector.load %arg14[%c0_60, %c0_61, %c0_62] : memref<1x1x64xf32, #tpu.memory_space<vmem>>, vector<1x1x64xf32>
    %156 = vector.shape_cast %155 : vector<1x1x64xf32> to vector<1x64xf32>
    %157 = vector.broadcast %156 : vector<1x64xf32> to vector<64x64xf32>
    %158 = arith.addf %154, %157 : vector<64x64xf32>
    %159 = arith.mulf %158, %158 : vector<64x64xf32>
    %160 = arith.mulf %158, %159 : vector<64x64xf32>
    %cst_63 = arith.constant 4.471500e-02 : f32
    %161 = vector.broadcast %cst_63 : f32 to vector<64x64xf32>
    %162 = arith.mulf %161, %160 : vector<64x64xf32>
    %163 = arith.addf %158, %162 : vector<64x64xf32>
    %cst_64 = arith.constant 0.797884583 : f32
    %164 = vector.broadcast %cst_64 : f32 to vector<64x64xf32>
    %165 = arith.mulf %164, %163 : vector<64x64xf32>
    %166 = math.tanh %165 : vector<64x64xf32>
    %cst_65 = arith.constant 1.000000e+00 : f32
    %167 = vector.broadcast %cst_65 : f32 to vector<64x64xf32>
    %168 = arith.addf %167, %166 : vector<64x64xf32>
    %cst_66 = arith.constant 5.000000e-01 : f32
    %169 = vector.broadcast %cst_66 : f32 to vector<64x64xf32>
    %170 = arith.mulf %169, %168 : vector<64x64xf32>
    %171 = arith.mulf %158, %170 : vector<64x64xf32>
    %c0_67 = arith.constant 0 : index
    %c0_68 = arith.constant 0 : index
    %c0_69 = arith.constant 0 : index
    %172 = vector.load %arg15[%c0_67, %c0_68, %c0_69] : memref<1x64x32xbf16, #tpu.memory_space<vmem>>, vector<1x64x32xbf16>
    %173 = vector.shape_cast %172 : vector<1x64x32xbf16> to vector<64x32xbf16>
    %174 = arith.truncf %171 : vector<64x64xf32> to vector<64x64xbf16>
    %cst_70 = arith.constant dense<0.000000e+00> : vector<64x32xf32>
    %175 = tpu.matmul %174, %173, %cst_70 {dimension_numbers = #tpu.dot_dimension_numbers<[1], [0], [0], [1], [0, 0, 1, 1], [], []>} : vector<64x64xbf16>, vector<64x32xbf16>, vector<64x32xf32> -> vector<64x32xf32>
    %c0_71 = arith.constant 0 : index
    %c0_72 = arith.constant 0 : index
    %c0_73 = arith.constant 0 : index
    %176 = vector.load %arg16[%c0_71, %c0_72, %c0_73] : memref<1x1x32xf32, #tpu.memory_space<vmem>>, vector<1x1x32xf32>
    %177 = vector.shape_cast %176 : vector<1x1x32xf32> to vector<1x32xf32>
    %178 = vector.broadcast %177 : vector<1x32xf32> to vector<64x32xf32>
    %179 = arith.addf %175, %178 : vector<64x32xf32>
    %180 = arith.addf %126, %179 : vector<64x32xf32>
    %c0_74 = arith.constant 0 : index
    %c0_75 = arith.constant 0 : index
    %181 = vector.load %arg22[%c0_74, %c0_75] : memref<64x32xf32, #tpu.memory_space<vmem>>, vector<64x32xf32>
    tpu.vector_store %arg22[%c0_74, %c0_75], %180 {strides = array<i32>} : memref<64x32xf32, #tpu.memory_space<vmem>>, vector<64x32xf32>,
    %c1_i32 = arith.constant 1 : i32
    %182 = arith.cmpi eq, %arg1, %c1_i32 : i32
    %183 = arith.extui %182 : i1 to i32
    %c0_i32_76 = arith.constant 0 : i32
    %184 = arith.cmpi ne, %183, %c0_i32_76 : i32
    scf.if %184 {
      %185 = vector.shape_cast %180 : vector<64x32xf32> to vector<2x32x32xf32>
      %186 = vector.extract_strided_slice %185 {offsets = [0, 0, 0], sizes = [2, 1, 32], strides = [1, 1, 1]} : vector<2x32x32xf32> to vector<2x1x32xf32>
      %187 = vector.shape_cast %186 : vector<2x1x32xf32> to vector<2x32xf32>
      %c0_77 = arith.constant 0 : index
      %c0_78 = arith.constant 0 : index
      %188 = vector.load %arg17[%c0_77, %c0_78] : memref<1x32xf32, #tpu.memory_space<vmem>>, vector<1x32xf32>
      %c0_79 = arith.constant 0 : index
      %c0_80 = arith.constant 0 : index
      %189 = vector.load %arg18[%c0_79, %c0_80] : memref<1x32xf32, #tpu.memory_space<vmem>>, vector<1x32xf32>
      %cst_81 = arith.constant dense<0.000000e+00> : vector<2xf32>
      %190 = vector.multi_reduction <add>, %187, %cst_81 [1] : vector<2x32xf32> to vector<2xf32>
      %191 = vector.shape_cast %190 : vector<2xf32> to vector<2x1xf32>
      %cst_82 = arith.constant 3.200000e+01 : f32
      %192 = vector.broadcast %cst_82 : f32 to vector<2x1xf32>
      %193 = arith.divf %191, %192 : vector<2x1xf32>
      %194 = vector.broadcast %193 : vector<2x1xf32> to vector<2x32xf32>
      %195 = arith.subf %187, %194 : vector<2x32xf32>
      %196 = arith.mulf %195, %195 : vector<2x32xf32>
      %cst_83 = arith.constant dense<0.000000e+00> : vector<2xf32>
      %197 = vector.multi_reduction <add>, %196, %cst_83 [1] : vector<2x32xf32> to vector<2xf32>
      %198 = vector.shape_cast %197 : vector<2xf32> to vector<2x1xf32>
      %cst_84 = arith.constant 3.200000e+01 : f32
      %199 = vector.broadcast %cst_84 : f32 to vector<2x1xf32>
      %200 = arith.divf %198, %199 : vector<2x1xf32>
      %cst_85 = arith.constant 9.99999974E-6 : f32
      %201 = vector.broadcast %cst_85 : f32 to vector<2x1xf32>
      %202 = arith.addf %200, %201 : vector<2x1xf32>
      %203 = math.rsqrt %202 : vector<2x1xf32>
      %204 = vector.broadcast %203 : vector<2x1xf32> to vector<2x32xf32>
      %205 = arith.mulf %195, %204 : vector<2x32xf32>
      %206 = vector.broadcast %188 : vector<1x32xf32> to vector<2x32xf32>
      %207 = arith.mulf %205, %206 : vector<2x32xf32>
      %208 = vector.broadcast %189 : vector<1x32xf32> to vector<2x32xf32>
      %209 = arith.addf %207, %208 : vector<2x32xf32>
      %c0_86 = arith.constant 0 : index
      %c0_87 = arith.constant 0 : index
      %210 = vector.load %arg19[%c0_86, %c0_87] : memref<32x128xbf16, #tpu.memory_space<vmem>>, vector<32x128xbf16>
      %211 = arith.truncf %209 : vector<2x32xf32> to vector<2x32xbf16>
      %cst_88 = arith.constant dense<0.000000e+00> : vector<2x128xf32>
      %212 = tpu.matmul %211, %210, %cst_88 {dimension_numbers = #tpu.dot_dimension_numbers<[1], [0], [0], [1], [0, 0, 1, 1], [], []>} : vector<2x32xbf16>, vector<32x128xbf16>, vector<2x128xf32> -> vector<2x128xf32>
      %c0_89 = arith.constant 0 : index
      %c0_90 = arith.constant 0 : index
      %213 = vector.load %arg20[%c0_89, %c0_90] : memref<1x128xf32, #tpu.memory_space<vmem>>, vector<1x128xf32>
      %214 = vector.broadcast %213 : vector<1x128xf32> to vector<2x128xf32>
      %215 = arith.addf %212, %214 : vector<2x128xf32>
      %216 = vector.shape_cast %215 : vector<2x128xf32> to vector<1x2x128xf32>
      %c0_91 = arith.constant 0 : index
      %c0_92 = arith.constant 0 : index
      %c0_93 = arith.constant 0 : index
      %217 = vector.load %arg21[%c0_91, %c0_92, %c0_93] : memref<1x2x128xf32, #tpu.memory_space<vmem>>, vector<1x2x128xf32>
      tpu.vector_store %arg21[%c0_91, %c0_92, %c0_93], %216 {strides = array<i32>} : memref<1x2x128xf32, #tpu.memory_space<vmem>>, vector<1x2x128xf32>,
    } else {
    }
    return
  }
  func.func @transform_0(%arg0: i32, %arg1: i32) -> (i32, i32) {
    %c0_i32 = arith.constant 0 : i32
    %c0_i32_0 = arith.constant 0 : i32
    return %arg0, %c0_i32 : i32, i32
  }
  func.func @transform_1(%arg0: i32, %arg1: i32) -> (i32, i32) {
    %c0_i32 = arith.constant 0 : i32
    %c0_i32_0 = arith.constant 0 : i32
    %c0_i32_1 = arith.constant 0 : i32
    return %c0_i32, %c0_i32_0 : i32, i32
  }
  func.func @transform_2(%arg0: i32, %arg1: i32) -> (i32, i32) {
    %c0_i32 = arith.constant 0 : i32
    %c0_i32_0 = arith.constant 0 : i32
    %c0_i32_1 = arith.constant 0 : i32
    return %c0_i32, %c0_i32_0 : i32, i32
  }
  func.func @transform_3(%arg0: i32, %arg1: i32) -> (i32, i32) {
    %c0_i32 = arith.constant 0 : i32
    %c0_i32_0 = arith.constant 0 : i32
    %c0_i32_1 = arith.constant 0 : i32
    return %c0_i32, %c0_i32_0 : i32, i32
  }
  func.func @transform_4(%arg0: i32, %arg1: i32) -> (i32, i32, i32) {
    %c0_i32 = arith.constant 0 : i32
    %c0_i32_0 = arith.constant 0 : i32
    %c0_i32_1 = arith.constant 0 : i32
    return %arg1, %c0_i32, %c0_i32_0 : i32, i32, i32
  }
  func.func @transform_5(%arg0: i32, %arg1: i32) -> (i32, i32, i32) {
    %c0_i32 = arith.constant 0 : i32
    %c0_i32_0 = arith.constant 0 : i32
    %c0_i32_1 = arith.constant 0 : i32
    return %arg1, %c0_i32, %c0_i32_0 : i32, i32, i32
  }
  func.func @transform_6(%arg0: i32, %arg1: i32) -> (i32, i32, i32) {
    %c0_i32 = arith.constant 0 : i32
    %c0_i32_0 = arith.constant 0 : i32
    %c0_i32_1 = arith.constant 0 : i32
    return %arg1, %c0_i32, %c0_i32_0 : i32, i32, i32
  }
  func.func @transform_7(%arg0: i32, %arg1: i32) -> (i32, i32, i32) {
    %c0_i32 = arith.constant 0 : i32
    %c0_i32_0 = arith.constant 0 : i32
    %c0_i32_1 = arith.constant 0 : i32
    return %arg1, %c0_i32, %c0_i32_0 : i32, i32, i32
  }
  func.func @transform_8(%arg0: i32, %arg1: i32) -> (i32, i32, i32) {
    %c0_i32 = arith.constant 0 : i32
    %c0_i32_0 = arith.constant 0 : i32
    %c0_i32_1 = arith.constant 0 : i32
    return %arg1, %c0_i32, %c0_i32_0 : i32, i32, i32
  }
  func.func @transform_9(%arg0: i32, %arg1: i32) -> (i32, i32, i32) {
    %c0_i32 = arith.constant 0 : i32
    %c0_i32_0 = arith.constant 0 : i32
    %c0_i32_1 = arith.constant 0 : i32
    return %arg1, %c0_i32, %c0_i32_0 : i32, i32, i32
  }
  func.func @transform_10(%arg0: i32, %arg1: i32) -> (i32, i32, i32) {
    %c0_i32 = arith.constant 0 : i32
    %c0_i32_0 = arith.constant 0 : i32
    %c0_i32_1 = arith.constant 0 : i32
    return %arg1, %c0_i32, %c0_i32_0 : i32, i32, i32
  }
  func.func @transform_11(%arg0: i32, %arg1: i32) -> (i32, i32, i32) {
    %c0_i32 = arith.constant 0 : i32
    %c0_i32_0 = arith.constant 0 : i32
    %c0_i32_1 = arith.constant 0 : i32
    return %arg1, %c0_i32, %c0_i32_0 : i32, i32, i32
  }
  func.func @transform_12(%arg0: i32, %arg1: i32) -> (i32, i32, i32) {
    %c0_i32 = arith.constant 0 : i32
    %c0_i32_0 = arith.constant 0 : i32
    %c0_i32_1 = arith.constant 0 : i32
    return %arg1, %c0_i32, %c0_i32_0 : i32, i32, i32
  }
  func.func @transform_13(%arg0: i32, %arg1: i32) -> (i32, i32, i32) {
    %c0_i32 = arith.constant 0 : i32
    %c0_i32_0 = arith.constant 0 : i32
    %c0_i32_1 = arith.constant 0 : i32
    return %arg1, %c0_i32, %c0_i32_0 : i32, i32, i32
  }
  func.func @transform_14(%arg0: i32, %arg1: i32) -> (i32, i32, i32) {
    %c0_i32 = arith.constant 0 : i32
    %c0_i32_0 = arith.constant 0 : i32
    %c0_i32_1 = arith.constant 0 : i32
    return %arg1, %c0_i32, %c0_i32_0 : i32, i32, i32
  }
  func.func @transform_15(%arg0: i32, %arg1: i32) -> (i32, i32) {
    %c0_i32 = arith.constant 0 : i32
    %c0_i32_0 = arith.constant 0 : i32
    %c0_i32_1 = arith.constant 0 : i32
    return %c0_i32, %c0_i32_0 : i32, i32
  }
  func.func @transform_16(%arg0: i32, %arg1: i32) -> (i32, i32) {
    %c0_i32 = arith.constant 0 : i32
    %c0_i32_0 = arith.constant 0 : i32
    %c0_i32_1 = arith.constant 0 : i32
    return %c0_i32, %c0_i32_0 : i32, i32
  }
  func.func @transform_17(%arg0: i32, %arg1: i32) -> (i32, i32) {
    %c0_i32 = arith.constant 0 : i32
    %c0_i32_0 = arith.constant 0 : i32
    %c0_i32_1 = arith.constant 0 : i32
    return %c0_i32, %c0_i32_0 : i32, i32
  }
  func.func @transform_18(%arg0: i32, %arg1: i32) -> (i32, i32) {
    %c0_i32 = arith.constant 0 : i32
    %c0_i32_0 = arith.constant 0 : i32
    %c0_i32_1 = arith.constant 0 : i32
    return %c0_i32, %c0_i32_0 : i32, i32
  }
  func.func @transform_19(%arg0: i32, %arg1: i32) -> (i32, i32, i32) {
    %c0_i32 = arith.constant 0 : i32
    %c0_i32_0 = arith.constant 0 : i32
    %c0_i32_1 = arith.constant 0 : i32
    return %arg0, %c0_i32, %c0_i32_0 : i32, i32, i32
  }
}

</mosaic_0001>

<bundles_post_ra>
// kernel: st_ecgformer_classifier_forward.1
= control target key start
LH: loop header
LB: loop body
LE: loop exit
PB: predicated region body
PF: predicated region fallthrough
CT: control target
= control target key end

     0   :  { %s5524_s0 = inlined_call_operand.vmem [shape: f32[128,16], index: 0, kind: input, shape index: {}]   ;;  %s5525_s1 = inlined_call_operand.vmem [shape: f32[64,32], index: 1, kind: input, shape index: {}]   ;;  %s5526_s2 = inlined_call_operand.vmem [shape: f32[1,32], index: 2, kind: input, shape index: {}]   ;;  %s5527_s3 = inlined_call_operand.vmem [shape: bf16[16,32], index: 3, kind: input, shape index: {}]   ;;  %s5528_s4 = inlined_call_operand.vmem [shape: f32[2,1,32], index: 4, kind: input, shape index: {}]   ;;  %s5529_s5 = inlined_call_operand.vmem [shape: f32[2,1,32], index: 5, kind: input, shape index: {}]   ;;  %s5530_s6 = inlined_call_operand.vmem [shape: bf16[2,32,96], index: 6, kind: input, shape index: {}]   ;;  %s5531_s7 = inlined_call_operand.vmem [shape: bf16[2,32,32], index: 7, kind: input, shape index: {}]   ;;  %s5532_s8 = inlined_call_operand.vmem [shape: f32[2,1,32], index: 8, kind: input, shape index: {}]   ;;  %s5533_s9 = inlined_call_operand.vmem [shape: f32[2,1,32], index: 9, kind: input, shape index: {}]   ;;  %s5534_s10 = inlined_call_operand.vmem [shape: f32[2,1,32], index: 10, kind: input, shape index: {}]   ;;  %s5535_s11 = inlined_call_operand.vmem [shape: bf16[2,32,64], index: 11, kind: input, shape index: {}]   ;;  %s5536_s12 = inlined_call_operand.vmem [shape: f32[2,1,64], index: 12, kind: input, shape index: {}]   ;;  %s5537_s13 = inlined_call_operand.vmem [shape: bf16[2,64,32], index: 13, kind: input, shape index: {}]   ;;  %s5538_s14 = inlined_call_operand.vmem [shape: f32[2,1,32], index: 14, kind: input, shape index: {}]   ;;  %s5539_s15 = inlined_call_operand.vmem [shape: f32[1,32], index: 15, kind: input, shape index: {}]   ;;  %s5540_s16 = inlined_call_operand.vmem [shape: f32[1,32], index: 16, kind: input, shape index: {}]   ;;  %s5541_s17 = inlined_call_operand.vmem [shape: bf16[32,128], index: 17, kind: input, shape index: {}]   ;;  %s5542_s18 = inlined_call_operand.vmem [shape: f32[1,128], index: 18, kind: input, shape index: {}]   ;;  %s5543_s19 = inlined_call_operand.hbm [shape: f32[2,2,128], index: 19, kind: output, shape index: {}]  }
   0x1   :  { %5562 = sst [smem:[#allocation19_spill]] %s5524_s0 }
   0x2   :  { %5563 = sst [smem:[#allocation20_spill]] %s5525_s1 }
   0x3   :  { %5564 = sst [smem:[#allocation21_spill]] %s5526_s2 }
   0x4   :  { %5565 = sst [smem:[#allocation22_spill]] %s5527_s3 }
   0x5   :  { %5566 = sst [smem:[#allocation23_spill]] %s5530_s6 }
   0x6   :  { %5567 = sst [smem:[#allocation24_spill]] %s5531_s7 }
   0x7   :  { %5568 = sst [smem:[#allocation25_spill]] %s5539_s15 }
   0x8   :  { %5569 = sst [smem:[#allocation26_spill]] %s5540_s16 }
   0x9   :  { %5570 = sst [smem:[#allocation27_spill]] %s5541_s17 }
   0xa   :  { %5571 = sst [smem:[#allocation28_spill]] %s5542_s18 }
   0xb   :  { %5572 = sst [smem:[#allocation29_spill]] %s5543_s19 }
   0xc   :  { %24 = vsyncpa [#allocation4], 0 }
   0xd   :  { %26 = vsyncpa [#allocation4 + $0x1], 0  ;;  %s4629_s0 = smov 0   ;;  %s4631_s30 = smov 0  }
   0xe   :  { %s4633_s20 = smov 0   ;;  %s4635_s21 = smov 0  }
   0xf   :  { %s4637_s1 = smov 0   ;;  %s4639_s22 = smov 0  }
  0x10   :  { %s4641_s2 = smov 0   ;;  %s4643_s23 = smov 0  }
  0x11 LB: > { %5573 = sst [smem:[#allocation6_spill]] %s4482_s0  ;;  %s3652_s24 = sadd.s32 4294967295, %s4510_s23   ;;  %s4510_s23 = sphi %s4643_s23, %s32_s23   ;;  %s4506_s2 = sphi %s4641_s2, %s5620_s2   ;;  %s4502_s22 = sphi %s4639_s22, %s5619_s22   ;;  %s4498_s1 = sphi %s4637_s1, %s5618_s1   ;;  %s4494_s21 = sphi %s4635_s21, %s5617_s21   ;;  %s4490_s20 = sphi %s4633_s20, %s5616_s20   ;;  %s4486_s30 = sphi %s4631_s30, %s5615_s30   ;;  %s4482_s0 = sphi %s4629_s0, %s5614_s0  }
  0x12   : > { %5574 = sst [smem:[#allocation7_spill]] %s4486_s30  ;;  %s3653_s25 = sadd.s32 4294967294, %s4510_s23  }
  0x13   : > { %5575 = sst [smem:[#allocation8_spill]] %s4490_s20  ;;  %s41_s3 = sadd.s32 1, %s4502_s22 }
  0x14   : > { %5576 = sst [smem:[#allocation9_spill]] %s4498_s1  ;;  %p42_p0 = scmp.ge.s32.totalorder %s41_s3, 2 }
  0x15   : > { %5577 = sst [smem:[#allocation10_spill]] %s4502_s22  ;;  %s44_s26 = sadd.s32 1, %s4506_s2 }
  0x16   : > { %5578 = sst [smem:[#allocation11_spill]] %s4506_s2  ;;  %p520_p1 = scmp.ne.s32.totalorder %s4490_s20, %s4486_s30 }
  0x17   : > { %5579 = sst [smem:[#allocation12_spill]] %s4510_s23  ;;  %p521_p2 = scmp.eq.s32.totalorder %s3652_s24, 3 }
  0x18   : > { %s5622_s3 = smov (%p42_p0, %s41_s3), 0  ;;  %s5624_s26 = smov (!%p42_p0, %s44_s26), %s4506_s2 }
  0x19   : > { %5580 = sst [smem:[#allocation13_spill]] %s5622_s3  ;;  %p4678_p3 = por %p521_p2, %p520_p1 }
  0x1a   : > { %p526_p4 = scmp.ne.s32.totalorder %s4486_s30, %s4482_s0  ;;  %p46_p5 = scmp.ge.s32.totalorder %s5624_s26, 2 }
  0x1b   : > { %s5581_s27 = scalar_select %p4678_p3, 1, 0 }
  0x1c   : > { %p527_p6 = scmp.eq.s32.totalorder %s3653_s25, 3  ;;  %p3656_p7 = scmp.ge.s32.totalorder %s4510_s23, 1 }
  0x1d   : > { %5582 = sst [smem:[#allocation14_spill]] %s5581_s27  ;;  %p649_p8 = scmp.lt.s32.totalorder %s4510_s23, 5 }
  0x1e   : > { %s5626_s26 = smov (%p46_p5, %s5624_s26), 0  ;;  %p4688_p9 = por %p527_p6, %p526_p4 }
  0x1f   : > { %5583 = sst [smem:[#allocation15_spill]] %s5626_s26  ;;  %p650_p10 = pnand %p3656_p7, %p649_p8 }
  0x20   : > { %s5584_s28 = scalar_select %p4688_p9, 1, 0 }
  0x21   : > { %s507_s29 = ssub.s32 %s4506_s2, %s5626_s26  ;;  %s510_s24 = sadd.s32 1, %s4490_s20 }
  0x22   : > { %5585 = sst [smem:[#allocation16_spill]] %s5584_s28  ;;  %p508_p11 = scmp.eq.s32.totalorder %s507_s29, 0 }
  0x23   : > { %653 = sbr.rel (%p650_p10) target bundleno = 5164 (0x142c), region = 96 }
  0x24   : > { %s4696_s3 = scalar_select %p508_p11, %s4490_s20, %s510_s24  }
  0x26   : > { %5586 = sst [smem:[#allocation17_spill]] %s4696_s3 }
  0x2a   : > { %s5550_s25 = sand.u32 1, %s4486_s30   ;;  %s3658_s22 = sshll.u32 %s4498_s1, 3 }
  0x2b   : > { %s4702_s0 = sshll.u32 %s5550_s25, 1  ;;  %p747_p12 = scmp.lt.s32.totalorder %s3658_s22, 15 }
  0x2c   : > { %p752_p13 = scmp.lt.s32.totalorder %s4494_s21, 1  ;;  %s5587_s25 = sld [smem:[#allocation19_spill]] }
  0x2d   : > { %s5628_s22 = smov (!%p747_p12, %s3658_s22), 15  ;;  %s5588_s6 = sld [smem:[#allocation23_spill]] }
  0x2e   : > { %s4706_s28 = scalar_select %p752_p13, %s4494_s21, 1 }
  0x2f   : > { %s3659_s29 = sshll.u32 %s5628_s22, 3  ;;  %s5589_s7 = sld [smem:[#allocation24_spill]] }
  0x30   : > { %s3751_s1 = sshll.u32 %s4706_s28, 4  ;;  %s773_s19 = scalar_lea.vmem %s5533_s9, %s4706_s28 }
  0x31   : > { %s776_s23 = scalar_lea.vmem %s5534_s10, %s4706_s28  ;;  %s792_s30 = scalar_lea.vmem %s5538_s14, %s4706_s28 }
  0x32   : > { %s4711_s2 = scalar_lea.vmem %s5587_s25, %s3659_s29  ;;  %p3668_p0 = scmp.ne.s32.totalorder %s4494_s21, 0 }
  0x33   : > { %s4725_s15 = scalar_lea.vmem %s5588_s6, %s3751_s1  ;;  %s4747_s6 = scalar_lea.vmem %s5535_s11, %s3751_s1  ;;  %v798_v1 = vld [vmem:[%s4711_s2] sm:$0xff] (!%p3668_p0)  ;;  %v799_v2 = vld [vmem:[%s4711_s2 + $0x8] sm:$0xff] (!%p3668_p0)  ;;  %vm826_vm0 = vcmask (!%p3668_p0), 130048   ;;  %v800_v6 = vld [vmem:[%s4711_s2 + $0x10] sm:$0xff] (!%p3668_p0)  ;;  %vm904_vm1 = vcmask (!%p3668_p0), 261120  }
  0x34   : > { %797 = sbr.rel (%p3668_p0) target bundleno = 281 (0x119), region = 100  ;;  %s5591_s18 = sld [smem:[#allocation22_spill]] (!%p3668_p0)  ;;  %v802_v3 = vld [vmem:[%s4711_s2 + $0x20] sm:$0xff] (!%p3668_p0)  ;;  %v808_v4 = vpack.c.bf16 (!%p3668_p0), %v799_v2, %v798_v1  ;;  %v803_v5 = vld [vmem:[%s4711_s2 + $0x28] sm:$0xff] (!%p3668_p0)  ;;  %v801_v7 = vld [vmem:[%s4711_s2 + $0x18] sm:$0xff] (!%p3668_p0) }
  0x35   : > { %s4730_s26 = scalar_lea.vmem %s5589_s7, %s3751_s1  ;;  %s784_s7 = scalar_lea.vmem %s5536_s12, %s4706_s28  ;;  %v810_v8 = vpack.c.bf16 (!%p3668_p0), %v803_v5, %v802_v3  ;;  %v809_v9 = vpack.c.bf16 (!%p3668_p0), %v801_v7, %v800_v6  ;;  %v804_v10 = vld [vmem:[%s4711_s2 + $0x30] sm:$0xff] (!%p3668_p0)  ;;  %v805_v11 = vld [vmem:[%s4711_s2 + $0x38] sm:$0xff] (!%p3668_p0) }
  0x36   : > { %5590 = sst [smem:[#allocation18_spill]] %s4730_s26  ;;  %s3754_s26 = sshll.u32 %s4706_s28, 5  ;;  %3855 = vmatprep.mubr.msk.bf16.mxu0 (!%p3668_p0), %vm826_vm0, %v808_v4  ;;  %v811_v12 = vpack.c.bf16 (!%p3668_p0), %v805_v11, %v804_v10 }
  0x37   : > { %s4757_s20 = scalar_lea.vmem %s5537_s13, %s3754_s26  ;;  %3859 = vmatprep.mubr.msk.bf16.mxu1 (!%p3668_p0), %vm826_vm0, %v810_v8  ;;  %s5592_s22 = sld [smem:[#allocation20_spill]] (!%p3668_p0) }
  0x3a   : > { %v4156_v0 = vld [vmem:[%s5591_s18] sm:$0xff] (!%p3668_p0)  }
  0x3b   : > { %3853 = vmatprep.subr.bf16.mxu0 %v4156_v0  ;;  %4051 = vmatprep.subr.bf16.mxu1 %v4156_v0 }
  0x3c   : > { %3854 = vmatpush3.bf16.msra.mxu0 %v4156_v0  ;;  %4052 = vmatpush3.bf16.msra.mxu1 %v4156_v0 }
  0x3d   : > { %s5593_s25 = smov %s5592_s22  ;;  %v814_v13 = vld [vmem:[%s5592_s22 + $0x10] sm:$0xff] }
  0x3e   : > { %v818_v14 = vld [vmem:[%s5593_s25 + $0x30] sm:$0xff]  ;;  %v812_v15 = vld [vmem:[%s5593_s25] sm:$0xff]  ;;  %v815_v19 = vld [vmem:[%s5593_s25 + $0x18] sm:$0xff] }
  0x3f   : > { %3856 = vmatmul.mubr.msk.bf16.vlgmr.msra.gmra.mrb[0].mxu0 %vm826_vm0, %v809_v9  ;;  %3860 = vmatmul.mubr.msk.bf16.vlgmr.msra.gmra.mrb[0].mxu1 %vm826_vm0, %v811_v12  ;;  %v816_v16 = vld [vmem:[%s5593_s25 + $0x20] sm:$0xff]  ;;  %v819_v20 = vld [vmem:[%s5593_s25 + $0x38] sm:$0xff]  ;;  %v813_v25 = vld [vmem:[%s5593_s25 + $0x8] sm:$0xff] }
  0x40   : > { %v817_v26 = vld [vmem:[%s5593_s25 + $0x28] sm:$0xff] }
 0x112   : > { %v3857_v17 = vpop.f32.mrb[0].mxu0  ;;  %v3861_v18 = vpop.f32.mrb[0].mxu1 }
 0x113   : > { %v882_v21 = vadd.f32 %v3857_v17, %v814_v13  ;;  %v898_v22 = vadd.f32 %v3861_v18, %v818_v14  ;;  %v873_v23 = vpop.f32.mrb[1].mxu0  ;;  %v889_v24 = vpop.f32.mrb[1].mxu1 }
 0x114   : > { %v874_v27 = vadd.f32 %v873_v23, %v812_v15  ;;  %v890_v28 = vadd.f32 %v889_v24, %v816_v16  ;;  %v3858_v29 = vpop.f32.mrb[2].mxu0  ;;  %v3862_v30 = vpop.f32.mrb[2].mxu1 }
 0x115   : > { %907 = vst.msk [vmem:[#allocation2 + $0x10] sm:$0xff] %vm904_vm1, %v882_v21  ;;  %911 = vst.msk [vmem:[#allocation2 + $0x30] sm:$0xff] %vm904_vm1, %v898_v22  ;;  %v885_v31 = vadd.f32 %v3858_v29, %v815_v19  ;;  %v901_v32 = vadd.f32 %v3862_v30, %v819_v20  ;;  %v876_v33 = vpop.f32.mrb[3].mxu0  ;;  %v892_v34 = vpop.f32.mrb[3].mxu1 }
 0x116   : > { %905 = vst.msk [vmem:[#allocation2] sm:$0xff] %vm904_vm1, %v874_v27  ;;  %909 = vst.msk [vmem:[#allocation2 + $0x20] sm:$0xff] %vm904_vm1, %v890_v28  ;;  %v877_v35 = vadd.f32 %v876_v33, %v813_v25  ;;  %v893_v36 = vadd.f32 %v892_v34, %v817_v26 }
 0x117   : > { %908 = vst.msk [vmem:[#allocation2 + $0x18] sm:$0xff] %vm904_vm1, %v885_v31  ;;  %912 = vst.msk [vmem:[#allocation2 + $0x38] sm:$0xff] %vm904_vm1, %v901_v32 }
 0x118   : > { %906 = vst.msk [vmem:[#allocation2 + $0x8] sm:$0xff] %vm904_vm1, %v877_v35  ;;  %910 = vst.msk [vmem:[#allocation2 + $0x28] sm:$0xff] %vm904_vm1, %v893_v36 }
 0x119 PF: > { %vm923_vm2 = vcmask 261120   ;;  %v4217_v29 = vld [vmem:[%s4725_s15] sm:$0xff]   ;;  %v4218_v30 = vld [vmem:[%s4725_s15 + $0x8] sm:$0xff]   ;;  %s5594_s1 = scalar_lea.vmem %s5528_s4, %s4706_s28  ;;  %s5595_s18 = scalar_lea.vmem %s5529_s5, %s4706_s28  ;;  %vm1165_vm3 = vcmask 64512   ;;  %vm2738_vm4 = vcmask 130048   ;;  %vm2747_vm5 = vcmask 195584  }
 0x11a   : > { %3863 = vmatprep.subr.bf16.mxu0 %v4217_v29  ;;  %s4512_s26 = smov 96   ;;  %s5596_s29 = sld [smem:[#allocation21_spill]]  ;;  %vm3229_vm6 = vcmask 523264  }
 0x11b   : > { %3864 = vmatpush3.bf16.msra.mxu0 %v4217_v29  ;;  %s4513_s3 = smov 64   ;;  %s4514_s24 = smov 88  }
 0x11c   : > { %v915_v38 = vld [vmem:[#allocation2 + $0x10] sm:$0xff]  ;;  %3865 = vmatprep.subr.bf16.mxu0 %v4218_v30  ;;  %s4515_s15 = smov 120   ;;  %s4516_s27 = smov 56  }
 0x11d   : > { %v913_v37 = vld [vmem:[#allocation2] sm:$0xff]  ;;  %v930_v41 = vsel %vm923_vm2, %v915_v38, 0.0  ;;  %v919_v49 = vld [vmem:[#allocation2 + $0x30] sm:$0xff]  ;;  %s4518_s2 = smov 112   ;;  %s4519_s16 = smov 48  }
 0x11e   : > { %v924_v40 = vsel %vm923_vm2, %v913_v37, 0.0  ;;  %v916_v42 = vld [vmem:[#allocation2 + $0x18] sm:$0xff]  ;;  %v917_v43 = vld [vmem:[#allocation2 + $0x20] sm:$0xff]  ;;  %931 = vadd.xlane.f32.xlu1 %v930_v41  ;;  %v942_v51 = vsel %vm923_vm2, %v919_v49, 0.0  ;;  %p3740_p1 = scmp.ne.s32.totalorder %s4494_s21, 1 }
 0x11f   : > { %v914_v39 = vld [vmem:[#allocation2 + $0x8] sm:$0xff]  ;;  %925 = vadd.xlane.f32.xlu0 %v924_v40  ;;  %v933_v46 = vsel %vm923_vm2, %v916_v42, 0.0  ;;  %v936_v47 = vsel %vm923_vm2, %v917_v43, 0.0  ;;  %v920_v50 = vld [vmem:[#allocation2 + $0x38] sm:$0xff]  ;;  %3866 = vmatpush3.bf16.msra.mxu0 %v4218_v30  ;;  %vm3332_vm7 = vcmask (!%p3740_p1), 1041409   ;;  %vm3335_vm8 = vcmask (!%p3740_p1), 254976  }
 0x120   : > { %v918_v44 = vld [vmem:[#allocation2 + $0x28] sm:$0xff]  ;;  %v927_v45 = vsel %vm923_vm2, %v914_v39, 0.0  ;;  %v945_v52 = vsel %vm923_vm2, %v920_v50, 0.0  ;;  %vm4527_vm9 = vmmov (!%p3740_p1), 0   ;;  %s5603_s22 = sld [smem:[#allocation28_spill]] (!%p3740_p1) }
 0x121   : > { %v939_v48 = vsel %vm923_vm2, %v918_v44, 0.0 }
 0x122   : > { %934 = vadd.xlane.f32.xlu1 %v933_v46 }
 0x123   : > { %928 = vadd.xlane.f32.xlu0 %v927_v45 }
 0x126   : > { %940 = vadd.xlane.f32.xlu1 %v939_v48 }
 0x127   : > { %937 = vadd.xlane.f32.xlu0 %v936_v47 }
 0x12a   : > { %946 = vadd.xlane.f32.xlu1 %v945_v52 }
 0x12b   : > { %943 = vadd.xlane.f32.xlu0 %v942_v51 }
 0x1ab   : > { %v932_v54 = vpop.xlane.xlu1 %931 }
 0x1ac   : > { %v926_v53 = vpop.xlane.xlu0 %925  ;;  %v951_v56 = vmul.f32 0.03125, %v932_v54 }
 0x1ad   : > { %v949_v55 = vmul.f32 0.03125, %v926_v53 }
 0x1ae   : > { %v4822_v58 = vsub.f32 %v915_v38, %v951_v56  ;;  %v3674_v56 = vld [vmem:[%s5594_s1] ss:$0 sm:$0xff]  ;;  %s4517_s1 = smov 80  }
 0x1af   : > { %v4820_v57 = vsub.f32 %v913_v37, %v949_v55  ;;  %v935_v60 = vpop.xlane.xlu1 %934 }
 0x1b0   : > { %v929_v59 = vpop.xlane.xlu0 %928  ;;  %v952_v62 = vmul.f32 0.03125, %v935_v60  ;;  %v967_v0 = vmul.f32 %v4822_v58, %v4822_v58 }
 0x1b1   : > { %v950_v61 = vmul.f32 0.03125, %v929_v59  ;;  %v965_v63 = vmul.f32 %v4820_v57, %v4820_v57 }
 0x1b2   : > { %v4830_v2 = vsub.f32 %v916_v42, %v952_v62  ;;  %v979_v6 = vsel %vm923_vm2, %v967_v0, 0.0 }
 0x1b3   : > { %v4828_v1 = vsub.f32 %v914_v39, %v950_v61  ;;  %v973_v3 = vsel %vm923_vm2, %v965_v63, 0.0  ;;  %v941_v5 = vpop.xlane.xlu1 %940 }
 0x1b4   : > { %974 = vadd.xlane.f32.xlu0 %v973_v3  ;;  %v938_v4 = vpop.xlane.xlu0 %937  ;;  %v954_v8 = vmul.f32 0.03125, %v941_v5  ;;  %v968_v10 = vmul.f32 %v4830_v2, %v4830_v2 }
 0x1b5   : > { %v953_v7 = vmul.f32 0.03125, %v938_v4  ;;  %v966_v9 = vmul.f32 %v4828_v1, %v4828_v1 }
 0x1b6   : > { %v4840_v12 = vsub.f32 %v918_v44, %v954_v8  ;;  %v982_v16 = vsel %vm923_vm2, %v968_v10, 0.0 }
 0x1b7   : > { %v4838_v11 = vsub.f32 %v917_v43, %v953_v7  ;;  %v976_v13 = vsel %vm923_vm2, %v966_v9, 0.0  ;;  %v947_v15 = vpop.xlane.xlu1 %946 }
 0x1b8   : > { %980 = vadd.xlane.f32.xlu0 %v979_v6  ;;  %977 = vadd.xlane.f32.xlu1 %v976_v13  ;;  %v944_v14 = vpop.xlane.xlu0 %943  ;;  %v956_v18 = vmul.f32 0.03125, %v947_v15  ;;  %v970_v20 = vmul.f32 %v4840_v12, %v4840_v12 }
 0x1b9   : > { %v955_v17 = vmul.f32 0.03125, %v944_v14  ;;  %v969_v19 = vmul.f32 %v4838_v11, %v4838_v11 }
 0x1ba   : > { %v4850_v22 = vsub.f32 %v920_v50, %v956_v18  ;;  %v988_v24 = vsel %vm923_vm2, %v970_v20, 0.0 }
 0x1bb   : > { %v4848_v21 = vsub.f32 %v919_v49, %v955_v17  ;;  %v985_v23 = vsel %vm923_vm2, %v969_v19, 0.0 }
 0x1bc   : > { %983 = vadd.xlane.f32.xlu1 %v982_v16  ;;  %986 = vadd.xlane.f32.xlu0 %v985_v23  ;;  %v972_v26 = vmul.f32 %v4850_v22, %v4850_v22 }
 0x1bd   : > { %v971_v25 = vmul.f32 %v4848_v21, %v4848_v21 }
 0x1be   : > { %v994_v28 = vsel %vm923_vm2, %v972_v26, 0.0 }
 0x1bf   : > { %v991_v27 = vsel %vm923_vm2, %v971_v25, 0.0 }
 0x1c0   : > { %989 = vadd.xlane.f32.xlu1 %v988_v24  ;;  %992 = vadd.xlane.f32.xlu0 %v991_v27 }
 0x1c4   : > { %995 = vadd.xlane.f32.xlu1 %v994_v28 }
 0x241   : > { %v975_v31 = vpop.xlane.xlu0 %974 }
 0x242   : > { %v997_v32 = vmul.f32 0.03125, %v975_v31 }
 0x244   : > { %v1005_v33 = vadd.f32 1e-05, %v997_v32 }
 0x245   : > { %v978_v34 = vpop.xlane.xlu1 %977  ;;  %v981_v35 = vpop.xlane.xlu0 %980 }
 0x246   : > { %4227 = vrsqrt.f32 %v1005_v33  ;;  %v998_v36 = vmul.f32 0.03125, %v978_v34  ;;  %v999_v37 = vmul.f32 0.03125, %v981_v35 }
 0x248   : > { %v1006_v38 = vadd.f32 1e-05, %v998_v36  ;;  %v1007_v39 = vadd.f32 1e-05, %v999_v37 }
 0x249   : > { %v984_v40 = vpop.xlane.xlu1 %983  ;;  %v987_v41 = vpop.xlane.xlu0 %986 }
 0x24a   : > { %4229 = vrsqrt.f32 %v1006_v38  ;;  %v1000_v42 = vmul.f32 0.03125, %v984_v40  ;;  %v1001_v43 = vmul.f32 0.03125, %v987_v41 }
 0x24b   : > { %4231 = vrsqrt.f32 %v1007_v39 }
 0x24c   : > { %v1008_v44 = vadd.f32 1e-05, %v1000_v42  ;;  %v1009_v45 = vadd.f32 1e-05, %v1001_v43 }
 0x24d   : > { %v990_v46 = vpop.xlane.xlu1 %989  ;;  %v993_v47 = vpop.xlane.xlu0 %992 }
 0x24e   : > { %4233 = vrsqrt.f32 %v1008_v44  ;;  %v1002_v48 = vmul.f32 0.03125, %v990_v46  ;;  %v1003_v49 = vmul.f32 0.03125, %v993_v47 }
 0x24f   : > { %4235 = vrsqrt.f32 %v1009_v45 }
 0x250   : > { %v4228_v50 = vpop.eup %4227  ;;  %v1010_v51 = vadd.f32 1e-05, %v1002_v48  ;;  %v1011_v52 = vadd.f32 1e-05, %v1003_v49 }
 0x251   : > { %v996_v53 = vpop.xlane.xlu1 %995  ;;  %v1021_v54 = vmul.f32 %v4228_v50, %v4820_v57  ;;  %v3675_v57 = vld [vmem:[%s5595_s18] ss:$0 sm:$0xff]  ;;  %s4520_s18 = smov 72  }
 0x252   : > { %4237 = vrsqrt.f32 %v1010_v51  ;;  %v1004_v55 = vmul.f32 0.03125, %v996_v53  ;;  %v4915_v51 = vld [vmem:[%s5596_s29] ss:$0 sm:$0xff] }
 0x253   : > { %4239 = vrsqrt.f32 %v1011_v52  ;;  %v1035_v63 = vmul.f32 %v3674_v56, %v1021_v54 }
 0x254   : > { %v4230_v59 = vpop.eup %4229  ;;  %v1012_v60 = vadd.f32 1e-05, %v1004_v55 }
 0x255   : > { %v4232_v61 = vpop.eup %4231  ;;  %v1022_v62 = vmul.f32 %v4230_v59, %v4828_v1  ;;  %v1049_v6 = vadd.f32 %v3675_v57, %v1035_v63 }
 0x256   : > { %4241 = vrsqrt.f32 %v1012_v60  ;;  %v1023_v0 = vmul.f32 %v4232_v61, %v4822_v58 }
 0x257   : > { %v1036_v3 = vmul.f32 %v3674_v56, %v1022_v62 }
 0x258   : > { %v4234_v4 = vpop.eup %4233  ;;  %v1037_v9 = vmul.f32 %v3674_v56, %v1023_v0 }
 0x259   : > { %v4236_v5 = vpop.eup %4235  ;;  %v1050_v7 = vadd.f32 %v3675_v57, %v1036_v3  ;;  %v1024_v8 = vmul.f32 %v4234_v4, %v4830_v2 }
 0x25a   : > { %v1025_v10 = vmul.f32 %v4236_v5, %v4838_v11  ;;  %v1051_v16 = vadd.f32 %v3675_v57, %v1037_v9 }
 0x25b   : > { %v1061_v1 = vpack.c.bf16 %v1050_v7, %v1049_v6  ;;  %v1038_v13 = vmul.f32 %v3674_v56, %v1024_v8 }
 0x25c   : > { %v4238_v14 = vpop.eup %4237  ;;  %v1039_v18 = vmul.f32 %v3674_v56, %v1025_v10 }
 0x25d   : > { %v4240_v15 = vpop.eup %4239  ;;  %3867 = vmatprep.mubr.msk.bf16.mxu0 %vm923_vm2, %v1061_v1  ;;  %v1052_v17 = vadd.f32 %v3675_v57, %v1038_v13  ;;  %v1026_v58 = vmul.f32 %v4238_v14, %v4840_v12 }
 0x25e   : > { %v1027_v19 = vmul.f32 %v4240_v15, %v4848_v21  ;;  %v1053_v2 = vadd.f32 %v3675_v57, %v1039_v18 }
 0x25f   : > { %v1062_v20 = vpack.c.bf16 %v1052_v17, %v1051_v16  ;;  %v1040_v23 = vmul.f32 %v3674_v56, %v1026_v58 }
 0x260   : > { %v4242_v24 = vpop.eup %4241  ;;  %v1041_v26 = vmul.f32 %v3674_v56, %v1027_v19 }
 0x261   : > { %3868 = vmatmul.mubr.msk.bf16.vlgmr.msra.gmra.mrb[0].mxu0 %vm923_vm2, %v1062_v20  ;;  %v1054_v11 = vadd.f32 %v3675_v57, %v1040_v23  ;;  %v1028_v25 = vmul.f32 %v4242_v24, %v4850_v22 }
 0x262   : > { %v1055_v29 = vadd.f32 %v3675_v57, %v1041_v26 }
 0x263   : > { %v1063_v27 = vpack.c.bf16 %v1054_v11, %v1053_v2  ;;  %v1042_v28 = vmul.f32 %v3674_v56, %v1028_v25 }
 0x265   : > { %3871 = vmatprep.mubr.msk.bf16.mxu0 %vm923_vm2, %v1063_v27  ;;  %v1056_v30 = vadd.f32 %v3675_v57, %v1042_v28 }
 0x267   : > { %v1064_v12 = vpack.c.bf16 %v1056_v30, %v1055_v29 }
 0x269   : > { %3872 = vmatmul.mubr.msk.bf16.gmra.mrb[4].mxu0 %vm923_vm2, %v1064_v12 }
 0x334   : > { %v3869_v21 = vpop.f32.mrb[0].mxu0 }
 0x335   : > { %v1123_v31 = vpop.f32.mrb[1].mxu0 }
 0x336   : > { %v3870_v32 = vpop.f32.mrb[2].mxu0 }
 0x337   : > { %v4884_v33 = vpack.c.bf16 %v3870_v32, %v3869_v21  ;;  %v1126_v34 = vpop.f32.mrb[3].mxu0 }
 0x338   : > { %v4886_v35 = vpack.c.bf16 %v1126_v34, %v1123_v31 }
 0x339   : > { %1163 = vrot.lane.b32.xlu1 %v4884_v33, %s4512_s26 }
 0x33a   : > { %1161 = vrot.lane.b32.xlu0 %v4886_v35, %s4512_s26  ;;  %3879 = vmatprep.mubr.msk.bf16.mxu1 %vm1165_vm3, %v4886_v35 }
 0x33c   : > { %v3873_v22 = vpop.f32.mrb[4].mxu0 }
 0x33d   : > { %v1139_v36 = vpop.f32.mrb[5].mxu0 }
 0x33e   : > { %v3874_v37 = vpop.f32.mrb[6].mxu0 }
 0x33f   : > { %v4892_v38 = vpack.c.bf16 %v3874_v37, %v3873_v22  ;;  %v1142_v39 = vpop.f32.mrb[7].mxu0 }
 0x340   : > { %v4894_v40 = vpack.c.bf16 %v1142_v39, %v1139_v36 }
 0x342   : > { %1229 = vrot.lane.b32.xlu1 %v4894_v40, %s4512_s26  ;;  %3887 = vmatprep.mubr.msk.bf16.mxu0 %vm1165_vm3, %v4894_v40 }
 0x346   : > { %1231 = vrot.lane.b32.xlu1 %v4892_v38, %s4512_s26  ;;  %s4521_s26 = smov 104  }
 0x3ab   : > { %v1164_v43 = vpop.permute.xlu1 %1163 }
 0x3ac   : > { %v1162_v41 = vpop.permute.xlu0 %1161  ;;  %v1176_v45 = vsel %vm1165_vm3, %v1164_v43, 0 }
 0x3ad   : > { %4053 = vmatprep.subr.msk.bf16.mxu1 %vm1165_vm3, %v1162_v41  ;;  %v1173_v42 = vsel %vm1165_vm3, %v1162_v41, 0 }
 0x3ae   : > { %3876 = vmatpush3.bf16.xpose.msra.mxu1 %v1173_v42 }
 0x3af   : > { %4054 = vmatprep.subr.msk.bf16.mxu1 %vm1165_vm3, %v1164_v43 }
 0x3b4   : > { %v1230_v44 = vpop.permute.xlu1 %1229 }
 0x3b5   : > { %4055 = vmatprep.subr.msk.bf16.mxu0 %vm1165_vm3, %v1230_v44  ;;  %v1240_v46 = vsel %vm1165_vm3, %v1230_v44, 0 }
 0x3b6   : > { %3878 = vmatpush3.bf16.xpose.msra.mxu1 %v1176_v45  ;;  %3884 = vmatpush3.bf16.xpose.msra.mxu0 %v1240_v46 }
 0x3b8   : > { %v1232_v47 = vpop.permute.xlu1 %1231 }
 0x3b9   : > { %4056 = vmatprep.subr.msk.bf16.mxu0 %vm1165_vm3, %v1232_v47  ;;  %v1243_v48 = vsel %vm1165_vm3, %v1232_v47, 0 }
 0x3bd   : > { %3880 = vmatmul.mubr.msk.bf16.vlgmr.msra.gmra.mrb[0].mxu1 %vm1165_vm3, %v4884_v33 }
 0x3be   : > { %3886 = vmatpush3.bf16.xpose.msra.mxu0 %v1243_v48 }
 0x3c5   : > { %3888 = vmatmul.mubr.msk.bf16.vlgmr.msra.gmra.mrb[8].mxu0 %vm1165_vm3, %v4892_v38 }
 0x490   : > { %v3881_v49 = vpop.f32.mrb[0].mxu1 }
 0x491   : > { %v1212_v50 = vpop.f32.mrb[1].mxu1  ;;  %v1296_v52 = vmul.f32 0.35355338, %v3881_v49 }
 0x492   : > { %v1294_v53 = vmul.f32 0.35355338, %v1212_v50  ;;  %v3882_v54 = vpop.f32.mrb[2].mxu1 }
 0x493   : > { %v1215_v55 = vpop.f32.mrb[3].mxu1  ;;  %v1297_v60 = vmul.f32 0.35355338, %v3882_v54  ;;  %v1310_v63 = vadd.f32 %v4915_v51, %v1296_v52 }
 0x494   : > { %v1295_v56 = vmul.f32 0.35355338, %v1215_v55  ;;  %v1308_v59 = vadd.f32 %v4915_v51, %v1294_v53 }
 0x495   : > { %v1322_v6 = vsel %vm923_vm2, %v1310_v63, -inf  ;;  %v1311_v7 = vadd.f32 %v4915_v51, %v1297_v60 }
 0x496   : > { %v1316_v61 = vsel %vm923_vm2, %v1308_v59, -inf  ;;  %v1309_v62 = vadd.f32 %v4915_v51, %v1295_v56 }
 0x497   : > { %1317 = vmax.xlane.f32.xlu0 %v1316_v61  ;;  %v1325_v13 = vsel %vm923_vm2, %v1311_v7, -inf }
 0x498   : > { %v3889_v57 = vpop.f32.mrb[8].mxu0  ;;  %v1319_v0 = vsel %vm923_vm2, %v1309_v62, -inf }
 0x499   : > { %v1279_v3 = vpop.f32.mrb[9].mxu0  ;;  %1320 = vmax.xlane.f32.xlu1 %v1319_v0  ;;  %v1300_v1 = vmul.f32 0.35355338, %v3889_v57 }
 0x49a   : > { %v1298_v4 = vmul.f32 0.35355338, %v1279_v3  ;;  %v3890_v5 = vpop.f32.mrb[10].mxu0 }
 0x49b   : > { %v1282_v8 = vpop.f32.mrb[11].mxu0  ;;  %1323 = vmax.xlane.f32.xlu0 %v1322_v6  ;;  %v1301_v9 = vmul.f32 0.35355338, %v3890_v5  ;;  %v1314_v18 = vadd.f32 %v4915_v51, %v1300_v1 }
 0x49c   : > { %v1299_v10 = vmul.f32 0.35355338, %v1282_v8  ;;  %v1312_v15 = vadd.f32 %v4915_v51, %v1298_v4 }
 0x49d   : > { %v1315_v17 = vadd.f32 %v4915_v51, %v1301_v9  ;;  %v1334_v20 = vsel %vm923_vm2, %v1314_v18, -inf }
 0x49e   : > { %v1313_v14 = vadd.f32 %v4915_v51, %v1299_v10  ;;  %v1328_v58 = vsel %vm923_vm2, %v1312_v15, -inf }
 0x49f   : > { %1326 = vmax.xlane.f32.xlu0 %v1325_v13  ;;  %v1337_v19 = vsel %vm923_vm2, %v1315_v17, -inf }
 0x4a0   : > { %v1331_v16 = vsel %vm923_vm2, %v1313_v14, -inf }
 0x4a1   : > { %1332 = vmax.xlane.f32.xlu1 %v1331_v16 }
 0x4a3   : > { %1329 = vmax.xlane.f32.xlu0 %v1328_v58 }
 0x4a5   : > { %1338 = vmax.xlane.f32.xlu1 %v1337_v19 }
 0x4a7   : > { %1335 = vmax.xlane.f32.xlu0 %v1334_v20 }
 0x4b6   : > { %1410 = vrot.lane.b32.xlu1 %v4884_v33, %s4513_s3 }
 0x4ba   : > { %1469 = vrot.lane.b32.xlu1 %v4894_v40, %s4513_s3 }
 0x4bd   : > { %1408 = vrot.lane.b32.xlu0 %v4886_v35, %s4513_s3 }
 0x4be   : > { %1471 = vrot.lane.b32.xlu1 %v4892_v38, %s4513_s3  ;;  %s4522_s3 = smov 40  }
 0x4c1   : > { %1534 = vrot.lane.b32.xlu0 %v4886_v35, %s4514_s24 }
 0x4c2   : > { %1536 = vrot.lane.b32.xlu1 %v4884_v33, %s4514_s24 }
 0x524   : > { %v1318_v23 = vpop.xlane.xlu0 %1317 }
 0x525   : > { %v1340_v24 = vsub.f32 %v1308_v59, %v1318_v23 }
 0x526   : > { %v1321_v2 = vpop.xlane.xlu1 %1320 }
 0x527   : > { %v1348_v26 = vmul.f32 1.442695, %v1340_v24  ;;  %v1341_v27 = vsub.f32 %v1309_v62, %v1321_v2 }
 0x528   : > { %v1324_v11 = vpop.xlane.xlu0 %1323 }
 0x529   : > { %v1342_v25 = vsub.f32 %v1310_v63, %v1324_v11  ;;  %v1350_v21 = vmul.f32 1.442695, %v1341_v27 }
 0x52b   : > { %v1352_v28 = vmul.f32 1.442695, %v1342_v25 }
 0x52c   : > { %v1327_v29 = vpop.xlane.xlu0 %1326 }
 0x52d   : > { %4243 = vpow2.f32 %v1352_v28  ;;  %v1343_v30 = vsub.f32 %v1311_v7, %v1327_v29 }
 0x52e   : > { %v1333_v12 = vpop.xlane.xlu1 %1332  ;;  %4245 = vpow2.f32 %v1348_v26 }
 0x52f   : > { %v1354_v31 = vmul.f32 1.442695, %v1343_v30  ;;  %v1345_v34 = vsub.f32 %v1313_v14, %v1333_v12 }
 0x530   : > { %v1330_v32 = vpop.xlane.xlu0 %1329 }
 0x531   : > { %4247 = vpow2.f32 %v1354_v31  ;;  %v1344_v36 = vsub.f32 %v1312_v15, %v1330_v32  ;;  %v1358_v43 = vmul.f32 1.442695, %v1345_v34 }
 0x532   : > { %v1339_v22 = vpop.xlane.xlu1 %1338  ;;  %4249 = vpow2.f32 %v1350_v21 }
 0x533   : > { %v1347_v37 = vsub.f32 %v1315_v17, %v1339_v22  ;;  %v1356_v46 = vmul.f32 1.442695, %v1344_v36 }
 0x534   : > { %v1336_v39 = vpop.xlane.xlu0 %1335 }
 0x535   : > { %v1362_v41 = vmul.f32 1.442695, %v1347_v37  ;;  %v1346_v42 = vsub.f32 %v1314_v18, %v1336_v39 }
 0x536   : > { %v1411_v44 = vpop.permute.xlu1 %1410 }
 0x537   : > { %v4941_v45 = vpop.eup %4243  ;;  %4251 = vpow2.f32 %v1362_v41  ;;  %v1360_v47 = vmul.f32 1.442695, %v1346_v42 }
 0x538   : > { %v1409_v48 = vpop.permute.xlu0 %1408  ;;  %v1370_v49 = vsel %vm923_vm2, %v4941_v45, 0.0  ;;  %v4945_v50 = vpop.eup %4245 }
 0x539   : > { %4253 = vpow2.f32 %v1360_v47  ;;  %1371 = vadd.xlane.f32.xlu0 %v1370_v49  ;;  %3891 = vmatprep.subr.bf16.mxu1 %v1409_v48  ;;  %v1364_v54 = vsel %vm923_vm2, %v4945_v50, 0.0 }
 0x53a   : > { %4255 = vpow2.f32 %v1358_v43  ;;  %3892 = vmatpush3.bf16.msra.mxu1 %v1409_v48  ;;  %v1470_v52 = vpop.permute.xlu1 %1469 }
 0x53b   : > { %v4248_v53 = vpop.eup %4247  ;;  %4257 = vpow2.f32 %v1356_v46  ;;  %3893 = vmatprep.subr.bf16.mxu1 %v1411_v44  ;;  %3899 = vmatprep.subr.bf16.mxu0 %v1470_v52 }
 0x53c   : > { %3900 = vmatpush3.bf16.msra.mxu0 %v1470_v52  ;;  %v1373_v55 = vsel %vm923_vm2, %v4248_v53, 0.0  ;;  %v4250_v56 = vpop.eup %4249  ;;  %v1535_v59 = vpop.permute.xlu0 %1534 }
 0x53d   : > { %1365 = vadd.xlane.f32.xlu0 %v1364_v54  ;;  %1374 = vadd.xlane.f32.xlu1 %v1373_v55  ;;  %v1367_v61 = vsel %vm923_vm2, %v4250_v56, 0.0  ;;  %v1545_v30 = vsel %vm1165_vm3, %v1535_v59, 0 }
 0x53e   : > { %3894 = vmatpush3.bf16.msra.mxu1 %v1411_v44  ;;  %v1472_v60 = vpop.permute.xlu1 %1471 }
 0x53f   : > { %3901 = vmatprep.subr.bf16.mxu0 %v1472_v60  ;;  %4057 = vmatprep.subr.msk.bf16.mxu1 %vm1165_vm3, %v1535_v59 }
 0x540   : > { %3902 = vmatpush3.bf16.msra.mxu0 %v1472_v60 }
 0x541   : > { %v4252_v62 = vpop.eup %4251  ;;  %1368 = vadd.xlane.f32.xlu1 %v1367_v61 }
 0x542   : > { %v1385_v3 = vsel %vm923_vm2, %v4252_v62, 0.0  ;;  %v1537_v7 = vpop.permute.xlu1 %1536 }
 0x543   : > { %v4254_v63 = vpop.eup %4253  ;;  %v1548_v41 = vsel %vm1165_vm3, %v1537_v7, 0 }
 0x544   : > { %v4256_v57 = vpop.eup %4255  ;;  %v1382_v0 = vsel %vm923_vm2, %v4254_v63, 0.0 }
 0x545   : > { %v4258_v4 = vpop.eup %4257  ;;  %1383 = vadd.xlane.f32.xlu0 %v1382_v0  ;;  %1386 = vadd.xlane.f32.xlu1 %v1385_v3  ;;  %v1379_v6 = vsel %vm923_vm2, %v4256_v57, 0.0 }
 0x546   : > { %v1376_v5 = vsel %vm923_vm2, %v4258_v4, 0.0 }
 0x549   : > { %1377 = vadd.xlane.f32.xlu0 %v1376_v5  ;;  %1380 = vadd.xlane.f32.xlu1 %v1379_v6 }
 0x55a   : > { %1530 = vrot.lane.b32.xlu1 %v4886_v35, %s4515_s15 }
 0x55e   : > { %1605 = vrot.lane.b32.xlu1 %v4892_v38, %s4514_s24 }
 0x55f   : > { %1603 = vrot.lane.b32.xlu0 %v4894_v40, %s4514_s24  ;;  %s4523_s24 = smov 8  }
 0x562   : > { %1601 = vrot.lane.b32.xlu1 %v4892_v38, %s4515_s15 }
 0x563   : > { %1532 = vrot.lane.b32.xlu0 %v4884_v33, %s4515_s15 }
 0x567   : > { %1599 = vrot.lane.b32.xlu0 %v4894_v40, %s4515_s15  ;;  %s4524_s15 = smov 16  }
 0x5c6   : > { %v1372_v8 = vpop.xlane.xlu0 %1371 }
 0x5ca   : > { %v1366_v9 = vpop.xlane.xlu0 %1365  ;;  %v1375_v10 = vpop.xlane.xlu1 %1374 }
 0x5cb   : > { %4259 = vrcp.f32 %v1375_v10 }
 0x5cc   : > { %4261 = vrcp.f32 %v1366_v9 }
 0x5cd   : > { %4263 = vrcp.f32 %v1372_v8 }
 0x5ce   : > { %v1369_v1 = vpop.xlane.xlu1 %1368 }
 0x5cf   : > { %4265 = vrcp.f32 %v1369_v1 }
 0x5d2   : > { %v1384_v13 = vpop.xlane.xlu0 %1383  ;;  %v1387_v14 = vpop.xlane.xlu1 %1386 }
 0x5d3   : > { %4267 = vrcp.f32 %v1384_v13 }
 0x5d4   : > { %4269 = vrcp.f32 %v1387_v14 }
 0x5d5   : > { %v4260_v15 = vpop.eup %4259 }
 0x5d6   : > { %v1378_v16 = vpop.xlane.xlu0 %1377  ;;  %v1381_v17 = vpop.xlane.xlu1 %1380  ;;  %v1399_v20 = vmul.f32 %v4260_v15, %v4248_v53 }
 0x5d7   : > { %v4262_v58 = vpop.eup %4261  ;;  %4271 = vrcp.f32 %v1378_v16 }
 0x5d8   : > { %v4264_v18 = vpop.eup %4263  ;;  %4273 = vrcp.f32 %v1381_v17  ;;  %v1396_v24 = vmul.f32 %v4262_v58, %v4945_v50 }
 0x5d9   : > { %v4266_v19 = vpop.eup %4265  ;;  %v1398_v11 = vmul.f32 %v4264_v18, %v4941_v45 }
 0x5da   : > { %v1604_v23 = vpop.permute.xlu0 %1603  ;;  %v1397_v2 = vmul.f32 %v4266_v19, %v4250_v56  ;;  %v1531_v29 = vpop.permute.xlu1 %1530 }
 0x5db   : > { %4059 = vmatprep.subr.msk.bf16.mxu0 %vm1165_vm3, %v1604_v23  ;;  %v1405_v26 = vpack.c.bf16 %v1399_v20, %v1398_v11  ;;  %v1614_v43 = vsel %vm1165_vm3, %v1604_v23, 0 }
 0x5dc   : > { %v1404_v25 = vpack.c.bf16 %v1397_v2, %v1396_v24 }
 0x5dd   : > { %v4268_v27 = vpop.eup %4267 }
 0x5de   : > { %3895 = vmatprep.mubr.msk.bf16.mxu1 %vm923_vm2, %v1404_v25  ;;  %v4270_v28 = vpop.eup %4269  ;;  %v1402_v31 = vmul.f32 %v4268_v27, %v4254_v63  ;;  %v1533_v34 = vpop.permute.xlu0 %1532 }
 0x5df   : > { %3896 = vmatmul.mubr.msk.bf16.vlgmr.msra.gmra.mrb[4].mxu1 %vm923_vm2, %v1405_v26  ;;  %v1403_v32 = vmul.f32 %v4270_v28, %v4252_v62  ;;  %v1606_v44 = vpop.permute.xlu1 %1605 }
 0x5e0   : > { %3908 = vmatpush3.bf16.xpose.msra.mxu1 %v1545_v30  ;;  %3911 = vmatprep.mubr.msk.bf16.mxu1 %vm1165_vm3, %v1531_v29  ;;  %v1617_v45 = vsel %vm1165_vm3, %v1606_v44, 0 }
 0x5e1   : > { %v4272_v12 = vpop.eup %4271  ;;  %4058 = vmatprep.subr.msk.bf16.mxu1 %vm1165_vm3, %v1537_v7  ;;  %v1407_v39 = vpack.c.bf16 %v1403_v32, %v1402_v31 }
 0x5e2   : > { %v4274_v21 = vpop.eup %4273  ;;  %v1400_v22 = vmul.f32 %v4272_v12, %v4258_v4  ;;  %v1600_v42 = vpop.permute.xlu0 %1599 }
 0x5e3   : > { %v1401_v36 = vmul.f32 %v4274_v21, %v4256_v57  ;;  %v1602_v46 = vpop.permute.xlu1 %1601 }
 0x5e5   : > { %v1406_v37 = vpack.c.bf16 %v1401_v36, %v1400_v22 }
 0x5e7   : > { %3903 = vmatprep.mubr.msk.bf16.mxu0 %vm923_vm2, %v1406_v37 }
 0x5e8   : > { %3904 = vmatmul.mubr.msk.bf16.vlgmr.msra.gmra.mrb[12].mxu0 %vm923_vm2, %v1407_v39  ;;  %3910 = vmatpush3.bf16.xpose.msra.mxu1 %v1548_v41 }
 0x5e9   : > { %3916 = vmatpush3.bf16.xpose.msra.mxu0 %v1614_v43  ;;  %3919 = vmatprep.mubr.msk.bf16.mxu0 %vm1165_vm3, %v1600_v42 }
 0x5ea   : > { %4060 = vmatprep.subr.msk.bf16.mxu0 %vm1165_vm3, %v1606_v44 }
 0x5ef   : > { %3912 = vmatmul.mubr.msk.bf16.vlgmr.msra.gmra.mrb[8].mxu1 %vm1165_vm3, %v1533_v34 }
 0x5f1   : > { %3918 = vmatpush3.bf16.xpose.msra.mxu0 %v1617_v45 }
 0x5f8   : > { %3920 = vmatmul.mubr.msk.bf16.vlgmr.msra.gmra.mrb[16].mxu0 %vm1165_vm3, %v1602_v46 }
 0x6b2   : > { %v4981_v47 = vpop.f32.mrb[4].mxu1 }
 0x6b3   : > { %v4983_v48 = vpop.f32.mrb[5].mxu1 }
 0x6b4   : > { %v4985_v49 = vpop.f32.mrb[6].mxu1 }
 0x6b5   : > { %v4987_v50 = vpop.f32.mrb[7].mxu1 }
 0x6bb   : > { %v4989_v52 = vpop.f32.mrb[12].mxu0 }
 0x6bc   : > { %v4991_v53 = vpop.f32.mrb[13].mxu0 }
 0x6bd   : > { %v4993_v54 = vpop.f32.mrb[14].mxu0 }
 0x6be   : > { %v4995_v55 = vpop.f32.mrb[15].mxu0 }
 0x6c2   : > { %v3913_v56 = vpop.f32.mrb[8].mxu1 }
 0x6c3   : > { %v1584_v59 = vpop.f32.mrb[9].mxu1  ;;  %v1670_v60 = vmul.f32 0.35355338, %v3913_v56 }
 0x6c4   : > { %v1668_v61 = vmul.f32 0.35355338, %v1584_v59  ;;  %v3914_v62 = vpop.f32.mrb[10].mxu1 }
 0x6c5   : > { %v1587_v63 = vpop.f32.mrb[11].mxu1  ;;  %v1671_v3 = vmul.f32 0.35355338, %v3914_v62  ;;  %v1678_v6 = vadd.f32 %v4915_v51, %v1670_v60 }
 0x6c6   : > { %v1669_v57 = vmul.f32 0.35355338, %v1587_v63  ;;  %v1676_v0 = vadd.f32 %v4915_v51, %v1668_v61 }
 0x6c7   : > { %v1690_v10 = vsel %vm923_vm2, %v1678_v6, -inf  ;;  %v1679_v1 = vadd.f32 %v4915_v51, %v1671_v3 }
 0x6c8   : > { %v1684_v4 = vsel %vm923_vm2, %v1676_v0, -inf  ;;  %v1677_v5 = vadd.f32 %v4915_v51, %v1669_v57 }
 0x6c9   : > { %1685 = vmax.xlane.f32.xlu0 %v1684_v4  ;;  %v1693_v18 = vsel %vm923_vm2, %v1679_v1, -inf }
 0x6ca   : > { %v1687_v7 = vsel %vm923_vm2, %v1677_v5, -inf }
 0x6cb   : > { %v3921_v8 = vpop.f32.mrb[16].mxu0  ;;  %1688 = vmax.xlane.f32.xlu1 %v1687_v7 }
 0x6cc   : > { %v1653_v9 = vpop.f32.mrb[17].mxu0  ;;  %v1674_v58 = vmul.f32 0.35355338, %v3921_v8 }
 0x6cd   : > { %v1672_v13 = vmul.f32 0.35355338, %v1653_v9  ;;  %v3922_v14 = vpop.f32.mrb[18].mxu0  ;;  %1691 = vmax.xlane.f32.xlu0 %v1690_v10 }
 0x6ce   : > { %v1656_v15 = vpop.f32.mrb[19].mxu0  ;;  %v1675_v16 = vmul.f32 0.35355338, %v3922_v14  ;;  %v1682_v11 = vadd.f32 %v4915_v51, %v1674_v58 }
 0x6cf   : > { %v1673_v17 = vmul.f32 0.35355338, %v1656_v15  ;;  %v1680_v19 = vadd.f32 %v4915_v51, %v1672_v13 }
 0x6d0   : > { %v1683_v24 = vadd.f32 %v4915_v51, %v1675_v16  ;;  %v1702_v26 = vsel %vm923_vm2, %v1682_v11, -inf }
 0x6d1   : > { %1694 = vmax.xlane.f32.xlu0 %v1693_v18  ;;  %v1681_v20 = vadd.f32 %v4915_v51, %v1673_v17  ;;  %v1696_v2 = vsel %vm923_vm2, %v1680_v19, -inf }
 0x6d2   : > { %v1705_v25 = vsel %vm923_vm2, %v1683_v24, -inf }
 0x6d3   : > { %v1699_v23 = vsel %vm923_vm2, %v1681_v20, -inf }
 0x6d4   : > { %1700 = vmax.xlane.f32.xlu1 %v1699_v23 }
 0x6d5   : > { %1697 = vmax.xlane.f32.xlu0 %v1696_v2 }
 0x6d8   : > { %1706 = vmax.xlane.f32.xlu1 %v1705_v25 }
 0x6d9   : > { %1703 = vmax.xlane.f32.xlu0 %v1702_v26 }
 0x6e9   : > { %1778 = vrot.lane.b32.xlu1 %v4884_v33, %s4516_s27 }
 0x6ed   : > { %1837 = vrot.lane.b32.xlu1 %v4894_v40, %s4516_s27 }
 0x6ef   : > { %1776 = vrot.lane.b32.xlu0 %v4886_v35, %s4516_s27 }
 0x6f1   : > { %1839 = vrot.lane.b32.xlu1 %v4892_v38, %s4516_s27  ;;  %s5597_s27 = sld [smem:[#allocation18_spill]] }
 0x6f3   : > { %1902 = vrot.lane.b32.xlu0 %v4886_v35, %s4517_s1 }
 0x6f5   : > { %1904 = vrot.lane.b32.xlu1 %v4884_v33, %s4517_s1 }
 0x756   : > { %v1686_v27 = vpop.xlane.xlu0 %1685 }
 0x757   : > { %v1708_v28 = vsub.f32 %v1676_v0, %v1686_v27 }
 0x758   : > { %v1689_v30 = vpop.xlane.xlu1 %1688 }
 0x759   : > { %v1716_v21 = vmul.f32 1.442695, %v1708_v28  ;;  %v1709_v32 = vsub.f32 %v1677_v5, %v1689_v30 }
 0x75a   : > { %v1692_v29 = vpop.xlane.xlu0 %1691 }
 0x75b   : > { %v1710_v12 = vsub.f32 %v1678_v6, %v1692_v29  ;;  %v1718_v39 = vmul.f32 1.442695, %v1709_v32 }
 0x75d   : > { %v1720_v31 = vmul.f32 1.442695, %v1710_v12 }
 0x75e   : > { %v1695_v34 = vpop.xlane.xlu0 %1694 }
 0x75f   : > { %4275 = vpow2.f32 %v1720_v31  ;;  %v1711_v22 = vsub.f32 %v1679_v1, %v1695_v34 }
 0x760   : > { %4277 = vpow2.f32 %v1716_v21 }
 0x761   : > { %v1722_v36 = vmul.f32 1.442695, %v1711_v22  ;;  %v1701_v37 = vpop.xlane.xlu1 %1700 }
 0x762   : > { %v1698_v41 = vpop.xlane.xlu0 %1697  ;;  %v1713_v44 = vsub.f32 %v1681_v20, %v1701_v37 }
 0x763   : > { %4279 = vpow2.f32 %v1722_v36  ;;  %v1712_v42 = vsub.f32 %v1680_v19, %v1698_v41 }
 0x764   : > { %4281 = vpow2.f32 %v1718_v39  ;;  %v1726_v57 = vmul.f32 1.442695, %v1713_v44 }
 0x765   : > { %v1707_v43 = vpop.xlane.xlu1 %1706  ;;  %v1724_v61 = vmul.f32 1.442695, %v1712_v42 }
 0x766   : > { %v1715_v45 = vsub.f32 %v1683_v24, %v1707_v43  ;;  %v1704_v46 = vpop.xlane.xlu0 %1703 }
 0x767   : > { %v1714_v56 = vsub.f32 %v1682_v11, %v1704_v46 }
 0x768   : > { %v1730_v59 = vmul.f32 1.442695, %v1715_v45 }
 0x769   : > { %v5021_v60 = vpop.eup %4275  ;;  %v1728_v62 = vmul.f32 1.442695, %v1714_v56  ;;  %v1779_v63 = vpop.permute.xlu1 %1778 }
 0x76a   : > { %4283 = vpow2.f32 %v1730_v59  ;;  %v1777_v0 = vpop.permute.xlu0 %1776  ;;  %v1738_v3 = vsel %vm923_vm2, %v5021_v60, 0.0  ;;  %v5025_v4 = vpop.eup %4277 }
 0x76b   : > { %4285 = vpow2.f32 %v1728_v62  ;;  %1739 = vadd.xlane.f32.xlu0 %v1738_v3  ;;  %3923 = vmatprep.subr.bf16.mxu1 %v1777_v0  ;;  %v1732_v7 = vsel %vm923_vm2, %v5025_v4, 0.0 }
 0x76c   : > { %3924 = vmatpush3.bf16.msra.mxu1 %v1777_v0  ;;  %4287 = vpow2.f32 %v1724_v61 }
 0x76d   : > { %v4280_v5 = vpop.eup %4279  ;;  %v1838_v6 = vpop.permute.xlu1 %1837  ;;  %3925 = vmatprep.subr.bf16.mxu1 %v1779_v63  ;;  %4289 = vpow2.f32 %v1726_v57 }
 0x76e   : > { %3931 = vmatprep.subr.bf16.mxu0 %v1838_v6  ;;  %v1741_v8 = vsel %vm923_vm2, %v4280_v5, 0.0  ;;  %v4282_v9 = vpop.eup %4281  ;;  %v1903_v10 = vpop.permute.xlu0 %1902 }
 0x76f   : > { %3932 = vmatpush3.bf16.msra.mxu0 %v1838_v6  ;;  %1733 = vadd.xlane.f32.xlu0 %v1732_v7  ;;  %v1735_v13 = vsel %vm923_vm2, %v4282_v9, 0.0  ;;  %v1913_v44 = vsel %vm1165_vm3, %v1903_v10, 0 }
 0x770   : > { %1742 = vadd.xlane.f32.xlu1 %v1741_v8  ;;  %3926 = vmatpush3.bf16.msra.mxu1 %v1779_v63 }
 0x771   : > { %v1840_v1 = vpop.permute.xlu1 %1839  ;;  %4061 = vmatprep.subr.msk.bf16.mxu1 %vm1165_vm3, %v1903_v10 }
 0x772   : > { %3933 = vmatprep.subr.bf16.mxu0 %v1840_v1 }
 0x773   : > { %3934 = vmatpush3.bf16.msra.mxu0 %v1840_v1 }
 0x774   : > { %v4284_v14 = vpop.eup %4283  ;;  %1736 = vadd.xlane.f32.xlu1 %v1735_v13 }
 0x775   : > { %v4286_v15 = vpop.eup %4285  ;;  %v1753_v58 = vsel %vm923_vm2, %v4284_v14, 0.0  ;;  %v1905_v24 = vpop.permute.xlu1 %1904 }
 0x776   : > { %v1750_v16 = vsel %vm923_vm2, %v4286_v15, 0.0  ;;  %v4288_v17 = vpop.eup %4287  ;;  %v1916_v3 = vsel %vm1165_vm3, %v1905_v24, 0 }
 0x777   : > { %1751 = vadd.xlane.f32.xlu0 %v1750_v16  ;;  %v4290_v18 = vpop.eup %4289  ;;  %v1744_v19 = vsel %vm923_vm2, %v4288_v17, 0.0 }
 0x778   : > { %1754 = vadd.xlane.f32.xlu1 %v1753_v58  ;;  %v1747_v20 = vsel %vm923_vm2, %v4290_v18, 0.0 }
 0x77b   : > { %1745 = vadd.xlane.f32.xlu0 %v1744_v19 }
 0x77c   : > { %1748 = vadd.xlane.f32.xlu1 %v1747_v20 }
 0x78d   : > { %1898 = vrot.lane.b32.xlu1 %v4886_v35, %s4518_s2 }
 0x791   : > { %1973 = vrot.lane.b32.xlu1 %v4892_v38, %s4517_s1  ;;  %1971 = vrot.lane.b32.xlu0 %v4894_v40, %s4517_s1  ;;  %s4525_s1 = smov 24  }
 0x795   : > { %1969 = vrot.lane.b32.xlu1 %v4892_v38, %s4518_s2  ;;  %1900 = vrot.lane.b32.xlu0 %v4884_v33, %s4518_s2 }
 0x799   : > { %1967 = vrot.lane.b32.xlu0 %v4894_v40, %s4518_s2  ;;  %s5601_s2 = sld [smem:[#allocation25_spill]] (!%p3740_p1) }
 0x7f8   : > { %v1740_v23 = vpop.xlane.xlu0 %1739 }
 0x7fc   : > { %v1734_v2 = vpop.xlane.xlu0 %1733 }
 0x7fd   : > { %v1743_v11 = vpop.xlane.xlu1 %1742 }
 0x7fe   : > { %4291 = vrcp.f32 %v1743_v11 }
 0x7ff   : > { %4293 = vrcp.f32 %v1734_v2 }
 0x800   : > { %4295 = vrcp.f32 %v1740_v23 }
 0x801   : > { %v1737_v25 = vpop.xlane.xlu1 %1736 }
 0x802   : > { %4297 = vrcp.f32 %v1737_v25 }
 0x804   : > { %v1752_v26 = vpop.xlane.xlu0 %1751 }
 0x805   : > { %v1755_v27 = vpop.xlane.xlu1 %1754  ;;  %4299 = vrcp.f32 %v1752_v26 }
 0x806   : > { %4301 = vrcp.f32 %v1755_v27 }
 0x808   : > { %v1746_v28 = vpop.xlane.xlu0 %1745  ;;  %v4292_v29 = vpop.eup %4291 }
 0x809   : > { %4303 = vrcp.f32 %v1746_v28  ;;  %v1749_v30 = vpop.xlane.xlu1 %1748  ;;  %v4294_v12 = vpop.eup %4293  ;;  %v1767_v32 = vmul.f32 %v4292_v29, %v4280_v5 }
 0x80a   : > { %4305 = vrcp.f32 %v1749_v30  ;;  %v4296_v21 = vpop.eup %4295  ;;  %v1764_v22 = vmul.f32 %v4294_v12, %v5025_v4 }
 0x80b   : > { %v1766_v37 = vmul.f32 %v4296_v21, %v5021_v60 }
 0x80c   : > { %v4298_v31 = vpop.eup %4297  ;;  %v1972_v34 = vpop.permute.xlu0 %1971 }
 0x80d   : > { %4063 = vmatprep.subr.msk.bf16.mxu0 %vm1165_vm3, %v1972_v34  ;;  %v1765_v36 = vmul.f32 %v4298_v31, %v4282_v9  ;;  %v1773_v42 = vpack.c.bf16 %v1767_v32, %v1766_v37  ;;  %v1899_v45 = vpop.permute.xlu1 %1898  ;;  %v1982_v4 = vsel %vm1165_vm3, %v1972_v34, 0 }
 0x80f   : > { %v1772_v39 = vpack.c.bf16 %v1765_v36, %v1764_v22  ;;  %v4300_v41 = vpop.eup %4299 }
 0x810   : > { %v4302_v43 = vpop.eup %4301  ;;  %v1770_v59 = vmul.f32 %v4300_v41, %v4286_v15  ;;  %v1901_v62 = vpop.permute.xlu0 %1900 }
 0x811   : > { %3927 = vmatprep.mubr.msk.bf16.mxu1 %vm923_vm2, %v1772_v39  ;;  %v1771_v61 = vmul.f32 %v4302_v43, %v4284_v14  ;;  %v1974_v5 = vpop.permute.xlu1 %1973 }
 0x812   : > { %3928 = vmatmul.mubr.msk.bf16.vlgmr.msra.gmra.mrb[12].mxu1 %vm923_vm2, %v1773_v42  ;;  %v1985_v7 = vsel %vm1165_vm3, %v1974_v5, 0 }
 0x813   : > { %v4304_v46 = vpop.eup %4303  ;;  %3940 = vmatpush3.bf16.xpose.msra.mxu1 %v1913_v44  ;;  %3943 = vmatprep.mubr.msk.bf16.mxu1 %vm1165_vm3, %v1899_v45  ;;  %v1775_v0 = vpack.c.bf16 %v1771_v61, %v1770_v59 }
 0x814   : > { %v4306_v56 = vpop.eup %4305  ;;  %4062 = vmatprep.subr.msk.bf16.mxu1 %vm1165_vm3, %v1905_v24  ;;  %v1768_v60 = vmul.f32 %v4304_v46, %v4288_v17  ;;  %v1968_v6 = vpop.permute.xlu0 %1967 }
 0x815   : > { %v1769_v63 = vmul.f32 %v4306_v56, %v4290_v18  ;;  %v1970_v8 = vpop.permute.xlu1 %1969 }
 0x817   : > { %v1774_v57 = vpack.c.bf16 %v1769_v63, %v1768_v60 }
 0x819   : > { %3935 = vmatprep.mubr.msk.bf16.mxu0 %vm923_vm2, %v1774_v57 }
 0x81a   : > { %3936 = vmatmul.mubr.msk.bf16.vlgmr.msra.gmra.mrb[20].mxu0 %vm923_vm2, %v1775_v0 }
 0x81b   : > { %3942 = vmatpush3.bf16.xpose.msra.mxu1 %v1916_v3  ;;  %3948 = vmatpush3.bf16.xpose.msra.mxu0 %v1982_v4 }
 0x81c   : > { %4064 = vmatprep.subr.msk.bf16.mxu0 %vm1165_vm3, %v1974_v5  ;;  %3951 = vmatprep.mubr.msk.bf16.mxu0 %vm1165_vm3, %v1968_v6 }
 0x822   : > { %3944 = vmatmul.mubr.msk.bf16.vlgmr.msra.gmra.mrb[16].mxu1 %vm1165_vm3, %v1901_v62 }
 0x823   : > { %3950 = vmatpush3.bf16.xpose.msra.mxu0 %v1985_v7 }
 0x82a   : > { %3952 = vmatmul.mubr.msk.bf16.vlgmr.msra.gmra.mrb[24].mxu0 %vm1165_vm3, %v1970_v8 }
 0x8e5   : > { %v5061_v9 = vpop.f32.mrb[12].mxu1 }
 0x8e6   : > { %v5063_v10 = vpop.f32.mrb[13].mxu1 }
 0x8e7   : > { %v5065_v1 = vpop.f32.mrb[14].mxu1 }
 0x8e8   : > { %v4162_v13 = vpack.i.bf16 %v5065_v1, %v5061_v9  ;;  %v5069_v14 = vpop.f32.mrb[15].mxu1 }
 0x8e9   : > { %v4157_v15 = vpack.i.bf16 %v5069_v14, %v5063_v10 }
 0x8ed   : > { %v5073_v16 = vpop.f32.mrb[20].mxu0 }
 0x8ee   : > { %v5075_v17 = vpop.f32.mrb[21].mxu0 }
 0x8ef   : > { %v5077_v58 = vpop.f32.mrb[22].mxu0 }
 0x8f0   : > { %v4182_v18 = vpack.i.bf16 %v5077_v58, %v5073_v16  ;;  %v5081_v19 = vpop.f32.mrb[23].mxu0 }
 0x8f1   : > { %v4177_v20 = vpack.i.bf16 %v5081_v19, %v5075_v17 }
 0x8f5   : > { %v3945_v23 = vpop.f32.mrb[16].mxu1 }
 0x8f6   : > { %v1952_v24 = vpop.f32.mrb[17].mxu1  ;;  %v2038_v2 = vmul.f32 0.35355338, %v3945_v23 }
 0x8f7   : > { %v2036_v11 = vmul.f32 0.35355338, %v1952_v24  ;;  %v3946_v25 = vpop.f32.mrb[18].mxu1 }
 0x8f8   : > { %v1955_v26 = vpop.f32.mrb[19].mxu1  ;;  %v2039_v29 = vmul.f32 0.35355338, %v3946_v25  ;;  %v2046_v21 = vadd.f32 %v4915_v51, %v2038_v2 }
 0x8f9   : > { %v2037_v27 = vmul.f32 0.35355338, %v1955_v26  ;;  %v2044_v28 = vadd.f32 %v4915_v51, %v2036_v11 }
 0x8fa   : > { %v2058_v37 = vsel %vm923_vm2, %v2046_v21, -inf  ;;  %v2047_v39 = vadd.f32 %v4915_v51, %v2039_v29 }
 0x8fb   : > { %v2052_v30 = vsel %vm923_vm2, %v2044_v28, -inf  ;;  %v2045_v12 = vadd.f32 %v4915_v51, %v2037_v27 }
 0x8fc   : > { %2053 = vmax.xlane.f32.xlu0 %v2052_v30  ;;  %v2061_v45 = vsel %vm923_vm2, %v2047_v39, -inf }
 0x8fd   : > { %v3953_v31 = vpop.f32.mrb[24].mxu0  ;;  %v2055_v32 = vsel %vm923_vm2, %v2045_v12, -inf }
 0x8fe   : > { %2056 = vmax.xlane.f32.xlu1 %v2055_v32  ;;  %v2021_v34 = vpop.f32.mrb[25].mxu0  ;;  %v2042_v44 = vmul.f32 0.35355338, %v3953_v31 }
 0x8ff   : > { %v2040_v22 = vmul.f32 0.35355338, %v2021_v34  ;;  %v3954_v36 = vpop.f32.mrb[26].mxu0 }
 0x900   : > { %2059 = vmax.xlane.f32.xlu0 %v2058_v37  ;;  %v2024_v41 = vpop.f32.mrb[27].mxu0  ;;  %v2043_v42 = vmul.f32 0.35355338, %v3954_v36  ;;  %v2050_v62 = vadd.f32 %v4915_v51, %v2042_v44 }
 0x901   : > { %v2041_v43 = vmul.f32 0.35355338, %v2024_v41  ;;  %v2048_v56 = vadd.f32 %v4915_v51, %v2040_v22 }
 0x902   : > { %v2051_v61 = vadd.f32 %v4915_v51, %v2043_v42  ;;  %v2070_v57 = vsel %vm923_vm2, %v2050_v62, -inf }
 0x903   : > { %v2049_v46 = vadd.f32 %v4915_v51, %v2041_v43  ;;  %v2064_v60 = vsel %vm923_vm2, %v2048_v56, -inf }
 0x904   : > { %2062 = vmax.xlane.f32.xlu0 %v2061_v45  ;;  %v2073_v63 = vsel %vm923_vm2, %v2051_v61, -inf }
 0x905   : > { %v2067_v59 = vsel %vm923_vm2, %v2049_v46, -inf }
 0x906   : > { %2068 = vmax.xlane.f32.xlu1 %v2067_v59 }
 0x908   : > { %2065 = vmax.xlane.f32.xlu0 %v2064_v60 }
 0x90a   : > { %2074 = vmax.xlane.f32.xlu1 %v2073_v63 }
 0x90c   : > { %2071 = vmax.xlane.f32.xlu0 %v2070_v57 }
 0x91b   : > { %2146 = vrot.lane.b32.xlu1 %v4884_v33, %s4519_s16 }
 0x91f   : > { %2205 = vrot.lane.b32.xlu1 %v4894_v40, %s4519_s16 }
 0x922   : > { %2144 = vrot.lane.b32.xlu0 %v4886_v35, %s4519_s16 }
 0x923   : > { %2207 = vrot.lane.b32.xlu1 %v4892_v38, %s4519_s16 }
 0x926   : > { %2270 = vrot.lane.b32.xlu0 %v4886_v35, %s4520_s18 }
 0x927   : > { %2272 = vrot.lane.b32.xlu1 %v4884_v33, %s4520_s18 }
 0x989   : > { %v2054_v51 = vpop.xlane.xlu0 %2053 }
 0x98a   : > { %v2076_v0 = vsub.f32 %v2044_v28, %v2054_v51 }
 0x98b   : > { %v2057_v3 = vpop.xlane.xlu1 %2056 }
 0x98c   : > { %v2084_v6 = vmul.f32 1.442695, %v2076_v0  ;;  %v2077_v7 = vsub.f32 %v2045_v12, %v2057_v3 }
 0x98d   : > { %v2060_v4 = vpop.xlane.xlu0 %2059 }
 0x98e   : > { %v2078_v5 = vsub.f32 %v2046_v21, %v2060_v4  ;;  %v2086_v11 = vmul.f32 1.442695, %v2077_v7 }
 0x990   : > { %v2088_v8 = vmul.f32 1.442695, %v2078_v5 }
 0x991   : > { %v2063_v23 = vpop.xlane.xlu0 %2062 }
 0x992   : > { %4307 = vpow2.f32 %v2088_v8  ;;  %v2079_v24 = vsub.f32 %v2047_v39, %v2063_v23 }
 0x993   : > { %v2069_v2 = vpop.xlane.xlu1 %2068  ;;  %4309 = vpow2.f32 %v2084_v6 }
 0x994   : > { %v2090_v25 = vmul.f32 1.442695, %v2079_v24  ;;  %v2081_v27 = vsub.f32 %v2049_v46, %v2069_v2 }
 0x995   : > { %v2066_v26 = vpop.xlane.xlu0 %2065 }
 0x996   : > { %4311 = vpow2.f32 %v2090_v25  ;;  %v2080_v30 = vsub.f32 %v2048_v56, %v2066_v26  ;;  %v2094_v34 = vmul.f32 1.442695, %v2081_v27 }
 0x997   : > { %v2075_v29 = vpop.xlane.xlu1 %2074  ;;  %4313 = vpow2.f32 %v2086_v11 }
 0x998   : > { %v2083_v28 = vsub.f32 %v2051_v61, %v2075_v29  ;;  %v2092_v36 = vmul.f32 1.442695, %v2080_v30 }
 0x999   : > { %v2072_v31 = vpop.xlane.xlu0 %2071 }
 0x99a   : > { %v2098_v32 = vmul.f32 1.442695, %v2083_v28  ;;  %v2082_v21 = vsub.f32 %v2050_v62, %v2072_v31 }
 0x99b   : > { %v2147_v12 = vpop.permute.xlu1 %2146 }
 0x99c   : > { %v5109_v22 = vpop.eup %4307  ;;  %4315 = vpow2.f32 %v2098_v32  ;;  %v2096_v37 = vmul.f32 1.442695, %v2082_v21 }
 0x99d   : > { %v2145_v39 = vpop.permute.xlu0 %2144  ;;  %v2106_v41 = vsel %vm923_vm2, %v5109_v22, 0.0  ;;  %v5113_v42 = vpop.eup %4309 }
 0x99e   : > { %4317 = vpow2.f32 %v2096_v37  ;;  %2107 = vadd.xlane.f32.xlu0 %v2106_v41  ;;  %3955 = vmatprep.subr.bf16.mxu1 %v2145_v39  ;;  %v2100_v45 = vsel %vm923_vm2, %v5113_v42, 0.0 }
 0x99f   : > { %4319 = vpow2.f32 %v2094_v34  ;;  %3956 = vmatpush3.bf16.msra.mxu1 %v2145_v39  ;;  %v2206_v43 = vpop.permute.xlu1 %2205 }
 0x9a0   : > { %v4312_v44 = vpop.eup %4311  ;;  %4321 = vpow2.f32 %v2092_v36  ;;  %3957 = vmatprep.subr.bf16.mxu1 %v2147_v12  ;;  %3963 = vmatprep.subr.bf16.mxu0 %v2206_v43 }
 0x9a1   : > { %3964 = vmatpush3.bf16.msra.mxu0 %v2206_v43  ;;  %v2109_v46 = vsel %vm923_vm2, %v4312_v44, 0.0  ;;  %v4314_v56 = vpop.eup %4313  ;;  %v2271_v59 = vpop.permute.xlu0 %2270 }
 0x9a2   : > { %2101 = vadd.xlane.f32.xlu0 %v2100_v45  ;;  %2110 = vadd.xlane.f32.xlu1 %v2109_v46  ;;  %v2103_v60 = vsel %vm923_vm2, %v4314_v56, 0.0  ;;  %v2281_v43 = vsel %vm1165_vm3, %v2271_v59, 0 }
 0x9a3   : > { %3958 = vmatpush3.bf16.msra.mxu1 %v2147_v12  ;;  %v2208_v61 = vpop.permute.xlu1 %2207 }
 0x9a4   : > { %3965 = vmatprep.subr.bf16.mxu0 %v2208_v61  ;;  %4065 = vmatprep.subr.msk.bf16.mxu1 %vm1165_vm3, %v2271_v59 }
 0x9a5   : > { %3966 = vmatpush3.bf16.msra.mxu0 %v2208_v61 }
 0x9a6   : > { %v4316_v62 = vpop.eup %4315  ;;  %2104 = vadd.xlane.f32.xlu1 %v2103_v60 }
 0x9a7   : > { %v2121_v0 = vsel %vm923_vm2, %v4316_v62, 0.0  ;;  %v2273_v6 = vpop.permute.xlu1 %2272 }
 0x9a8   : > { %v4318_v63 = vpop.eup %4317 }
 0x9a9   : > { %v4320_v57 = vpop.eup %4319  ;;  %v2118_v51 = vsel %vm923_vm2, %v4318_v63, 0.0 }
 0x9aa   : > { %v4322_v3 = vpop.eup %4321  ;;  %2119 = vadd.xlane.f32.xlu0 %v2118_v51  ;;  %2122 = vadd.xlane.f32.xlu1 %v2121_v0  ;;  %v2115_v5 = vsel %vm923_vm2, %v4320_v57, 0.0 }
 0x9ab   : > { %v2112_v4 = vsel %vm923_vm2, %v4322_v3, 0.0 }
 0x9ae   : > { %2113 = vadd.xlane.f32.xlu0 %v2112_v4  ;;  %2116 = vadd.xlane.f32.xlu1 %v2115_v5  ;;  %v2284_v4 = vsel %vm1165_vm3, %v2273_v6, 0 }
 0x9bf   : > { %2266 = vrot.lane.b32.xlu1 %v4886_v35, %s4521_s26 }
 0x9c3   : > { %2341 = vrot.lane.b32.xlu1 %v4892_v38, %s4520_s18 }
 0x9c4   : > { %2339 = vrot.lane.b32.xlu0 %v4894_v40, %s4520_s18  ;;  %s5598_s18 = scalar_lea.vmem %s5532_s8, %s4706_s28 }
 0x9c7   : > { %2337 = vrot.lane.b32.xlu1 %v4892_v38, %s4521_s26 }
 0x9c8   : > { %2268 = vrot.lane.b32.xlu0 %v4884_v33, %s4521_s26 }
 0x9cc   : > { %2335 = vrot.lane.b32.xlu0 %v4894_v40, %s4521_s26 }
 0xa2b   : > { %v2108_v7 = vpop.xlane.xlu0 %2107 }
 0xa2f   : > { %v2102_v8 = vpop.xlane.xlu0 %2101  ;;  %v2111_v23 = vpop.xlane.xlu1 %2110 }
 0xa30   : > { %4323 = vrcp.f32 %v2111_v23 }
 0xa31   : > { %4325 = vrcp.f32 %v2102_v8 }
 0xa32   : > { %4327 = vrcp.f32 %v2108_v7 }
 0xa33   : > { %v2105_v24 = vpop.xlane.xlu1 %2104 }
 0xa34   : > { %4329 = vrcp.f32 %v2105_v24 }
 0xa37   : > { %v2120_v2 = vpop.xlane.xlu0 %2119  ;;  %v2123_v11 = vpop.xlane.xlu1 %2122 }
 0xa38   : > { %4331 = vrcp.f32 %v2120_v2 }
 0xa39   : > { %4333 = vrcp.f32 %v2123_v11 }
 0xa3a   : > { %v4324_v25 = vpop.eup %4323 }
 0xa3b   : > { %v2114_v26 = vpop.xlane.xlu0 %2113  ;;  %v2117_v27 = vpop.xlane.xlu1 %2116  ;;  %v2135_v31 = vmul.f32 %v4324_v25, %v4312_v44 }
 0xa3c   : > { %v4326_v29 = vpop.eup %4325  ;;  %4335 = vrcp.f32 %v2114_v26 }
 0xa3d   : > { %v4328_v30 = vpop.eup %4327  ;;  %4337 = vrcp.f32 %v2117_v27  ;;  %v2132_v21 = vmul.f32 %v4326_v29, %v5113_v42 }
 0xa3e   : > { %v4330_v28 = vpop.eup %4329  ;;  %v2134_v12 = vmul.f32 %v4328_v30, %v5109_v22 }
 0xa3f   : > { %v2340_v32 = vpop.permute.xlu0 %2339  ;;  %v2133_v34 = vmul.f32 %v4330_v28, %v4314_v56  ;;  %v2267_v45 = vpop.permute.xlu1 %2266 }
 0xa40   : > { %4067 = vmatprep.subr.msk.bf16.mxu0 %vm1165_vm3, %v2340_v32  ;;  %v2141_v37 = vpack.c.bf16 %v2135_v31, %v2134_v12  ;;  %v2350_v59 = vsel %vm1165_vm3, %v2340_v32, 0  ;;  %v4403_v12 = vld [vmem:[%s5596_s29] ss:$0 sm:$0xff] }
 0xa41   : > { %v2140_v36 = vpack.c.bf16 %v2133_v34, %v2132_v21 }
 0xa42   : > { %v4332_v39 = vpop.eup %4331 }
 0xa43   : > { %3959 = vmatprep.mubr.msk.bf16.mxu1 %vm923_vm2, %v2140_v36  ;;  %v4334_v41 = vpop.eup %4333  ;;  %v2138_v44 = vmul.f32 %v4332_v39, %v4318_v63  ;;  %v2269_v56 = vpop.permute.xlu0 %2268 }
 0xa44   : > { %3960 = vmatmul.mubr.msk.bf16.vlgmr.msra.gmra.mrb[20].mxu1 %vm923_vm2, %v2141_v37  ;;  %v2139_v46 = vmul.f32 %v4334_v41, %v4316_v62  ;;  %v2342_v7 = vpop.permute.xlu1 %2341 }
 0xa45   : > { %3972 = vmatpush3.bf16.xpose.msra.mxu1 %v2281_v43  ;;  %3975 = vmatprep.mubr.msk.bf16.mxu1 %vm1165_vm3, %v2267_v45  ;;  %v2353_v62 = vsel %vm1165_vm3, %v2342_v7, 0 }
 0xa46   : > { %v4336_v42 = vpop.eup %4335  ;;  %4066 = vmatprep.subr.msk.bf16.mxu1 %vm1165_vm3, %v2273_v6  ;;  %v2143_v0 = vpack.c.bf16 %v2139_v46, %v2138_v44 }
 0xa47   : > { %v4338_v22 = vpop.eup %4337  ;;  %v2136_v61 = vmul.f32 %v4336_v42, %v4322_v3  ;;  %v2336_v5 = vpop.permute.xlu0 %2335 }
 0xa48   : > { %v2137_v60 = vmul.f32 %v4338_v22, %v4320_v57  ;;  %v2338_v63 = vpop.permute.xlu1 %2337 }
 0xa4a   : > { %v2142_v51 = vpack.c.bf16 %v2137_v60, %v2136_v61 }
 0xa4c   : > { %3967 = vmatprep.mubr.msk.bf16.mxu0 %vm923_vm2, %v2142_v51 }
 0xa4d   : > { %3968 = vmatmul.mubr.msk.bf16.vlgmr.msra.gmra.mrb[28].mxu0 %vm923_vm2, %v2143_v0  ;;  %3974 = vmatpush3.bf16.xpose.msra.mxu1 %v2284_v4 }
 0xa4e   : > { %3980 = vmatpush3.bf16.xpose.msra.mxu0 %v2350_v59  ;;  %3983 = vmatprep.mubr.msk.bf16.mxu0 %vm1165_vm3, %v2336_v5 }
 0xa4f   : > { %4068 = vmatprep.subr.msk.bf16.mxu0 %vm1165_vm3, %v2342_v7 }
 0xa54   : > { %3976 = vmatmul.mubr.msk.bf16.vlgmr.msra.gmra.mrb[24].mxu1 %vm1165_vm3, %v2269_v56 }
 0xa56   : > { %3982 = vmatpush3.bf16.xpose.msra.mxu0 %v2353_v62 }
 0xa5d   : > { %3984 = vmatmul.mubr.msk.bf16.vlgmr.msra.gmra.mrb[32].mxu0 %vm1165_vm3, %v2338_v63 }
 0xb17   : > { %v5149_v57 = vpop.f32.mrb[20].mxu1 }
 0xb18   : > { %v5151_v3 = vpop.f32.mrb[21].mxu1 }
 0xb19   : > { %v5153_v6 = vpop.f32.mrb[22].mxu1 }
 0xb1a   : > { %v4172_v8 = vpack.i.bf16 %v5153_v6, %v5149_v57  ;;  %v5157_v23 = vpop.f32.mrb[23].mxu1 }
 0xb1b   : > { %v4167_v24 = vpack.i.bf16 %v5157_v23, %v5151_v3 }
 0xb20   : > { %v5161_v2 = vpop.f32.mrb[28].mxu0 }
 0xb21   : > { %v5163_v11 = vpop.f32.mrb[29].mxu0 }
 0xb22   : > { %v5165_v25 = vpop.f32.mrb[30].mxu0 }
 0xb23   : > { %v4202_v26 = vpack.i.bf16 %v5165_v25, %v5161_v2  ;;  %v5169_v27 = vpop.f32.mrb[31].mxu0 }
 0xb24   : > { %v4197_v29 = vpack.i.bf16 %v5169_v27, %v5163_v11 }
 0xb27   : > { %v3977_v30 = vpop.f32.mrb[24].mxu1 }
 0xb28   : > { %v2320_v28 = vpop.f32.mrb[25].mxu1  ;;  %v2406_v31 = vmul.f32 0.35355338, %v3977_v30 }
 0xb29   : > { %v2404_v32 = vmul.f32 0.35355338, %v2320_v28  ;;  %v3978_v21 = vpop.f32.mrb[26].mxu1 }
 0xb2a   : > { %v2323_v34 = vpop.f32.mrb[27].mxu1  ;;  %v2414_v39 = vadd.f32 %v4403_v12, %v2406_v31  ;;  %v2407_v41 = vmul.f32 0.35355338, %v3978_v21 }
 0xb2b   : > { %v2412_v36 = vadd.f32 %v4403_v12, %v2404_v32  ;;  %v2405_v37 = vmul.f32 0.35355338, %v2323_v34 }
 0xb2c   : > { %v2415_v44 = vadd.f32 %v4403_v12, %v2407_v41  ;;  %v2426_v56 = vsel %vm923_vm2, %v2414_v39, -inf }
 0xb2d   : > { %v2413_v43 = vadd.f32 %v4403_v12, %v2405_v37  ;;  %v2420_v45 = vsel %vm923_vm2, %v2412_v36, -inf }
 0xb2e   : > { %2421 = vmax.xlane.f32.xlu0 %v2420_v45  ;;  %v2429_v7 = vsel %vm923_vm2, %v2415_v44, -inf }
 0xb2f   : > { %v2423_v42 = vsel %vm923_vm2, %v2413_v43, -inf }
 0xb30   : > { %v3985_v22 = vpop.f32.mrb[32].mxu0  ;;  %2424 = vmax.xlane.f32.xlu1 %v2423_v42 }
 0xb31   : > { %v2389_v46 = vpop.f32.mrb[33].mxu0  ;;  %v2410_v59 = vmul.f32 0.35355338, %v3985_v22 }
 0xb32   : > { %v2408_v61 = vmul.f32 0.35355338, %v2389_v46  ;;  %v3986_v60 = vpop.f32.mrb[34].mxu0  ;;  %2427 = vmax.xlane.f32.xlu0 %v2426_v56 }
 0xb33   : > { %v2392_v51 = vpop.f32.mrb[35].mxu0  ;;  %v2411_v0 = vmul.f32 0.35355338, %v3986_v60  ;;  %v2418_v28 = vadd.f32 %v4403_v12, %v2410_v59 }
 0xb34   : > { %v2409_v4 = vmul.f32 0.35355338, %v2392_v51  ;;  %v2416_v5 = vadd.f32 %v4403_v12, %v2408_v61 }
 0xb35   : > { %v5182_v63 = vadd.f32 %v4403_v12, %v2411_v0  ;;  %v2438_v21 = vsel %vm923_vm2, %v2418_v28, -inf }
 0xb36   : > { %v5180_v62 = vadd.f32 %v4403_v12, %v2409_v4  ;;  %2430 = vmax.xlane.f32.xlu0 %v2429_v7  ;;  %v2432_v31 = vsel %vm923_vm2, %v2416_v5, -inf }
 0xb37   : > { %v2441_v32 = vsel %vm923_vm2, %v5182_v63, -inf }
 0xb38   : > { %v2435_v30 = vsel %vm923_vm2, %v5180_v62, -inf }
 0xb39   : > { %2436 = vmax.xlane.f32.xlu1 %v2435_v30 }
 0xb3a   : > { %2433 = vmax.xlane.f32.xlu0 %v2432_v31 }
 0xb3d   : > { %2442 = vmax.xlane.f32.xlu1 %v2441_v32 }
 0xb3e   : > { %2439 = vmax.xlane.f32.xlu0 %v2438_v21 }
 0xbbb   : > { %v2422_v34 = vpop.xlane.xlu0 %2421 }
 0xbbc   : > { %v2444_v37 = vsub.f32 %v2412_v36, %v2422_v34 }
 0xbbd   : > { %v2425_v41 = vpop.xlane.xlu1 %2424 }
 0xbbe   : > { %v2452_v22 = vmul.f32 1.442695, %v2444_v37  ;;  %v2445_v46 = vsub.f32 %v2413_v43, %v2425_v41 }
 0xbbf   : > { %v2428_v45 = vpop.xlane.xlu0 %2427 }
 0xbc0   : > { %v2446_v42 = vsub.f32 %v2414_v39, %v2428_v45  ;;  %v2454_v60 = vmul.f32 1.442695, %v2445_v46 }
 0xbc2   : > { %v2456_v56 = vmul.f32 1.442695, %v2446_v42 }
 0xbc3   : > { %v2431_v12 = vpop.xlane.xlu0 %2430 }
 0xbc4   : > { %4339 = vpow2.f32 %v2456_v56  ;;  %v2447_v61 = vsub.f32 %v2415_v44, %v2431_v12 }
 0xbc5   : > { %4341 = vpow2.f32 %v2452_v22 }
 0xbc6   : > { %v2458_v51 = vmul.f32 1.442695, %v2447_v61  ;;  %v2437_v42 = vpop.xlane.xlu1 %2436 }
 0xbc7   : > { %v2434_v0 = vpop.xlane.xlu0 %2433 }
 0xbc8   : > { %4343 = vpow2.f32 %v2458_v51  ;;  %v2448_v4 = vsub.f32 %v2416_v5, %v2434_v0 }
 0xbc9   : > { %4345 = vpow2.f32 %v2454_v60 }
 0xbca   : > { %v2460_v36 = vmul.f32 1.442695, %v2448_v4  ;;  %v2443_v22 = vpop.xlane.xlu1 %2442 }
 0xbcb   : > { %v2440_v59 = vpop.xlane.xlu0 %2439  ;;  %v2451_v46 = vsub.f32 %v5182_v63, %v2443_v22 }
 0xbcc   : > { %v2450_v7 = vsub.f32 %v2418_v28, %v2440_v59 }
 0xbce   : > { %v5190_v30 = vpop.eup %4339  ;;  %v2464_v31 = vmul.f32 1.442695, %v2450_v7 }
 0xbcf   : > { %v2474_v39 = vsel %vm923_vm2, %v5190_v30, 0.0  ;;  %v5194_v43 = vpop.eup %4341 }
 0xbd0   : > { %4347 = vpow2.f32 %v2464_v31  ;;  %2475 = vadd.xlane.f32.xlu0 %v2474_v39  ;;  %v2468_v32 = vsel %vm923_vm2, %v5194_v43, 0.0 }
 0xbd1   : > { %4349 = vpow2.f32 %v2460_v36 }
 0xbd2   : > { %v5196_v44 = vpop.eup %4343 }
 0xbd3   : > { %v2477_v5 = vsel %vm923_vm2, %v5196_v44, 0.0  ;;  %v4346_v28 = vpop.eup %4345 }
 0xbd4   : > { %2469 = vadd.xlane.f32.xlu0 %v2468_v32  ;;  %2478 = vadd.xlane.f32.xlu1 %v2477_v5  ;;  %v2471_v21 = vsel %vm923_vm2, %v4346_v28, 0.0  ;;  %v4219_v32 = vld [vmem:[%s5597_s27] sm:$0xff]   ;;  %v4220_v5 = vld [vmem:[%s5597_s27 + $0x8] sm:$0xff]  }
 0xbd8   : > { %2472 = vadd.xlane.f32.xlu1 %v2471_v21 }
 0xbda   : > { %v5203_v34 = vpop.eup %4347 }
 0xbdb   : > { %v2486_v37 = vsel %vm923_vm2, %v5203_v34, 0.0  ;;  %v5207_v41 = vpop.eup %4349 }
 0xbdc   : > { %2487 = vadd.xlane.f32.xlu0 %v2486_v37  ;;  %v2480_v45 = vsel %vm923_vm2, %v5207_v41, 0.0 }
 0xbe0   : > { %2481 = vadd.xlane.f32.xlu0 %v2480_v45 }
 0xbe9   : > { %2514 = vrot.lane.b32.xlu1 %v4884_v33, %s4522_s3  ;;  %v2449_v33 = vsub.f32 %v5180_v62, %v2437_v42 }
 0xbed   : > { %2573 = vrot.lane.b32.xlu1 %v4894_v40, %s4522_s3  ;;  %v2466_v40 = vmul.f32 1.442695, %v2451_v46 }
 0xbef   : > { %4351 = vpow2.f32 %v2466_v40 }
 0xbf6   : > { %2512 = vrot.lane.b32.xlu0 %v4886_v35, %s4522_s3  ;;  %v2462_v35 = vmul.f32 1.442695, %v2449_v33 }
 0xbf8   : > { %4353 = vpow2.f32 %v2462_v35 }
 0xbf9   : > { %v4352_v10 = vpop.eup %4351 }
 0xbfa   : > { %4158 = vrot.lane.b32.xlu0 %v4157_v15, %s4523_s24  ;;  %v2489_v14 = vsel %vm923_vm2, %v4352_v10, 0.0 }
 0xbfe   : > { %4168 = vrot.lane.b32.xlu0 %v4167_v24, %s4524_s15 }
 0xc02   : > { %4178 = vrot.lane.b32.xlu0 %v4177_v20, %s4523_s24  ;;  %v4354_v15 = vpop.eup %4353 }
 0xc03   : > { %v2483_v63 = vsel %vm923_vm2, %v4354_v15, 0.0 }
 0xc11   : > { %2490 = vadd.xlane.f32.xlu1 %v2489_v14 }
 0xc15   : > { %2484 = vadd.xlane.f32.xlu1 %v2483_v63 }
 0xc26   : > { %2575 = vrot.lane.b32.xlu1 %v4892_v38, %s4522_s3 }
 0xc2a   : > { %4163 = vrot.lane.b32.xlu1 %v4162_v13, %s4523_s24 }
 0xc2e   : > { %4173 = vrot.lane.b32.xlu1 %v4172_v8, %s4524_s15 }
 0xc32   : > { %4183 = vrot.lane.b32.xlu1 %v4182_v18, %s4523_s24 }
 0xc5d   : > { %v2476_v17 = vpop.xlane.xlu0 %2475 }
 0xc61   : > { %v2470_v19 = vpop.xlane.xlu0 %2469  ;;  %v2479_v20 = vpop.xlane.xlu1 %2478 }
 0xc62   : > { %4355 = vrcp.f32 %v2470_v19 }
 0xc65   : > { %v2473_v3 = vpop.xlane.xlu1 %2472 }
 0xc66   : > { %4357 = vrcp.f32 %v2473_v3 }
 0xc67   : > { %4359 = vrcp.f32 %v2479_v20 }
 0xc68   : > { %4361 = vrcp.f32 %v2476_v17 }
 0xc69   : > { %v2488_v38 = vpop.xlane.xlu0 %2487  ;;  %v2515_v9 = vpop.permute.xlu1 %2514 }
 0xc6c   : > { %v4356_v23 = vpop.eup %4355 }
 0xc6d   : > { %v2482_v1 = vpop.xlane.xlu0 %2481  ;;  %v2574_v13 = vpop.permute.xlu1 %2573  ;;  %v2500_v16 = vmul.f32 %v4356_v23, %v5194_v43 }
 0xc6e   : > { %3995 = vmatprep.subr.bf16.mxu0 %v2574_v13 }
 0xc6f   : > { %3996 = vmatpush3.bf16.msra.mxu0 %v2574_v13 }
 0xc70   : > { %v4358_v57 = vpop.eup %4357 }
 0xc71   : > { %v4360_v6 = vpop.eup %4359  ;;  %v2513_v8 = vpop.permute.xlu0 %2512  ;;  %v2501_v58 = vmul.f32 %v4358_v57, %v4346_v28 }
 0xc72   : > { %3987 = vmatprep.subr.bf16.mxu1 %v2513_v8  ;;  %v4362_v18 = vpop.eup %4361  ;;  %v2503_v62 = vmul.f32 %v4360_v6, %v5196_v44 }
 0xc73   : > { %3988 = vmatpush3.bf16.msra.mxu1 %v2513_v8  ;;  %v2508_v24 = vpack.c.bf16 %v2501_v58, %v2500_v16  ;;  %v2502_v56 = vmul.f32 %v4362_v18, %v5190_v30 }
 0xc74   : > { %3989 = vmatprep.subr.bf16.mxu1 %v2515_v9 }
 0xc75   : > { %3991 = vmatprep.mubr.msk.bf16.mxu1 %vm923_vm2, %v2508_v24  ;;  %v2509_v12 = vpack.c.bf16 %v2503_v62, %v2502_v56  ;;  %v4159_v14 = vpop.permute.xlu0 %4158 }
 0xc76   : > { %v4161_v17 = vunpack.i.h.bf16 %v4159_v14  ;;  %v4160_v2 = vunpack.i.l.bf16 %v4159_v14  ;;  %v3721_v14 = vld [vmem:[%s5598_s18] ss:$0 sm:$0xff] }
 0xc77   : > { %3990 = vmatpush3.bf16.msra.mxu1 %v2515_v9 }
 0xc78   : > { %4003 = vmatprep.subr.bf16.mxu1 %v4219_v32  ;;  %v2730_v9 = vsel %vm1165_vm3, %v4983_v48, %v4160_v2  ;;  %v4405_v2 = vld [vmem:[#allocation2] sm:$0xff] }
 0xc79   : > { %v4169_v63 = vpop.permute.xlu0 %4168 }
 0xc7a   : > { %3992 = vmatmul.mubr.msk.bf16.vlgmr.msra.gmra.mrb[28].mxu1 %vm923_vm2, %v2509_v12  ;;  %v4170_v3 = vunpack.i.l.bf16 %v4169_v63 }
 0xc7b   : > { %4004 = vmatpush3.bf16.msra.mxu1 %v4219_v32 }
 0xc7c   : > { %4005 = vmatprep.subr.bf16.mxu1 %v4220_v5  ;;  %v2739_v48 = vsel %vm2738_vm4, %v2730_v9, %v4170_v3  ;;  %v4407_v3 = vld [vmem:[#allocation2 + $0x18] sm:$0xff] }
 0xc7f   : > { %4006 = vmatpush3.bf16.msra.mxu1 %v4220_v5 }
 0xc9e   : > { %v2491_v61 = vpop.xlane.xlu1 %2490 }
 0xc9f   : > { %4363 = vrcp.f32 %v2491_v61 }
 0xca0   : > { %4365 = vrcp.f32 %v2482_v1 }
 0xca1   : > { %4367 = vrcp.f32 %v2488_v38  ;;  %v2731_v38 = vsel %vm1165_vm3, %v4987_v50, %v4161_v17 }
 0xca2   : > { %v2485_v60 = vpop.xlane.xlu1 %2484 }
 0xca3   : > { %4369 = vrcp.f32 %v2485_v60 }
 0xca6   : > { %v2576_v51 = vpop.permute.xlu1 %2575 }
 0xca7   : > { %3997 = vmatprep.subr.bf16.mxu0 %v2576_v51 }
 0xca8   : > { %3998 = vmatpush3.bf16.msra.mxu0 %v2576_v51 }
 0xca9   : > { %v4364_v0 = vpop.eup %4363 }
 0xcaa   : > { %v4366_v4 = vpop.eup %4365  ;;  %v2507_v30 = vmul.f32 %v4364_v0, %v4352_v10  ;;  %v4164_v10 = vpop.permute.xlu1 %4163 }
 0xcab   : > { %v4368_v59 = vpop.eup %4367  ;;  %v2504_v36 = vmul.f32 %v4366_v4, %v5207_v41  ;;  %v4166_v19 = vunpack.i.h.bf16 %v4164_v10  ;;  %v4165_v20 = vunpack.i.l.bf16 %v4164_v10 }
 0xcac   : > { %v2506_v39 = vmul.f32 %v4368_v59, %v5203_v34 }
 0xcad   : > { %v4370_v7 = vpop.eup %4369  ;;  %v2733_v13 = vsel %vm1165_vm3, %v4985_v49, %v4166_v19  ;;  %v2732_v23 = vsel %vm1165_vm3, %v4981_v47, %v4165_v20 }
 0xcae   : > { %v2505_v31 = vmul.f32 %v4370_v7, %v4354_v15  ;;  %v2511_v44 = vpack.c.bf16 %v2507_v30, %v2506_v39  ;;  %v4174_v15 = vpop.permute.xlu1 %4173 }
 0xcaf   : > { %v4176_v11 = vunpack.i.h.bf16 %v4174_v15  ;;  %v4175_v27 = vunpack.i.l.bf16 %v4174_v15 }
 0xcb0   : > { %v2510_v43 = vpack.c.bf16 %v2505_v31, %v2504_v36 }
 0xcb1   : > { %v2741_v16 = vsel %vm2738_vm4, %v2732_v23, %v4175_v27  ;;  %v2742_v58 = vsel %vm2738_vm4, %v2733_v13, %v4176_v11  ;;  %v4406_v11 = vld [vmem:[#allocation2 + $0x8] sm:$0xff] }
 0xcb2   : > { %3999 = vmatprep.mubr.msk.bf16.mxu0 %vm923_vm2, %v2510_v43  ;;  %v4184_v25 = vpop.permute.xlu1 %4183 }
 0xcb3   : > { %4000 = vmatmul.mubr.msk.bf16.vlgmr.msra.gmra.mrb[36].mxu0 %vm923_vm2, %v2511_v44  ;;  %v4186_v59 = vunpack.i.h.bf16 %v4184_v25  ;;  %v4185_v7 = vunpack.i.l.bf16 %v4184_v25 }
 0xcb5   : > { %v2737_v5 = vsel %vm1165_vm3, %v4993_v54, %v4186_v59 }
 0xd4d   : > { %v3993_v28 = vpop.f32.mrb[28].mxu1 }
 0xd4e   : > { %v2558_v21 = vpop.f32.mrb[29].mxu1 }
 0xd4f   : > { %v3994_v37 = vpop.f32.mrb[30].mxu1 }
 0xd50   : > { %v4187_v45 = vpack.i.bf16 %v3994_v37, %v3993_v28  ;;  %v2561_v41 = vpop.f32.mrb[31].mxu1  ;;  %v2736_v28 = vsel %vm1165_vm3, %v4989_v52, %v4185_v7 }
 0xd51   : > { %v4192_v42 = vpack.i.bf16 %v2561_v41, %v2558_v21 }
 0xd52   : > { %4188 = vrot.lane.b32.xlu1 %v4187_v45, %s4525_s1 }
 0xd53   : > { %4193 = vrot.lane.b32.xlu0 %v4192_v42, %s4525_s1 }
 0xd56   : > { %4203 = vrot.lane.b32.xlu1 %v4202_v26, %s4524_s15  ;;  %v4179_v26 = vpop.permute.xlu0 %4178 }
 0xd57   : > { %4198 = vrot.lane.b32.xlu0 %v4197_v29, %s4524_s15  ;;  %v4171_v29 = vunpack.i.h.bf16 %v4169_v63  ;;  %v4181_v51 = vunpack.i.h.bf16 %v4179_v26  ;;  %v4180_v0 = vunpack.i.l.bf16 %v4179_v26  ;;  %v4404_v63 = vld [vmem:[#allocation2 + $0x10] sm:$0xff] }
 0xd59   : > { %v2740_v24 = vsel %vm2738_vm4, %v2731_v38, %v4171_v29  ;;  %v2735_v43 = vsel %vm1165_vm3, %v4995_v55, %v4181_v51  ;;  %v2734_v44 = vsel %vm1165_vm3, %v4991_v53, %v4180_v0 }
 0xd86   : > { %v4001_v34 = vpop.f32.mrb[36].mxu0 }
 0xd87   : > { %v2619_v22 = vpop.f32.mrb[37].mxu0 }
 0xd88   : > { %v4002_v46 = vpop.f32.mrb[38].mxu0 }
 0xd89   : > { %v4212_v33 = vpack.i.bf16 %v4002_v46, %v4001_v34  ;;  %v2622_v40 = vpop.f32.mrb[39].mxu0 }
 0xd8a   : > { %v4207_v35 = vpack.i.bf16 %v2622_v40, %v2619_v22 }
 0xd8b   : > { %4213 = vrot.lane.b32.xlu1 %v4212_v33, %s4525_s1 }
 0xd8c   : > { %4208 = vrot.lane.b32.xlu0 %v4207_v35, %s4525_s1 }
 0xdc4   : > { %v4189_v1 = vpop.permute.xlu1 %4188 }
 0xdc5   : > { %v4191_v57 = vunpack.i.h.bf16 %v4189_v1  ;;  %v4190_v6 = vunpack.i.l.bf16 %v4189_v1  ;;  %v4194_v8 = vpop.permute.xlu0 %4193 }
 0xdc6   : > { %v4196_v50 = vunpack.i.h.bf16 %v4194_v8  ;;  %v4195_v18 = vunpack.i.l.bf16 %v4194_v8 }
 0xdc7   : > { %v2750_v62 = vsel %vm2747_vm5, %v2741_v16, %v4190_v6  ;;  %v2751_v49 = vsel %vm2747_vm5, %v2742_v58, %v4191_v57  ;;  %v4408_v58 = vld [vmem:[#allocation2 + $0x30] sm:$0xff] }
 0xdc8   : > { %v2761_v56 = vpack.c.bf16 %v2751_v49, %v2750_v62  ;;  %v2749_v47 = vsel %vm2747_vm5, %v2740_v24, %v4196_v50  ;;  %v2748_v12 = vsel %vm2747_vm5, %v2739_v48, %v4195_v18  ;;  %v4204_v60 = vpop.permute.xlu1 %4203  ;;  %v4409_v18 = vld [vmem:[#allocation2 + $0x20] sm:$0xff] }
 0xdc9   : > { %v2760_v61 = vpack.c.bf16 %v2749_v47, %v2748_v12  ;;  %v4199_v4 = vpop.permute.xlu0 %4198  ;;  %v4206_v30 = vunpack.i.h.bf16 %v4204_v60  ;;  %v4205_v36 = vunpack.i.l.bf16 %v4204_v60  ;;  %v4411_v12 = vld [vmem:[#allocation2 + $0x28] sm:$0xff] }
 0xdca   : > { %v4201_v31 = vunpack.i.h.bf16 %v4199_v4  ;;  %v4200_v39 = vunpack.i.l.bf16 %v4199_v4 }
 0xdcb   : > { %4007 = vmatprep.mubr.msk.bf16.mxu1 %vm923_vm2, %v2760_v61  ;;  %v2745_v41 = vsel %vm2738_vm4, %v2736_v28, %v4205_v36  ;;  %v2746_v42 = vsel %vm2738_vm4, %v2737_v5, %v4206_v30 }
 0xdcc   : > { %4008 = vmatmul.mubr.msk.bf16.vlgmr.msra.gmra.mrb[32].mxu1 %vm923_vm2, %v2761_v56  ;;  %v2744_v22 = vsel %vm2738_vm4, %v2735_v43, %v4201_v31  ;;  %v2743_v53 = vsel %vm2738_vm4, %v2734_v44, %v4200_v39  ;;  %v4410_v56 = vld [vmem:[#allocation2 + $0x38] sm:$0xff] }
 0xdfd   : > { %v4214_v32 = vpop.permute.xlu1 %4213 }
 0xdfe   : > { %v4216_v21 = vunpack.i.h.bf16 %v4214_v32  ;;  %v4215_v37 = vunpack.i.l.bf16 %v4214_v32  ;;  %v4209_v45 = vpop.permute.xlu0 %4208 }
 0xdff   : > { %v4211_v34 = vunpack.i.h.bf16 %v4209_v45  ;;  %v4210_v55 = vunpack.i.l.bf16 %v4209_v45 }
 0xe00   : > { %v2754_v46 = vsel %vm2747_vm5, %v2745_v41, %v4215_v37  ;;  %v2755_v54 = vsel %vm2747_vm5, %v2746_v42, %v4216_v21 }
 0xe01   : > { %v2763_v33 = vpack.c.bf16 %v2755_v54, %v2754_v46  ;;  %v2753_v52 = vsel %vm2747_vm5, %v2744_v22, %v4211_v34  ;;  %v2752_v40 = vsel %vm2747_vm5, %v2743_v53, %v4210_v55 }
 0xe02   : > { %v2762_v35 = vpack.c.bf16 %v2753_v52, %v2752_v40  ;;  %v4221_v52 = vld [vmem:[%s4747_s6] sm:$0xff]   ;;  %v4222_v40 = vld [vmem:[%s4747_s6 + $0x8] sm:$0xff]   ;;  %s5602_s6 = sld [smem:[#allocation26_spill]] (!%p3740_p1) }
 0xe03   : > { %4015 = vmatprep.subr.bf16.mxu0 %v4221_v52 }
 0xe04   : > { %4011 = vmatprep.mubr.msk.bf16.mxu1 %vm923_vm2, %v2762_v35  ;;  %4016 = vmatpush3.bf16.msra.mxu0 %v4221_v52 }
 0xe05   : > { %4012 = vmatmul.mubr.msk.bf16.gmra.mrb[36].mxu1 %vm923_vm2, %v2763_v33  ;;  %4017 = vmatprep.subr.bf16.mxu0 %v4222_v40 }
 0xe08   : > { %4018 = vmatpush3.bf16.msra.mxu0 %v4222_v40 }
 0xe9f   : > { %v4009_v10 = vpop.f32.mrb[32].mxu1 }
 0xea0   : > { %v2822_v15 = vpop.f32.mrb[33].mxu1  ;;  %v2855_v17 = vadd.f32 %v4404_v63, %v4009_v10 }
 0xea1   : > { %v2853_v25 = vadd.f32 %v4405_v2, %v2822_v15  ;;  %v4010_v26 = vpop.f32.mrb[34].mxu1 }
 0xea2   : > { %v2825_v19 = vpop.f32.mrb[35].mxu1  ;;  %v5301_v29 = vadd.f32 %v3721_v14, %v2855_v17  ;;  %v2856_v38 = vadd.f32 %v4407_v3, %v4010_v26 }
 0xea3   : > { %v5299_v20 = vadd.f32 %v3721_v14, %v2853_v25  ;;  %v2854_v27 = vadd.f32 %v4406_v11, %v2825_v19 }
 0xea4   : > { %v5309_v23 = vadd.f32 %v3721_v14, %v2856_v38  ;;  %v2884_v57 = vsel %vm923_vm2, %v5301_v29, 0.0 }
 0xea5   : > { %v5303_v9 = vadd.f32 %v3721_v14, %v2854_v27  ;;  %v2878_v1 = vsel %vm923_vm2, %v5299_v20, 0.0 }
 0xea6   : > { %2879 = vadd.xlane.f32.xlu0 %v2878_v1  ;;  %v2887_v6 = vsel %vm923_vm2, %v5309_v23, 0.0 }
 0xea7   : > { %v2881_v13 = vsel %vm923_vm2, %v5303_v9, 0.0 }
 0xea8   : > { %2882 = vadd.xlane.f32.xlu1 %v2881_v13 }
 0xeaa   : > { %2885 = vadd.xlane.f32.xlu0 %v2884_v57 }
 0xeae   : > { %2888 = vadd.xlane.f32.xlu0 %v2887_v6 }
 0xed8   : > { %v4013_v8 = vpop.f32.mrb[36].mxu1 }
 0xed9   : > { %v2838_v16 = vpop.f32.mrb[37].mxu1  ;;  %v2859_v50 = vadd.f32 %v4408_v58, %v4013_v8 }
 0xeda   : > { %v2857_v48 = vadd.f32 %v4409_v18, %v2838_v16  ;;  %v4014_v24 = vpop.f32.mrb[38].mxu1 }
 0xedb   : > { %v2841_v62 = vpop.f32.mrb[39].mxu1  ;;  %v2860_v47 = vadd.f32 %v4410_v56, %v4014_v24  ;;  %v5317_v60 = vadd.f32 %v3721_v14, %v2859_v50 }
 0xedc   : > { %v5315_v49 = vadd.f32 %v3721_v14, %v2857_v48  ;;  %v2858_v61 = vadd.f32 %v4411_v12, %v2841_v62 }
 0xedd   : > { %v5323_v4 = vadd.f32 %v3721_v14, %v2860_v47  ;;  %v2896_v7 = vsel %vm923_vm2, %v5317_v60, 0.0 }
 0xede   : > { %v5319_v51 = vadd.f32 %v3721_v14, %v2858_v61  ;;  %v2890_v0 = vsel %vm923_vm2, %v5315_v49, 0.0 }
 0xedf   : > { %2891 = vadd.xlane.f32.xlu0 %v2890_v0  ;;  %v2899_v30 = vsel %vm923_vm2, %v5323_v4, 0.0 }
 0xee0   : > { %v2893_v59 = vsel %vm923_vm2, %v5319_v51, 0.0 }
 0xee1   : > { %2894 = vadd.xlane.f32.xlu1 %v2893_v59 }
 0xee3   : > { %2897 = vadd.xlane.f32.xlu0 %v2896_v7 }
 0xee5   : > { %2900 = vadd.xlane.f32.xlu1 %v2899_v30  ;;  %v3722_v30 = vld [vmem:[%s773_s19] ss:$0 sm:$0xff] }
 0xf33   : > { %v2880_v36 = vpop.xlane.xlu0 %2879 }
 0xf34   : > { %v2902_v31 = vmul.f32 0.03125, %v2880_v36 }
 0xf35   : > { %v2883_v39 = vpop.xlane.xlu1 %2882 }
 0xf36   : > { %v5332_v43 = vsub.f32 %v5299_v20, %v2902_v31  ;;  %v2903_v44 = vmul.f32 0.03125, %v2883_v39 }
 0xf37   : > { %v2886_v32 = vpop.xlane.xlu0 %2885 }
 0xf38   : > { %v5335_v5 = vsub.f32 %v5303_v9, %v2903_v44  ;;  %v2904_v28 = vmul.f32 0.03125, %v2886_v32  ;;  %v2918_v21 = vmul.f32 %v5332_v43, %v5332_v43 }
 0xf3a   : > { %v5340_v37 = vsub.f32 %v5301_v29, %v2904_v28  ;;  %v2926_v45 = vsel %vm923_vm2, %v2918_v21, 0.0  ;;  %v2919_v41 = vmul.f32 %v5335_v5, %v5335_v5  ;;  %v3723_v28 = vld [vmem:[%s776_s23] ss:$0 sm:$0xff]  ;;  %s5604_s23 = scalar_lea.vmem (!%p3740_p1), [#allocation3], %s4702_s0 }
 0xf3b   : > { %v2889_v42 = vpop.xlane.xlu0 %2888  ;;  %2927 = vadd.xlane.f32.xlu0 %v2926_v45 }
 0xf3c   : > { %v2905_v34 = vmul.f32 0.03125, %v2889_v42  ;;  %v2929_v55 = vsel %vm923_vm2, %v2919_v41, 0.0  ;;  %v2920_v22 = vmul.f32 %v5340_v37, %v5340_v37 }
 0xf3d   : > { %2930 = vadd.xlane.f32.xlu1 %v2929_v55 }
 0xf3e   : > { %v5349_v53 = vsub.f32 %v5309_v23, %v2905_v34  ;;  %v2932_v46 = vsel %vm923_vm2, %v2920_v22, 0.0 }
 0xf3f   : > { %2933 = vadd.xlane.f32.xlu0 %v2932_v46 }
 0xf40   : > { %v2921_v54 = vmul.f32 %v5349_v53, %v5349_v53 }
 0xf42   : > { %v2935_v33 = vsel %vm923_vm2, %v2921_v54, 0.0 }
 0xf43   : > { %2936 = vadd.xlane.f32.xlu1 %v2935_v33 }
 0xf6c   : > { %v2892_v35 = vpop.xlane.xlu0 %2891 }
 0xf6d   : > { %v2906_v10 = vmul.f32 0.03125, %v2892_v35 }
 0xf6e   : > { %v2895_v14 = vpop.xlane.xlu1 %2894 }
 0xf6f   : > { %v5358_v15 = vsub.f32 %v5315_v49, %v2906_v10  ;;  %v2907_v63 = vmul.f32 0.03125, %v2895_v14 }
 0xf70   : > { %v2898_v17 = vpop.xlane.xlu0 %2897 }
 0xf71   : > { %v5361_v2 = vsub.f32 %v5319_v51, %v2907_v63  ;;  %v2908_v25 = vmul.f32 0.03125, %v2898_v17  ;;  %v2922_v26 = vmul.f32 %v5358_v15, %v5358_v15 }
 0xf72   : > { %v2901_v19 = vpop.xlane.xlu1 %2900 }
 0xf73   : > { %v5366_v11 = vsub.f32 %v5317_v60, %v2908_v25  ;;  %v2909_v27 = vmul.f32 0.03125, %v2901_v19  ;;  %v2938_v3 = vsel %vm923_vm2, %v2922_v26, 0.0  ;;  %v2923_v38 = vmul.f32 %v5361_v2, %v5361_v2 }
 0xf74   : > { %2939 = vadd.xlane.f32.xlu0 %v2938_v3 }
 0xf75   : > { %v5372_v1 = vsub.f32 %v5323_v4, %v2909_v27  ;;  %v2941_v13 = vsel %vm923_vm2, %v2923_v38, 0.0  ;;  %v2924_v57 = vmul.f32 %v5366_v11, %v5366_v11 }
 0xf76   : > { %2942 = vadd.xlane.f32.xlu1 %v2941_v13 }
 0xf77   : > { %v2944_v6 = vsel %vm923_vm2, %v2924_v57, 0.0  ;;  %v2925_v8 = vmul.f32 %v5372_v1, %v5372_v1 }
 0xf78   : > { %2945 = vadd.xlane.f32.xlu0 %v2944_v6 }
 0xf79   : > { %v2947_v16 = vsel %vm923_vm2, %v2925_v8, 0.0 }
 0xf7a   : > { %2948 = vadd.xlane.f32.xlu1 %v2947_v16 }
 0xfc8   : > { %v2928_v58 = vpop.xlane.xlu0 %2927 }
 0xfc9   : > { %v2950_v50 = vmul.f32 0.03125, %v2928_v58 }
 0xfca   : > { %v2931_v18 = vpop.xlane.xlu1 %2930 }
 0xfcb   : > { %v2958_v48 = vadd.f32 1e-05, %v2950_v50  ;;  %v2951_v24 = vmul.f32 0.03125, %v2931_v18 }
 0xfcc   : > { %v2934_v62 = vpop.xlane.xlu0 %2933 }
 0xfcd   : > { %4371 = vrsqrt.f32 %v2958_v48  ;;  %v2959_v56 = vadd.f32 1e-05, %v2951_v24  ;;  %v2952_v47 = vmul.f32 0.03125, %v2934_v62 }
 0xfcf   : > { %4373 = vrsqrt.f32 %v2959_v56  ;;  %v2960_v12 = vadd.f32 1e-05, %v2952_v47 }
 0xfd0   : > { %v2937_v61 = vpop.xlane.xlu1 %2936 }
 0xfd1   : > { %4375 = vrsqrt.f32 %v2960_v12  ;;  %v2953_v0 = vmul.f32 0.03125, %v2937_v61  ;;  %v4224_v12 = vld [vmem:[%s4757_s20 + $0x8] sm:$0xff]   ;;  %v4226_v61 = vld [vmem:[%s4757_s20 + $0x18] sm:$0xff]  }
 0xfd3   : > { %v2961_v59 = vadd.f32 1e-05, %v2953_v0  ;;  %v5412_v0 = vld [vmem:[%s784_s7] ss:$0 sm:$0xff] }
 0xfd5   : > { %4377 = vrsqrt.f32 %v2961_v59 }
 0xfd7   : > { %v4372_v7 = vpop.eup %4371 }
 0xfd8   : > { %v2974_v36 = vmul.f32 %v4372_v7, %v5332_v43 }
 0xfd9   : > { %v4374_v31 = vpop.eup %4373 }
 0xfda   : > { %v2975_v39 = vmul.f32 %v4374_v31, %v5335_v5  ;;  %v2988_v44 = vmul.f32 %v3722_v30, %v2974_v36 }
 0xfdb   : > { %v4376_v32 = vpop.eup %4375 }
 0xfdc   : > { %v2976_v21 = vmul.f32 %v4376_v32, %v5340_v37  ;;  %v2989_v45 = vmul.f32 %v3722_v30, %v2975_v39  ;;  %v3002_v41 = vadd.f32 %v3723_v28, %v2988_v44 }
 0xfde   : > { %v3003_v42 = vadd.f32 %v3723_v28, %v2989_v45  ;;  %v2990_v55 = vmul.f32 %v3722_v30, %v2976_v21 }
 0xfdf   : > { %v4378_v34 = vpop.eup %4377 }
 0xfe0   : > { %v2977_v22 = vmul.f32 %v4378_v34, %v5349_v53  ;;  %v3014_v43 = vpack.c.bf16 %v3003_v42, %v3002_v41  ;;  %v3004_v5 = vadd.f32 %v3723_v28, %v2990_v55 }
 0xfe2   : > { %v2991_v46 = vmul.f32 %v3722_v30, %v2977_v22  ;;  %4019 = vmatprep.mubr.msk.bf16.mxu0 %vm923_vm2, %v3014_v43 }
 0xfe4   : > { %v3005_v54 = vadd.f32 %v3723_v28, %v2991_v46 }
 0xfe6   : > { %v3015_v33 = vpack.c.bf16 %v3005_v54, %v3004_v5 }
 0xfe8   : > { %4020 = vmatmul.mubr.msk.bf16.vlgmr.msra.gmra.mrb[40].mxu0 %vm923_vm2, %v3015_v33 }
0x1001   : > { %v2940_v52 = vpop.xlane.xlu0 %2939 }
0x1002   : > { %v2954_v40 = vmul.f32 0.03125, %v2940_v52 }
0x1003   : > { %v2943_v35 = vpop.xlane.xlu1 %2942 }
0x1004   : > { %v2962_v37 = vadd.f32 1e-05, %v2954_v40  ;;  %v2955_v10 = vmul.f32 0.03125, %v2943_v35 }
0x1005   : > { %v2946_v14 = vpop.xlane.xlu0 %2945 }
0x1006   : > { %4379 = vrsqrt.f32 %v2962_v37  ;;  %v2963_v63 = vadd.f32 1e-05, %v2955_v10  ;;  %v2956_v17 = vmul.f32 0.03125, %v2946_v14 }
0x1007   : > { %v2949_v25 = vpop.xlane.xlu1 %2948 }
0x1008   : > { %4381 = vrsqrt.f32 %v2963_v63  ;;  %v2964_v53 = vadd.f32 1e-05, %v2956_v17  ;;  %v2957_v26 = vmul.f32 0.03125, %v2949_v25 }
0x100a   : > { %4383 = vrsqrt.f32 %v2964_v53  ;;  %v2965_v19 = vadd.f32 1e-05, %v2957_v26 }
0x100c   : > { %4385 = vrsqrt.f32 %v2965_v19 }
0x1010   : > { %v4380_v27 = vpop.eup %4379 }
0x1011   : > { %v2978_v3 = vmul.f32 %v4380_v27, %v5358_v15 }
0x1012   : > { %v4382_v38 = vpop.eup %4381 }
0x1013   : > { %v2979_v13 = vmul.f32 %v4382_v38, %v5361_v2  ;;  %v2992_v57 = vmul.f32 %v3722_v30, %v2978_v3 }
0x1014   : > { %v4384_v6 = vpop.eup %4383 }
0x1015   : > { %v2980_v8 = vmul.f32 %v4384_v6, %v5366_v11  ;;  %v2993_v16 = vmul.f32 %v3722_v30, %v2979_v13  ;;  %v3006_v18 = vadd.f32 %v3723_v28, %v2992_v57  ;;  %v4223_v11 = vld [vmem:[%s4757_s20] sm:$0xff]  }
0x1016   : > { %v4386_v58 = vpop.eup %4385  ;;  %4027 = vmatprep.subr.bf16.mxu1 %v4223_v11 }
0x1017   : > { %v2981_v50 = vmul.f32 %v4386_v58, %v5372_v1  ;;  %v3007_v48 = vadd.f32 %v3723_v28, %v2993_v16  ;;  %v2994_v24 = vmul.f32 %v3722_v30, %v2980_v8  ;;  %4028 = vmatpush3.bf16.msra.mxu1 %v4223_v11  ;;  %v4225_v1 = vld [vmem:[%s4757_s20 + $0x10] sm:$0xff]  }
0x1018   : > { %4029 = vmatprep.subr.bf16.mxu1 %v4224_v12 }
0x1019   : > { %v3016_v62 = vpack.c.bf16 %v3007_v48, %v3006_v18  ;;  %v2995_v15 = vmul.f32 %v3722_v30, %v2981_v50  ;;  %v3008_v2 = vadd.f32 %v3723_v28, %v2994_v24 }
0x101b   : > { %4023 = vmatprep.mubr.msk.bf16.mxu0 %vm923_vm2, %v3016_v62  ;;  %v3009_v56 = vadd.f32 %v3723_v28, %v2995_v15  ;;  %4030 = vmatpush3.bf16.msra.mxu1 %v4224_v12 }
0x101c   : > { %4031 = vmatprep.subr.bf16.mxu1 %v4225_v1 }
0x101d   : > { %v3017_v47 = vpack.c.bf16 %v3009_v56, %v3008_v2 }
0x101f   : > { %4024 = vmatmul.mubr.msk.bf16.gmra.mrb[44].mxu0 %vm923_vm2, %v3017_v47  ;;  %4032 = vmatpush3.bf16.msra.mxu1 %v4225_v1 }
0x1020   : > { %4033 = vmatprep.subr.bf16.mxu1 %v4226_v61 }
0x1023   : > { %4034 = vmatpush3.bf16.msra.mxu1 %v4226_v61 }
0x10bb   : > { %v4021_v59 = vpop.f32.mrb[40].mxu0 }
0x10bc   : > { %v3092_v7 = vadd.f32 %v4021_v59, %v5412_v0  ;;  %v3083_v30 = vpop.f32.mrb[41].mxu0 }
0x10bd   : > { %v3084_v36 = vadd.f32 %v5412_v0, %v3083_v30  ;;  %v4022_v31 = vpop.f32.mrb[42].mxu0 }
0x10be   : > { %v3116_v39 = vmul.f32 %v3092_v7, %v3092_v7  ;;  %v3095_v44 = vadd.f32 %v4022_v31, %v5412_v0  ;;  %v3086_v32 = vpop.f32.mrb[43].mxu0 }
0x10bf   : > { %v3114_v28 = vmul.f32 %v3084_v36, %v3084_v36  ;;  %v3087_v21 = vadd.f32 %v5412_v0, %v3086_v32 }
0x10c0   : > { %v3124_v45 = vmul.f32 %v3116_v39, %v3092_v7  ;;  %v3117_v41 = vmul.f32 %v3095_v44, %v3095_v44 }
0x10c1   : > { %v3122_v42 = vmul.f32 %v3114_v28, %v3084_v36  ;;  %v3115_v34 = vmul.f32 %v3087_v21, %v3087_v21 }
0x10c2   : > { %v3132_v55 = vmul.f32 0.044715, %v3124_v45  ;;  %v3125_v22 = vmul.f32 %v3117_v41, %v3095_v44 }
0x10c3   : > { %v3130_v43 = vmul.f32 0.044715, %v3122_v42  ;;  %v3123_v46 = vmul.f32 %v3115_v34, %v3087_v21 }
0x10c4   : > { %v3140_v5 = vadd.f32 %v3132_v55, %v3092_v7  ;;  %v3133_v54 = vmul.f32 0.044715, %v3125_v22 }
0x10c5   : > { %v3138_v33 = vadd.f32 %v3130_v43, %v3084_v36  ;;  %v3131_v52 = vmul.f32 0.044715, %v3123_v46 }
0x10c6   : > { %v3148_v40 = vmul.f32 0.7978846, %v3140_v5  ;;  %v3141_v35 = vadd.f32 %v3133_v54, %v3095_v44 }
0x10c7   : > { %v3146_v37 = vmul.f32 0.7978846, %v3138_v33  ;;  %v3139_v10 = vadd.f32 %v3131_v52, %v3087_v21 }
0x10c8   : > { %4387 = vtanh.f32 %v3148_v40  ;;  %v3149_v14 = vmul.f32 0.7978846, %v3141_v35 }
0x10c9   : > { %4389 = vtanh.f32 %v3146_v37  ;;  %v3147_v63 = vmul.f32 0.7978846, %v3139_v10 }
0x10ca   : > { %4391 = vtanh.f32 %v3149_v14 }
0x10cb   : > { %4393 = vtanh.f32 %v3147_v63 }
0x10d2   : > { %v4388_v17 = vpop.eup %4387 }
0x10d3   : > { %v4390_v25 = vpop.eup %4389  ;;  %v3164_v53 = vadd.f32 1.0, %v4388_v17 }
0x10d4   : > { %v4392_v26 = vpop.eup %4391  ;;  %v3162_v19 = vadd.f32 1.0, %v4390_v25 }
0x10d5   : > { %v4394_v27 = vpop.eup %4393  ;;  %v3172_v3 = vmul.f32 0.5, %v3164_v53  ;;  %v3165_v38 = vadd.f32 1.0, %v4392_v26 }
0x10d6   : > { %v3170_v13 = vmul.f32 0.5, %v3162_v19  ;;  %v3163_v57 = vadd.f32 1.0, %v4394_v27 }
0x10d7   : > { %v3173_v6 = vmul.f32 0.5, %v3165_v38  ;;  %v3180_v16 = vmul.f32 %v3172_v3, %v3092_v7 }
0x10d8   : > { %v3171_v8 = vmul.f32 0.5, %v3163_v57  ;;  %v3178_v50 = vmul.f32 %v3170_v13, %v3084_v36  ;;  %v3731_v13 = vld [vmem:[%s792_s30] ss:$0 sm:$0xff]  ;;  %s5599_s30 = sld [smem:[#allocation27_spill]] (!%p3740_p1) }
0x10d9   : > { %v3181_v58 = vmul.f32 %v3173_v6, %v3095_v44 }
0x10da   : > { %v3179_v18 = vmul.f32 %v3171_v8, %v3087_v21 }
0x10db   : > { %v3195_v48 = vpack.c.bf16 %v3181_v58, %v3180_v16 }
0x10dc   : > { %v3194_v24 = vpack.c.bf16 %v3179_v18, %v3178_v50 }
0x10de   : > { %4035 = vmatprep.mubr.msk.bf16.mxu1 %vm3229_vm6, %v3194_v24  ;;  %s5600_s3 = smov (!%p3740_p1), %s5599_s30 }
0x10df   : > { %4036 = vmatmul.mubr.msk.bf16.vlgmr.msra.gmra.mrb[40].mxu1 %vm3229_vm6, %v3195_v48 }
0x10f2   : > { %v4025_v62 = vpop.f32.mrb[44].mxu0 }
0x10f3   : > { %v3108_v15 = vadd.f32 %v4025_v62, %v5412_v0  ;;  %v3099_v2 = vpop.f32.mrb[45].mxu0 }
0x10f4   : > { %v3100_v56 = vadd.f32 %v5412_v0, %v3099_v2  ;;  %v4026_v47 = vpop.f32.mrb[46].mxu0 }
0x10f5   : > { %v3120_v11 = vmul.f32 %v3108_v15, %v3108_v15  ;;  %v3111_v12 = vadd.f32 %v4026_v47, %v5412_v0  ;;  %v3102_v1 = vpop.f32.mrb[47].mxu0 }
0x10f6   : > { %v3118_v61 = vmul.f32 %v3100_v56, %v3100_v56  ;;  %v3103_v59 = vadd.f32 %v5412_v0, %v3102_v1 }
0x10f7   : > { %v3128_v7 = vmul.f32 %v3120_v11, %v3108_v15  ;;  %v3121_v30 = vmul.f32 %v3111_v12, %v3111_v12 }
0x10f8   : > { %v3126_v36 = vmul.f32 %v3118_v61, %v3100_v56  ;;  %v3119_v31 = vmul.f32 %v3103_v59, %v3103_v59 }
0x10f9   : > { %v3136_v39 = vmul.f32 0.044715, %v3128_v7  ;;  %v3129_v44 = vmul.f32 %v3121_v30, %v3111_v12 }
0x10fa   : > { %v3134_v32 = vmul.f32 0.044715, %v3126_v36  ;;  %v3127_v28 = vmul.f32 %v3119_v31, %v3103_v59 }
0x10fb   : > { %v3144_v21 = vadd.f32 %v3136_v39, %v3108_v15  ;;  %v3137_v45 = vmul.f32 0.044715, %v3129_v44 }
0x10fc   : > { %v3142_v41 = vadd.f32 %v3134_v32, %v3100_v56  ;;  %v3135_v42 = vmul.f32 0.044715, %v3127_v28 }
0x10fd   : > { %v3152_v34 = vmul.f32 0.7978846, %v3144_v21  ;;  %v3145_v55 = vadd.f32 %v3137_v45, %v3111_v12 }
0x10fe   : > { %v3150_v22 = vmul.f32 0.7978846, %v3142_v41  ;;  %v3143_v43 = vadd.f32 %v3135_v42, %v3103_v59  ;;  %v4412_v41 = vld [vmem:[%s5599_s30] sm:$0xff] (!%p3740_p1)   ;;  %v4526_v42 = vmov (!%p3740_p1), 0.0  }
0x10ff   : > { %4395 = vtanh.f32 %v3152_v34  ;;  %v3153_v46 = vmul.f32 0.7978846, %v3145_v55  ;;  %4043 = vmatprep.subr.bf16.mxu0 (!%p3740_p1), %v4526_v42  ;;  %4047 = vmatprep.mubr.msk.bf16.mxu0 (!%p3740_p1), %vm4527_vm9, %v4526_v42  ;;  %v4413_v34 = vld [vmem:[%s5600_s3 + $0x8] sm:$0xff] (!%p3740_p1)  }
0x1100   : > { %4397 = vtanh.f32 %v3150_v22  ;;  %v3151_v0 = vmul.f32 0.7978846, %v3143_v43  ;;  %4044 = vmatpush3.bf16.msra.mxu0 (!%p3740_p1), %v4412_v41 }
0x1101   : > { %4399 = vtanh.f32 %v3153_v46  ;;  %4045 = vmatprep.subr.bf16.mxu0 (!%p3740_p1), %v4526_v42 }
0x1102   : > { %4401 = vtanh.f32 %v3151_v0  ;;  %v3741_v0 = vld [vmem:[%s5601_s2] ss:$0 sm:$0xff] (!%p3740_p1) }
0x1104   : > { %4046 = vmatpush3.bf16.msra.mxu0 (!%p3740_p1), %v4413_v34 }
0x1109   : > { %v4396_v5 = vpop.eup %4395 }
0x110a   : > { %v4398_v54 = vpop.eup %4397  ;;  %v3168_v33 = vadd.f32 1.0, %v4396_v5 }
0x110b   : > { %v4400_v52 = vpop.eup %4399  ;;  %v3166_v40 = vadd.f32 1.0, %v4398_v54 }
0x110c   : > { %v4402_v35 = vpop.eup %4401  ;;  %v3176_v37 = vmul.f32 0.5, %v3168_v33  ;;  %v3169_v10 = vadd.f32 1.0, %v4400_v52  ;;  %v3742_v33 = vld [vmem:[%s5602_s6] ss:$0 sm:$0xff] (!%p3740_p1) }
0x110d   : > { %v3174_v14 = vmul.f32 0.5, %v3166_v40  ;;  %v3167_v63 = vadd.f32 1.0, %v4402_v35 }
0x110e   : > { %v3177_v17 = vmul.f32 0.5, %v3169_v10  ;;  %v3184_v53 = vmul.f32 %v3176_v37, %v3108_v15 }
0x110f   : > { %v3175_v25 = vmul.f32 0.5, %v3167_v63  ;;  %v3182_v19 = vmul.f32 %v3174_v14, %v3100_v56 }
0x1110   : > { %v3185_v26 = vmul.f32 %v3177_v17, %v3111_v12 }
0x1111   : > { %v3183_v27 = vmul.f32 %v3175_v25, %v3103_v59 }
0x1112   : > { %v3197_v3 = vpack.c.bf16 %v3185_v26, %v3184_v53 }
0x1113   : > { %v3196_v38 = vpack.c.bf16 %v3183_v27, %v3182_v19  ;;  %v3743_v27 = vld [vmem:[%s5603_s22] ss:$0 sm:$0xff] (!%p3740_p1) }
0x1115   : > { %4039 = vmatprep.mubr.msk.bf16.mxu1 %vm3229_vm6, %v3196_v38 }
0x1116   : > { %4040 = vmatmul.mubr.msk.bf16.gmra.mrb[44].mxu1 %vm3229_vm6, %v3197_v3 }
0x11b2   : > { %v4037_v57 = vpop.f32.mrb[40].mxu1 }
0x11b3   : > { %v3285_v6 = vadd.f32 %v4037_v57, %v3731_v13  ;;  %v3276_v8 = vpop.f32.mrb[41].mxu1 }
0x11b4   : > { %v3277_v16 = vadd.f32 %v3731_v13, %v3276_v8  ;;  %v4038_v58 = vpop.f32.mrb[42].mxu1 }
0x11b5   : > { %v3309_v50 = vadd.f32 %v3285_v6, %v5301_v29  ;;  %v3288_v18 = vadd.f32 %v4038_v58, %v3731_v13  ;;  %v3279_v48 = vpop.f32.mrb[43].mxu1 }
0x11b6   : > { %v3307_v24 = vadd.f32 %v3277_v16, %v5299_v20  ;;  %v3280_v62 = vadd.f32 %v3731_v13, %v3279_v48 }
0x11b7   : > { %3317 = vst.msk [vmem:[#allocation2 + $0x10] sm:$0xff] %vm923_vm2, %v3309_v50  ;;  %v3310_v15 = vadd.f32 %v3288_v18, %v5309_v23 }
0x11b8   : > { %3315 = vst.msk [vmem:[#allocation2] sm:$0xff] %vm923_vm2, %v3307_v24  ;;  %v3308_v2 = vadd.f32 %v3280_v62, %v5303_v9 }
0x11b9   : > { %3318 = vst.msk [vmem:[#allocation2 + $0x18] sm:$0xff] %vm923_vm2, %v3310_v15 }
0x11ba   : > { %3316 = vst.msk [vmem:[#allocation2 + $0x8] sm:$0xff] %vm923_vm2, %v3308_v2 }
0x11e9   : > { %v4041_v56 = vpop.f32.mrb[44].mxu1 }
0x11ea   : > { %v3301_v47 = vadd.f32 %v4041_v56, %v3731_v13  ;;  %v3292_v29 = vpop.f32.mrb[45].mxu1 }
0x11eb   : > { %v3293_v11 = vadd.f32 %v3731_v13, %v3292_v29  ;;  %v4042_v12 = vpop.f32.mrb[46].mxu1  ;;  %3326 = sbr.rel (%p3740_p1) target bundleno = 5138 (0x1412), region = 104 }
0x11ec   : > { %v3313_v20 = vadd.f32 %v3301_v47, %v5317_v60  ;;  %v3304_v1 = vadd.f32 %v4042_v12, %v3731_v13  ;;  %v3295_v61 = vpop.f32.mrb[47].mxu1 }
0x11ed   : > { %v3311_v59 = vadd.f32 %v3293_v11, %v5315_v49  ;;  %v3296_v23 = vadd.f32 %v3731_v13, %v3295_v61 }
0x11ee   : > { %3321 = vst.msk [vmem:[#allocation2 + $0x30] sm:$0xff] %vm923_vm2, %v3313_v20  ;;  %v3314_v9 = vadd.f32 %v3304_v1, %v5323_v4 }
0x11ef   : > { %3319 = vst.msk [vmem:[#allocation2 + $0x20] sm:$0xff] %vm923_vm2, %v3311_v59  ;;  %v3312_v7 = vadd.f32 %v3296_v23, %v5319_v51  ;;  %v3331_v60 = vrot.slane (!%p3740_p1), %v3311_v59, 7 }
0x11f0   : > { %3322 = vst.msk [vmem:[#allocation2 + $0x38] sm:$0xff] %vm923_vm2, %v3314_v9 }
0x11f1   : > { %3320 = vst.msk [vmem:[#allocation2 + $0x28] sm:$0xff] %vm923_vm2, %v3312_v7  ;;  %v3333_v49 = vsel (!%p3740_p1), %vm3332_vm7, %v3331_v60, %v3307_v24 }
0x11f2   : > { %v3336_v30 = vsel %vm3335_vm8, %v3333_v49, 0.0 }
0x11f3   : > { %3337 = vadd.xlane.f32.xlu0 %v3336_v30 }
0x1280   : > { %v3338_v36 = vpop.xlane.xlu0 %3337 }
0x1281   : > { %v3339_v4 = vmul.f32 0.03125, %v3338_v36 }
0x1283   : > { %v3341_v31 = vrot.slane %v3339_v4, 1  ;;  %v3344_v39 = vsub.f32 %v3307_v24, %v3339_v4 }
0x1285   : > { %v3345_v44 = vsub.f32 %v3311_v59, %v3341_v31  ;;  %v3346_v32 = vmul.f32 %v3344_v39, %v3344_v39 }
0x1287   : > { %v3347_v51 = vmul.f32 %v3345_v44, %v3345_v44 }
0x1289   : > { %v3350_v28 = vrot.slane %v3347_v51, 7 }
0x128b   : > { %v3351_v21 = vsel %vm3332_vm7, %v3350_v28, %v3346_v32 }
0x128c   : > { %v3353_v45 = vsel %vm3335_vm8, %v3351_v21, 0.0 }
0x128d   : > { %3354 = vadd.xlane.f32.xlu0 %v3353_v45 }
0x131a   : > { %v3355_v55 = vpop.xlane.xlu0 %3354 }
0x131b   : > { %v3356_v22 = vmul.f32 0.03125, %v3355_v55 }
0x131d   : > { %v3357_v43 = vadd.f32 1e-05, %v3356_v22 }
0x131f   : > { %4414 = vrsqrt.f32 %v3357_v43 }
0x1329   : > { %v4415_v46 = vpop.eup %4414 }
0x132a   : > { %v3360_v5 = vrot.slane %v4415_v46, 1  ;;  %v3363_v54 = vmul.f32 %v4415_v46, %v3344_v39 }
0x132c   : > { %v3364_v52 = vmul.f32 %v3360_v5, %v3345_v44  ;;  %v3371_v40 = vmul.f32 %v3741_v0, %v3363_v54 }
0x132e   : > { %v3372_v35 = vmul.f32 %v3741_v0, %v3364_v52  ;;  %v3379_v37 = vadd.f32 %v3742_v33, %v3371_v40 }
0x1330   : > { %v3380_v10 = vadd.f32 %v3742_v33, %v3372_v35  ;;  %v3385_v14 = vpack.c.bf16 %v3379_v37, %v3379_v37 }
0x1332   : > { %v3386_v63 = vpack.c.bf16 %v3380_v10, %v3380_v10  ;;  %v3396_v25 = vunpack.c.l.b16 %v3385_v14 }
0x1334   : > { %v3397_v17 = vunpack.c.l.b16 %v3386_v63 }
0x1336   : > { %v3398_v53 = vrot.slane %v3397_v17, 7 }
0x1338   : > { %v3399_v26 = vsel %vm3332_vm7, %v3398_v53, %v3396_v25 }
0x1339   : > { %v3400_v19 = vpack.c.b16 %v3399_v26, %v3399_v26 }
0x133b   : > { %4048 = vmatmul.mubr.msk.bf16.vlgmr.msra.gmra.mrb[0].mxu0 %vm923_vm2, %v3400_v19 }
0x140e   : > { %v3450_v3 = vpop.f32.mrb[0].mxu0 }
0x140f   : > { %v3451_v38 = vadd.f32 %v3743_v27, %v3450_v3  ;;  %v4049_v13 = vpop.f32.mrb[1].mxu0 }
0x1410   : > { %v3453_v57 = vpop.f32.mrb[2].mxu0 }
0x1411   : > { %3456 = vst [vmem:[%s5604_s23] sm:$0x3] %v3451_v38  ;;  %v4050_v6 = vpop.f32.mrb[3].mxu0 }
0x1412 PF: > { %s5605_s19 = sld [smem:[#allocation9_spill]]  ;;  %s5608_s24 = sld [smem:[#allocation29_spill]] }
0x1413   : > { %s5606_s7 = sld [smem:[#allocation7_spill]]  ;;  %s5609_s27 = scalar_lea.vmem [#allocation3], %s4702_s0 }
0x1414   : > { %s3471_s1 = sshll.u32 %s5609_s27, 4  ;;  %s4528_s6 = smov [#allocation3]   ;;  %s3472_s1 = int_to_ptr.vmem [resolvable:$true] %s3471_s1 }
0x1415   : > { %s4416_s18 = scalar_lea.vmem %s3472_s1, 32  ;;  %s4420_s26 = sshll.u32 %s4528_s6, 4  ;;  %s4421_s26 = int_to_ptr.vmem [resolvable:$false] %s4420_s26 }
0x1416   : > { %p4417_p2 = scmp.ne.s32.totalorder %s3472_s1, %s4416_s18  ;;  %s4422_s17 = scalar_lea.vmem %s4421_s26, 64 }
0x1417   : > { %p4423_p6 = scmp.lt.s32.totalorder %s3472_s1, %s4421_s26  ;;  %p4424_p7 = scmp.lt.s32.totalorder %s4422_s17, %s4416_s18 }
0x1418   : > { %s3748_s21 = sshll.u32 %s5605_s19, 5  ;;  %p4418_p4 = pnand %p4417_p2, %p4678_p3 }
0x1419   : > { %s5473_s15 = scalar_lea.hbm %s5608_s24, %s3748_s21  ;;  %s5610_s2 = sand.u32 1, %s5606_s7  }
0x141a   : > { %s3458_s16 = scalar_lea.sflag [#allocation4], %s5610_s2  ;;  %p4419_p5 = pneg %p4418_p4 }
0x141b   : > { %p4425_p8 = por %p4424_p7, %p4423_p6 }
0x141d   : > { %p4426_p10 = pnand %p4425_p8, %p4419_p5 }
0x141f   : > { %4429 = shalt.err (!%p4426_p10)
}
0x1420   : > { %s4430_s0 = scalar_lea.hbm %s5473_s15, 32  ;;  %s4434_s19 = scalar_lea.hbm %s5608_s24, 64 }
0x1421   : > { %p4431_p11 = scmp.ne.s32.totalorder %s5473_s15, %s4430_s0  ;;  %p4435_p0 = scmp.lt.u32.totalorder %s5473_s15, %s5608_s24 }
0x1422   : > { %p4436_p1 = scmp.lt.u32.totalorder %s4434_s19, %s4430_s0  ;;  %p4438_p4 = scmp.lt.u32.totalorder %s4430_s0, %s5473_s15 }
0x1423   : > { %p4432_p12 = pnand %p4431_p11, %p4678_p3 }
0x1424   : > { %p4437_p2 = por %p4436_p1, %p4435_p0 }
0x1425   : > { %p4433_p13 = pneg %p4432_p12 }
0x1426   : > { %p4439_p5 = por %p4438_p4, %p4437_p2 }
0x1428   : > { %p4440_p6 = pnand %p4439_p5, %p4433_p13 }
0x142a   : > { %4443 = shalt.err (!%p4440_p6)
}
0x142b   : > { %4069 = dma.vmem_to_hbm [thread:$0]  (%p4678_p3), %s3472_s1, 32, %s5473_s15, %s3458_s16  }
0x142c PF: > { %s5611_s28 = sld [smem:[#allocation12_spill]]  ;;  %s5612_s30 = sld [smem:[#allocation6_spill]] }
0x1432   : > { %p4075_p7 = scmp.ge.s32.totalorder %s5611_s28, 2  ;;  %s3483_s2 = sand.u32 1, %s5612_s30  }
0x1433   : > { %s3484_s18 = scalar_lea.sflag [#allocation4], %s3483_s2 }
0x1434   : > { %p4072_p8 = pnand %p4075_p7, %p4688_p9 }
0x1436   : > { %4477 = dma.done.wait (!%p4072_p8), %s3484_s18, 32  }
0x1437   : > { %4479 = vsyncadd (!%p4072_p8), %s3484_s18, 4294967264  ;;  %s32_s23 = sadd.s32 1, %s5611_s28   ;;  %s5614_s0 = sld [smem:[#allocation7_spill]] }
0x1438   : > { %p29_p10 = scmp.ge.s32.totalorder %s32_s23, 6   ;;  %s5615_s30 = sld [smem:[#allocation8_spill]] }
0x1439   : > { %s5616_s20 = sld [smem:[#allocation17_spill]]  ;;  %s5617_s21 = sld [smem:[#allocation10_spill]] }
0x143a   : > { %s5618_s1 = sld [smem:[#allocation11_spill]]  ;;  %s5619_s22 = sld [smem:[#allocation13_spill]] }
0x143b   : > { %s5620_s2 = sld [smem:[#allocation15_spill]]  ;;  %31 = sbr.rel (!%p29_p10) target bundleno = 17 (0x11), region = 172 }
0x1442   :  { %3489 = vsyncpa [#allocation4], 1 }
0x1443   :  { %3491 = vsyncpa [#allocation4 + $0x1], 1 }

</bundles_post_ra>
